<compile_context>
chip_gen: v6e
topology: v6e:2x2x1
jax: 0.10.0
libtpu: 0.0.40
codegen_flags: <defaults>
</compile_context>

<pallas_src>
import functools

import jax
import jax.numpy as jnp
from jax.experimental import pallas as pl
from jax.experimental.pallas import tpu as pltpu


# ----------------------------------------------------------------------------
# Fused Pallas kernel
# ----------------------------------------------------------------------------
def _imd_kernel(x_ref, w3_ref, w5_ref, b_ref, o_ref, pad_ref,
                *, bb, h, wc, cdtype):
    """Fused IMDModule_speed forward for a (bb, h, wc) lane-dense slab.

    x_ref  : (bb, h, wc)         input slab, wc = W*C
    w3_ref : (4, 3, wc, wc)      block-tridiagonal 3x3-conv matrices (per dy)
    w5_ref : (4, wc, wc)         block-diagonal 1x1-conv matrices (per branch)
    b_ref  : (5, wc)             bias slabs (c1..c5), f32
    o_ref  : (bb, h, wc)         output slab
    pad_ref: (bb, h+2, wc) f32   row-padded halo scratch (lane-dense)
    """
    f32 = jnp.float32

    # Zero only the two halo rows; the interior is fully overwritten by every
    # stage (all stages produce full-C slabs).  Done every step: cheap and
    # safe under any megacore grid splitting.
    zrow = jnp.zeros((bb, 1, wc), f32)
    pad_ref[:, 0:1, :] = zrow
    pad_ref[:, h + 1:h + 2, :] = zrow

    def conv3x3(y, s, lrelu):
        # y: (bb*h, wc) f32 slab.  Row-pad, then one matmul per dy tap against
        # its block-tridiagonal (wc, wc) weight matrix (dx taps + W-direction
        # zero padding are inside the band structure).
        pad_ref[:, 1:h + 1, :] = y.reshape(bb, h, wc)
        top = pad_ref[:, 0:h, :].reshape(bb * h, wc)          # dy = 0
        bot = pad_ref[:, 2:h + 2, :].reshape(bb * h, wc)      # dy = 2
        acc = jnp.dot(top.astype(cdtype), w3_ref[s, 0],
                      preferred_element_type=f32)
        acc += jnp.dot(y.astype(cdtype), w3_ref[s, 1],        # dy = 1 (center)
                       preferred_element_type=f32)
        acc += jnp.dot(bot.astype(cdtype), w3_ref[s, 2],
                       preferred_element_type=f32)
        acc += b_ref[s:s + 1, :]
        if lrelu:
            acc = jnp.maximum(acc, 0.05 * acc)                # LeakyReLU(0.05)
        return acc

    x = x_ref[...].astype(f32).reshape(bb * h, wc)

    y1 = conv3x3(x, 0, True)     # c1 + lrelu
    y2 = conv3x3(y1, 1, True)    # c2 + lrelu   (distilled rows zeroed in W)
    y3 = conv3x3(y2, 2, True)    # c3 + lrelu
    y4 = conv3x3(y3, 3, False)   # c4           (extra output channels = 0)

    # c5 (1x1 conv over the concatenated distilled channels) as four
    # block-diagonal matmuls -> no concat, no lane slicing.
    out = jnp.dot(y1.astype(cdtype), w5_ref[0], preferred_element_type=f32)
    out += jnp.dot(y2.astype(cdtype), w5_ref[1], preferred_element_type=f32)
    out += jnp.dot(y3.astype(cdtype), w5_ref[2], preferred_element_type=f32)
    out += jnp.dot(y4.astype(cdtype), w5_ref[3], preferred_element_type=f32)
    out += b_ref[4:5, :]
    out += x                                                   # residual add
    o_ref[...] = out.reshape(bb, h, wc).astype(o_ref.dtype)


# ----------------------------------------------------------------------------
# Wrapper-side weight preparation (one-time, outside the kernel)
# ----------------------------------------------------------------------------
def _band_matrices(k_hwio, w):
    """k_hwio: (3, 3, C, C) HWIO kernel.  Returns (3, W*C, W*C): one
    block-tridiagonal matrix per dy tap; block (w_in, w_out) = K[dy, dx] for
    dx = w_in - w_out + 1 in {0,1,2}, else 0 (== width-direction zero pad)."""
    c = k_hwio.shape[-1]
    wi = jnp.arange(w)[:, None]
    wo = jnp.arange(w)[None, :]
    dx = wi - wo + 1                                            # (W, W)
    valid = ((dx >= 0) & (dx <= 2)).astype(k_hwio.dtype)
    dxc = jnp.clip(dx, 0, 2)
    mats = []
    for dy in range(3):
        blocks = k_hwio[dy][dxc] * valid[:, :, None, None]      # (W, W, C, C)
        mats.append(blocks.transpose(0, 2, 1, 3).reshape(w * c, w * c))
    return jnp.stack(mats)                                      # (3, WC, WC)


def _prepare_weights(params, C, dc, W, dtype):
    f32 = jnp.float32
    # Fold the channel split into zero input rows (distilled channels of the
    # previous stage contribute nothing to c2/c3/c4); pad c4's outputs to C.
    k1 = params["c1"]["w"].astype(f32)
    k2 = jnp.pad(params["c2"]["w"].astype(f32), ((0, 0), (0, 0), (dc, 0), (0, 0)))
    k3 = jnp.pad(params["c3"]["w"].astype(f32), ((0, 0), (0, 0), (dc, 0), (0, 0)))
    k4 = jnp.pad(params["c4"]["w"].astype(f32),
                 ((0, 0), (0, 0), (dc, 0), (0, C - dc)))
    w3x3 = jnp.stack([_band_matrices(k, W) for k in (k1, k2, k3, k4)])

    # c5: split the 1x1 weight into four (dc, C) branch blocks, zero-pad to
    # (C, C) (only the distilled rows act), make block-diagonal over W.
    w5 = params["c5"]["w"].astype(f32).reshape(4 * dc, C)
    eye_w = jnp.eye(W, dtype=f32)
    w5_mats = []
    for i in range(4):
        blk = jnp.pad(w5[i * dc:(i + 1) * dc], ((0, C - dc), (0, 0)))
        w5_mats.append(jnp.kron(eye_w, blk))                    # (WC, WC)
    w1x1 = jnp.stack(w5_mats)

    b4 = jnp.pad(params["c4"]["b"].astype(f32), (0, C - dc))
    biases = jnp.stack([jnp.tile(params["c1"]["b"].astype(f32), W),
                        jnp.tile(params["c2"]["b"].astype(f32), W),
                        jnp.tile(params["c3"]["b"].astype(f32), W),
                        jnp.tile(b4, W),
                        jnp.tile(params["c5"]["b"].astype(f32), W)])
    return w3x3.astype(dtype), w1x1.astype(dtype), biases


# ----------------------------------------------------------------------------
# pallas_call wrapper
# ----------------------------------------------------------------------------
def imd_fused(x_nhwc, params, dc, rc, *, block_batch=None, use_bf16=False):
    """x_nhwc: (B, H, W, C).  Returns (B, H, W, C)."""
    del rc  # folded into the zero-padded weights
    B, H, W, C = x_nhwc.shape
    WC = W * C

    if block_batch is None:
        block_batch = max(d for d in range(1, min(B, 8) + 1) if B % d == 0)
    bb = block_batch
    assert B % bb == 0, (B, bb)

    cdtype = jnp.bfloat16 if use_bf16 else jnp.float32
    w3x3, w1x1, biases = _prepare_weights(params, C, dc, W, cdtype)

    x_slab = x_nhwc.reshape(B, H, WC)         # free view: NHWC is contiguous

    kernel = functools.partial(_imd_kernel, bb=bb, h=H, wc=WC, cdtype=cdtype)

    out = pl.pallas_call(
        kernel,
        out_shape=jax.ShapeDtypeStruct((B, H, WC), x_nhwc.dtype),
        grid_spec=pltpu.PrefetchScalarGridSpec(
            num_scalar_prefetch=0,
            grid=(B // bb,),
            in_specs=[
                pl.BlockSpec((bb, H, WC), lambda i: (i, 0, 0)),
                pl.BlockSpec((4, 3, WC, WC), lambda i: (0, 0, 0, 0)),
                pl.BlockSpec((4, WC, WC), lambda i: (0, 0, 0)),
                pl.BlockSpec((5, WC), lambda i: (0, 0)),
            ],
            out_specs=pl.BlockSpec((bb, H, WC), lambda i: (i, 0, 0)),
            scratch_shapes=[pltpu.VMEM((bb, H + 2, WC), jnp.float32)],
        ),
        compiler_params=pltpu.CompilerParams(
            dimension_semantics=("parallel",),
            vmem_limit_bytes=32 * 1024 * 1024,
        ),
    )(x_slab, w3x3, w1x1, biases)
    return out.reshape(B, H, W, C)


# ----------------------------------------------------------------------------
# IMDModule_speed forward (NCHW in / NCHW out, matches the PyTorch module)
# ----------------------------------------------------------------------------
def init_params(key, in_channels, distillation_rate=0.25, dtype=jnp.float32):
    dc = int(in_channels * distillation_rate)
    rc = in_channels - dc
    specs = {
        # (Cout, Cin, kh, kw) -- PyTorch OIHW shapes from the module __init__
        "c1": (in_channels, in_channels, 3, 3),
        "c2": (in_channels, rc, 3, 3),
        "c3": (in_channels, rc, 3, 3),
        "c4": (dc, rc, 3, 3),
        "c5": (in_channels, dc * 4, 1, 1),
    }
    params = {}
    for name, shp in specs.items():
        key, kw, kb = jax.random.split(key, 3)
        w_oihw = (jax.random.normal(kw, shp, dtype) * 0.05).astype(dtype)
        b = (jax.random.normal(kb, (shp[0],), dtype) * 0.05).astype(dtype)
        params[name] = {"w": jnp.transpose(w_oihw, (2, 3, 1, 0)), "b": b}  # HWIO
    return params, dc, rc


def imd_module_speed_forward(params, x_nchw, dc, rc):
    """Replicates IMDModule_speed.forward.  Input/output layout: NCHW."""
    x = jnp.transpose(x_nchw, (0, 2, 3, 1))          # NCHW -> NHWC
    y = imd_fused(x, params, dc, rc)
    return jnp.transpose(y, (0, 3, 1, 2))            # NHWC -> NCHW


# ----------------------------------------------------------------------------
# Pure-JAX reference (for correctness check)
# ----------------------------------------------------------------------------
def _conv_ref(x, w, b, pad):
    y = jax.lax.conv_general_dilated(
        x, w, window_strides=(1, 1), padding=[(pad, pad), (pad, pad)],
        dimension_numbers=("NHWC", "HWIO", "NHWC"))
    return y + b


def reference_forward(params, x_nchw, dc, rc):
    x = jnp.transpose(x_nchw, (0, 2, 3, 1))
    lrelu = lambda v: jnp.where(v > 0, v, 0.05 * v)
    o1 = lrelu(_conv_ref(x, params["c1"]["w"], params["c1"]["b"], 1))
    d1, r1 = o1[..., :dc], o1[..., dc:]
    o2 = lrelu(_conv_ref(r1, params["c2"]["w"], params["c2"]["b"], 1))
    d2, r2 = o2[..., :dc], o2[..., dc:]
    o3 = lrelu(_conv_ref(r2, params["c3"]["w"], params["c3"]["b"], 1))
    d3, r3 = o3[..., :dc], o3[..., dc:]
    o4 = _conv_ref(r3, params["c4"]["w"], params["c4"]["b"], 1)
    out = jnp.concatenate([d1, d2, d3, o4], axis=-1)
    out = _conv_ref(out, params["c5"]["w"], params["c5"]["b"], 0) + x
    return jnp.transpose(out, (0, 3, 1, 2))


# ----------------------------------------------------------------------------
if __name__ == "__main__":
    key = jax.random.PRNGKey(0)
    B, C, H, W = 2, 16, 16, 16            # in_channels=16 -> dc=4, rc=12
    key, kx = jax.random.split(key)
    x = jax.random.normal(kx, (B, C, H, W), jnp.float32)

    params, dc, rc = init_params(key, C)

    fwd = jax.jit(imd_module_speed_forward, static_argnums=(2, 3))
    out = jax.block_until_ready(fwd(params, x, dc, rc))

    ref = jax.block_until_ready(reference_forward(params, x, dc, rc))
    assert out.shape == (B, C, H, W), out.shape
    max_err = float(jnp.max(jnp.abs(out - ref)))
    assert jnp.allclose(out, ref, atol=1e-4, rtol=1e-4), max_err

    print("KERNEL_OK")
</pallas_src>

<mosaic_0001>
module attributes {stable_mosaic.version = 11 : i64} {
  func.func @_imd_kernel(%arg0: i32, %arg1: memref<2x16x256xf32, #tpu.memory_space<vmem>>, %arg2: memref<4x3x256x256xf32, #tpu.memory_space<vmem>>, %arg3: memref<4x256x256xf32, #tpu.memory_space<vmem>>, %arg4: memref<5x256xf32, #tpu.memory_space<vmem>>, %arg5: memref<2x16x256xf32, #tpu.memory_space<vmem>>, %arg6: memref<2x18x256xf32, #tpu.memory_space<vmem>>) attributes {dimension_semantics = [#tpu.dimension_semantics<parallel>], iteration_bounds = array<i64: 1>, scalar_prefetch = 0 : i64, scratch_operands = 1 : i64, tpu.core_type = #tpu.core_type<tc>, window_params = [{transform_indices = @transform_0, window_bounds = array<i64: 2, 16, 256>}, {pipeline_mode = #tpu.pipeline_mode<synchronous>, transform_indices = @transform_1, window_bounds = array<i64: 4, 3, 256, 256>}, {pipeline_mode = #tpu.pipeline_mode<synchronous>, transform_indices = @transform_2, window_bounds = array<i64: 4, 256, 256>}, {pipeline_mode = #tpu.pipeline_mode<synchronous>, transform_indices = @transform_3, window_bounds = array<i64: 5, 256>}, {transform_indices = @transform_4, window_bounds = array<i64: 2, 16, 256>}]} {
    %cst = arith.constant 0.000000e+00 : f32
    %0 = vector.broadcast %cst : f32 to vector<2x1x256xf32>
    %c0 = arith.constant 0 : index
    %c0_0 = arith.constant 0 : index
    %c0_1 = arith.constant 0 : index
    %1 = vector.load %arg6[%c0, %c0_0, %c0_1] : memref<2x18x256xf32, #tpu.memory_space<vmem>>, vector<2x1x256xf32>
    tpu.vector_store %arg6[%c0, %c0_0, %c0_1], %0 {strides = array<i32>} : memref<2x18x256xf32, #tpu.memory_space<vmem>>, vector<2x1x256xf32>,
    %c0_2 = arith.constant 0 : index
    %c17 = arith.constant 17 : index
    %c0_3 = arith.constant 0 : index
    %2 = vector.load %arg6[%c0_2, %c17, %c0_3] : memref<2x18x256xf32, #tpu.memory_space<vmem>>, vector<2x1x256xf32>
    tpu.vector_store %arg6[%c0_2, %c17, %c0_3], %0 {strides = array<i32>} : memref<2x18x256xf32, #tpu.memory_space<vmem>>, vector<2x1x256xf32>,
    %c0_4 = arith.constant 0 : index
    %c0_5 = arith.constant 0 : index
    %c0_6 = arith.constant 0 : index
    %3 = vector.load %arg1[%c0_4, %c0_5, %c0_6] : memref<2x16x256xf32, #tpu.memory_space<vmem>>, vector<2x16x256xf32>
    %4 = vector.shape_cast %3 : vector<2x16x256xf32> to vector<32x256xf32>
    %5 = vector.shape_cast %4 : vector<32x256xf32> to vector<2x16x256xf32>
    %c0_7 = arith.constant 0 : index
    %c1 = arith.constant 1 : index
    %c0_8 = arith.constant 0 : index
    %6 = vector.load %arg6[%c0_7, %c1, %c0_8] : memref<2x18x256xf32, #tpu.memory_space<vmem>>, vector<2x16x256xf32>
    tpu.vector_store %arg6[%c0_7, %c1, %c0_8], %5 {strides = array<i32>} : memref<2x18x256xf32, #tpu.memory_space<vmem>>, vector<2x16x256xf32>,
    %c0_9 = arith.constant 0 : index
    %c0_10 = arith.constant 0 : index
    %c0_11 = arith.constant 0 : index
    %7 = vector.load %arg6[%c0_9, %c0_10, %c0_11] : memref<2x18x256xf32, #tpu.memory_space<vmem>>, vector<2x16x256xf32>
    %8 = vector.shape_cast %7 : vector<2x16x256xf32> to vector<32x256xf32>
    %c0_12 = arith.constant 0 : index
    %c2 = arith.constant 2 : index
    %c0_13 = arith.constant 0 : index
    %9 = vector.load %arg6[%c0_12, %c2, %c0_13] : memref<2x18x256xf32, #tpu.memory_space<vmem>>, vector<2x16x256xf32>
    %10 = vector.shape_cast %9 : vector<2x16x256xf32> to vector<32x256xf32>
    %c0_14 = arith.constant 0 : index
    %c0_15 = arith.constant 0 : index
    %c0_16 = arith.constant 0 : index
    %c0_17 = arith.constant 0 : index
    %11 = vector.load %arg2[%c0_14, %c0_15, %c0_16, %c0_17] : memref<4x3x256x256xf32, #tpu.memory_space<vmem>>, vector<1x1x256x256xf32>
    %12 = vector.shape_cast %11 : vector<1x1x256x256xf32> to vector<256x256xf32>
    %cst_18 = arith.constant dense<0.000000e+00> : vector<32x256xf32>
    %13 = tpu.matmul %8, %12, %cst_18 {dimension_numbers = #tpu.dot_dimension_numbers<[1], [0], [0], [1], [0, 0, 1, 1], [], []>} : vector<32x256xf32>, vector<256x256xf32>, vector<32x256xf32> -> vector<32x256xf32>
    %c0_19 = arith.constant 0 : index
    %c1_20 = arith.constant 1 : index
    %c0_21 = arith.constant 0 : index
    %c0_22 = arith.constant 0 : index
    %14 = vector.load %arg2[%c0_19, %c1_20, %c0_21, %c0_22] : memref<4x3x256x256xf32, #tpu.memory_space<vmem>>, vector<1x1x256x256xf32>
    %15 = vector.shape_cast %14 : vector<1x1x256x256xf32> to vector<256x256xf32>
    %cst_23 = arith.constant dense<0.000000e+00> : vector<32x256xf32>
    %16 = tpu.matmul %4, %15, %cst_23 {dimension_numbers = #tpu.dot_dimension_numbers<[1], [0], [0], [1], [0, 0, 1, 1], [], []>} : vector<32x256xf32>, vector<256x256xf32>, vector<32x256xf32> -> vector<32x256xf32>
    %17 = arith.addf %13, %16 : vector<32x256xf32>
    %c0_24 = arith.constant 0 : index
    %c2_25 = arith.constant 2 : index
    %c0_26 = arith.constant 0 : index
    %c0_27 = arith.constant 0 : index
    %18 = vector.load %arg2[%c0_24, %c2_25, %c0_26, %c0_27] : memref<4x3x256x256xf32, #tpu.memory_space<vmem>>, vector<1x1x256x256xf32>
    %19 = vector.shape_cast %18 : vector<1x1x256x256xf32> to vector<256x256xf32>
    %cst_28 = arith.constant dense<0.000000e+00> : vector<32x256xf32>
    %20 = tpu.matmul %10, %19, %cst_28 {dimension_numbers = #tpu.dot_dimension_numbers<[1], [0], [0], [1], [0, 0, 1, 1], [], []>} : vector<32x256xf32>, vector<256x256xf32>, vector<32x256xf32> -> vector<32x256xf32>
    %21 = arith.addf %17, %20 : vector<32x256xf32>
    %c0_29 = arith.constant 0 : index
    %c0_30 = arith.constant 0 : index
    %22 = vector.load %arg4[%c0_29, %c0_30] : memref<5x256xf32, #tpu.memory_space<vmem>>, vector<1x256xf32>
    %23 = vector.broadcast %22 : vector<1x256xf32> to vector<32x256xf32>
    %24 = arith.addf %21, %23 : vector<32x256xf32>
    %cst_31 = arith.constant 5.000000e-02 : f32
    %25 = vector.broadcast %cst_31 : f32 to vector<32x256xf32>
    %26 = arith.mulf %25, %24 : vector<32x256xf32>
    %27 = arith.maximumf %24, %26 : vector<32x256xf32>
    %28 = vector.shape_cast %27 : vector<32x256xf32> to vector<2x16x256xf32>
    %c0_32 = arith.constant 0 : index
    %c1_33 = arith.constant 1 : index
    %c0_34 = arith.constant 0 : index
    %29 = vector.load %arg6[%c0_32, %c1_33, %c0_34] : memref<2x18x256xf32, #tpu.memory_space<vmem>>, vector<2x16x256xf32>
    tpu.vector_store %arg6[%c0_32, %c1_33, %c0_34], %28 {strides = array<i32>} : memref<2x18x256xf32, #tpu.memory_space<vmem>>, vector<2x16x256xf32>,
    %c0_35 = arith.constant 0 : index
    %c0_36 = arith.constant 0 : index
    %c0_37 = arith.constant 0 : index
    %30 = vector.load %arg6[%c0_35, %c0_36, %c0_37] : memref<2x18x256xf32, #tpu.memory_space<vmem>>, vector<2x16x256xf32>
    %31 = vector.shape_cast %30 : vector<2x16x256xf32> to vector<32x256xf32>
    %c0_38 = arith.constant 0 : index
    %c2_39 = arith.constant 2 : index
    %c0_40 = arith.constant 0 : index
    %32 = vector.load %arg6[%c0_38, %c2_39, %c0_40] : memref<2x18x256xf32, #tpu.memory_space<vmem>>, vector<2x16x256xf32>
    %33 = vector.shape_cast %32 : vector<2x16x256xf32> to vector<32x256xf32>
    %c1_41 = arith.constant 1 : index
    %c0_42 = arith.constant 0 : index
    %c0_43 = arith.constant 0 : index
    %c0_44 = arith.constant 0 : index
    %34 = vector.load %arg2[%c1_41, %c0_42, %c0_43, %c0_44] : memref<4x3x256x256xf32, #tpu.memory_space<vmem>>, vector<1x1x256x256xf32>
    %35 = vector.shape_cast %34 : vector<1x1x256x256xf32> to vector<256x256xf32>
    %cst_45 = arith.constant dense<0.000000e+00> : vector<32x256xf32>
    %36 = tpu.matmul %31, %35, %cst_45 {dimension_numbers = #tpu.dot_dimension_numbers<[1], [0], [0], [1], [0, 0, 1, 1], [], []>} : vector<32x256xf32>, vector<256x256xf32>, vector<32x256xf32> -> vector<32x256xf32>
    %c1_46 = arith.constant 1 : index
    %c1_47 = arith.constant 1 : index
    %c0_48 = arith.constant 0 : index
    %c0_49 = arith.constant 0 : index
    %37 = vector.load %arg2[%c1_46, %c1_47, %c0_48, %c0_49] : memref<4x3x256x256xf32, #tpu.memory_space<vmem>>, vector<1x1x256x256xf32>
    %38 = vector.shape_cast %37 : vector<1x1x256x256xf32> to vector<256x256xf32>
    %cst_50 = arith.constant dense<0.000000e+00> : vector<32x256xf32>
    %39 = tpu.matmul %27, %38, %cst_50 {dimension_numbers = #tpu.dot_dimension_numbers<[1], [0], [0], [1], [0, 0, 1, 1], [], []>} : vector<32x256xf32>, vector<256x256xf32>, vector<32x256xf32> -> vector<32x256xf32>
    %40 = arith.addf %36, %39 : vector<32x256xf32>
    %c1_51 = arith.constant 1 : index
    %c2_52 = arith.constant 2 : index
    %c0_53 = arith.constant 0 : index
    %c0_54 = arith.constant 0 : index
    %41 = vector.load %arg2[%c1_51, %c2_52, %c0_53, %c0_54] : memref<4x3x256x256xf32, #tpu.memory_space<vmem>>, vector<1x1x256x256xf32>
    %42 = vector.shape_cast %41 : vector<1x1x256x256xf32> to vector<256x256xf32>
    %cst_55 = arith.constant dense<0.000000e+00> : vector<32x256xf32>
    %43 = tpu.matmul %33, %42, %cst_55 {dimension_numbers = #tpu.dot_dimension_numbers<[1], [0], [0], [1], [0, 0, 1, 1], [], []>} : vector<32x256xf32>, vector<256x256xf32>, vector<32x256xf32> -> vector<32x256xf32>
    %44 = arith.addf %40, %43 : vector<32x256xf32>
    %c1_56 = arith.constant 1 : index
    %c0_57 = arith.constant 0 : index
    %45 = vector.load %arg4[%c1_56, %c0_57] : memref<5x256xf32, #tpu.memory_space<vmem>>, vector<1x256xf32>
    %46 = vector.broadcast %45 : vector<1x256xf32> to vector<32x256xf32>
    %47 = arith.addf %44, %46 : vector<32x256xf32>
    %cst_58 = arith.constant 5.000000e-02 : f32
    %48 = vector.broadcast %cst_58 : f32 to vector<32x256xf32>
    %49 = arith.mulf %48, %47 : vector<32x256xf32>
    %50 = arith.maximumf %47, %49 : vector<32x256xf32>
    %51 = vector.shape_cast %50 : vector<32x256xf32> to vector<2x16x256xf32>
    %c0_59 = arith.constant 0 : index
    %c1_60 = arith.constant 1 : index
    %c0_61 = arith.constant 0 : index
    %52 = vector.load %arg6[%c0_59, %c1_60, %c0_61] : memref<2x18x256xf32, #tpu.memory_space<vmem>>, vector<2x16x256xf32>
    tpu.vector_store %arg6[%c0_59, %c1_60, %c0_61], %51 {strides = array<i32>} : memref<2x18x256xf32, #tpu.memory_space<vmem>>, vector<2x16x256xf32>,
    %c0_62 = arith.constant 0 : index
    %c0_63 = arith.constant 0 : index
    %c0_64 = arith.constant 0 : index
    %53 = vector.load %arg6[%c0_62, %c0_63, %c0_64] : memref<2x18x256xf32, #tpu.memory_space<vmem>>, vector<2x16x256xf32>
    %54 = vector.shape_cast %53 : vector<2x16x256xf32> to vector<32x256xf32>
    %c0_65 = arith.constant 0 : index
    %c2_66 = arith.constant 2 : index
    %c0_67 = arith.constant 0 : index
    %55 = vector.load %arg6[%c0_65, %c2_66, %c0_67] : memref<2x18x256xf32, #tpu.memory_space<vmem>>, vector<2x16x256xf32>
    %56 = vector.shape_cast %55 : vector<2x16x256xf32> to vector<32x256xf32>
    %c2_68 = arith.constant 2 : index
    %c0_69 = arith.constant 0 : index
    %c0_70 = arith.constant 0 : index
    %c0_71 = arith.constant 0 : index
    %57 = vector.load %arg2[%c2_68, %c0_69, %c0_70, %c0_71] : memref<4x3x256x256xf32, #tpu.memory_space<vmem>>, vector<1x1x256x256xf32>
    %58 = vector.shape_cast %57 : vector<1x1x256x256xf32> to vector<256x256xf32>
    %cst_72 = arith.constant dense<0.000000e+00> : vector<32x256xf32>
    %59 = tpu.matmul %54, %58, %cst_72 {dimension_numbers = #tpu.dot_dimension_numbers<[1], [0], [0], [1], [0, 0, 1, 1], [], []>} : vector<32x256xf32>, vector<256x256xf32>, vector<32x256xf32> -> vector<32x256xf32>
    %c2_73 = arith.constant 2 : index
    %c1_74 = arith.constant 1 : index
    %c0_75 = arith.constant 0 : index
    %c0_76 = arith.constant 0 : index
    %60 = vector.load %arg2[%c2_73, %c1_74, %c0_75, %c0_76] : memref<4x3x256x256xf32, #tpu.memory_space<vmem>>, vector<1x1x256x256xf32>
    %61 = vector.shape_cast %60 : vector<1x1x256x256xf32> to vector<256x256xf32>
    %cst_77 = arith.constant dense<0.000000e+00> : vector<32x256xf32>
    %62 = tpu.matmul %50, %61, %cst_77 {dimension_numbers = #tpu.dot_dimension_numbers<[1], [0], [0], [1], [0, 0, 1, 1], [], []>} : vector<32x256xf32>, vector<256x256xf32>, vector<32x256xf32> -> vector<32x256xf32>
    %63 = arith.addf %59, %62 : vector<32x256xf32>
    %c2_78 = arith.constant 2 : index
    %c2_79 = arith.constant 2 : index
    %c0_80 = arith.constant 0 : index
    %c0_81 = arith.constant 0 : index
    %64 = vector.load %arg2[%c2_78, %c2_79, %c0_80, %c0_81] : memref<4x3x256x256xf32, #tpu.memory_space<vmem>>, vector<1x1x256x256xf32>
    %65 = vector.shape_cast %64 : vector<1x1x256x256xf32> to vector<256x256xf32>
    %cst_82 = arith.constant dense<0.000000e+00> : vector<32x256xf32>
    %66 = tpu.matmul %56, %65, %cst_82 {dimension_numbers = #tpu.dot_dimension_numbers<[1], [0], [0], [1], [0, 0, 1, 1], [], []>} : vector<32x256xf32>, vector<256x256xf32>, vector<32x256xf32> -> vector<32x256xf32>
    %67 = arith.addf %63, %66 : vector<32x256xf32>
    %c2_83 = arith.constant 2 : index
    %c0_84 = arith.constant 0 : index
    %68 = vector.load %arg4[%c2_83, %c0_84] : memref<5x256xf32, #tpu.memory_space<vmem>>, vector<1x256xf32>
    %69 = vector.broadcast %68 : vector<1x256xf32> to vector<32x256xf32>
    %70 = arith.addf %67, %69 : vector<32x256xf32>
    %cst_85 = arith.constant 5.000000e-02 : f32
    %71 = vector.broadcast %cst_85 : f32 to vector<32x256xf32>
    %72 = arith.mulf %71, %70 : vector<32x256xf32>
    %73 = arith.maximumf %70, %72 : vector<32x256xf32>
    %74 = vector.shape_cast %73 : vector<32x256xf32> to vector<2x16x256xf32>
    %c0_86 = arith.constant 0 : index
    %c1_87 = arith.constant 1 : index
    %c0_88 = arith.constant 0 : index
    %75 = vector.load %arg6[%c0_86, %c1_87, %c0_88] : memref<2x18x256xf32, #tpu.memory_space<vmem>>, vector<2x16x256xf32>
    tpu.vector_store %arg6[%c0_86, %c1_87, %c0_88], %74 {strides = array<i32>} : memref<2x18x256xf32, #tpu.memory_space<vmem>>, vector<2x16x256xf32>,
    %c0_89 = arith.constant 0 : index
    %c0_90 = arith.constant 0 : index
    %c0_91 = arith.constant 0 : index
    %76 = vector.load %arg6[%c0_89, %c0_90, %c0_91] : memref<2x18x256xf32, #tpu.memory_space<vmem>>, vector<2x16x256xf32>
    %77 = vector.shape_cast %76 : vector<2x16x256xf32> to vector<32x256xf32>
    %c0_92 = arith.constant 0 : index
    %c2_93 = arith.constant 2 : index
    %c0_94 = arith.constant 0 : index
    %78 = vector.load %arg6[%c0_92, %c2_93, %c0_94] : memref<2x18x256xf32, #tpu.memory_space<vmem>>, vector<2x16x256xf32>
    %79 = vector.shape_cast %78 : vector<2x16x256xf32> to vector<32x256xf32>
    %c3 = arith.constant 3 : index
    %c0_95 = arith.constant 0 : index
    %c0_96 = arith.constant 0 : index
    %c0_97 = arith.constant 0 : index
    %80 = vector.load %arg2[%c3, %c0_95, %c0_96, %c0_97] : memref<4x3x256x256xf32, #tpu.memory_space<vmem>>, vector<1x1x256x256xf32>
    %81 = vector.shape_cast %80 : vector<1x1x256x256xf32> to vector<256x256xf32>
    %cst_98 = arith.constant dense<0.000000e+00> : vector<32x256xf32>
    %82 = tpu.matmul %77, %81, %cst_98 {dimension_numbers = #tpu.dot_dimension_numbers<[1], [0], [0], [1], [0, 0, 1, 1], [], []>} : vector<32x256xf32>, vector<256x256xf32>, vector<32x256xf32> -> vector<32x256xf32>
    %c3_99 = arith.constant 3 : index
    %c1_100 = arith.constant 1 : index
    %c0_101 = arith.constant 0 : index
    %c0_102 = arith.constant 0 : index
    %83 = vector.load %arg2[%c3_99, %c1_100, %c0_101, %c0_102] : memref<4x3x256x256xf32, #tpu.memory_space<vmem>>, vector<1x1x256x256xf32>
    %84 = vector.shape_cast %83 : vector<1x1x256x256xf32> to vector<256x256xf32>
    %cst_103 = arith.constant dense<0.000000e+00> : vector<32x256xf32>
    %85 = tpu.matmul %73, %84, %cst_103 {dimension_numbers = #tpu.dot_dimension_numbers<[1], [0], [0], [1], [0, 0, 1, 1], [], []>} : vector<32x256xf32>, vector<256x256xf32>, vector<32x256xf32> -> vector<32x256xf32>
    %86 = arith.addf %82, %85 : vector<32x256xf32>
    %c3_104 = arith.constant 3 : index
    %c2_105 = arith.constant 2 : index
    %c0_106 = arith.constant 0 : index
    %c0_107 = arith.constant 0 : index
    %87 = vector.load %arg2[%c3_104, %c2_105, %c0_106, %c0_107] : memref<4x3x256x256xf32, #tpu.memory_space<vmem>>, vector<1x1x256x256xf32>
    %88 = vector.shape_cast %87 : vector<1x1x256x256xf32> to vector<256x256xf32>
    %cst_108 = arith.constant dense<0.000000e+00> : vector<32x256xf32>
    %89 = tpu.matmul %79, %88, %cst_108 {dimension_numbers = #tpu.dot_dimension_numbers<[1], [0], [0], [1], [0, 0, 1, 1], [], []>} : vector<32x256xf32>, vector<256x256xf32>, vector<32x256xf32> -> vector<32x256xf32>
    %90 = arith.addf %86, %89 : vector<32x256xf32>
    %c3_109 = arith.constant 3 : index
    %c0_110 = arith.constant 0 : index
    %91 = vector.load %arg4[%c3_109, %c0_110] : memref<5x256xf32, #tpu.memory_space<vmem>>, vector<1x256xf32>
    %92 = vector.broadcast %91 : vector<1x256xf32> to vector<32x256xf32>
    %93 = arith.addf %90, %92 : vector<32x256xf32>
    %c0_111 = arith.constant 0 : index
    %c0_112 = arith.constant 0 : index
    %c0_113 = arith.constant 0 : index
    %94 = vector.load %arg3[%c0_111, %c0_112, %c0_113] : memref<4x256x256xf32, #tpu.memory_space<vmem>>, vector<1x256x256xf32>
    %95 = vector.shape_cast %94 : vector<1x256x256xf32> to vector<256x256xf32>
    %cst_114 = arith.constant dense<0.000000e+00> : vector<32x256xf32>
    %96 = tpu.matmul %27, %95, %cst_114 {dimension_numbers = #tpu.dot_dimension_numbers<[1], [0], [0], [1], [0, 0, 1, 1], [], []>} : vector<32x256xf32>, vector<256x256xf32>, vector<32x256xf32> -> vector<32x256xf32>
    %c1_115 = arith.constant 1 : index
    %c0_116 = arith.constant 0 : index
    %c0_117 = arith.constant 0 : index
    %97 = vector.load %arg3[%c1_115, %c0_116, %c0_117] : memref<4x256x256xf32, #tpu.memory_space<vmem>>, vector<1x256x256xf32>
    %98 = vector.shape_cast %97 : vector<1x256x256xf32> to vector<256x256xf32>
    %cst_118 = arith.constant dense<0.000000e+00> : vector<32x256xf32>
    %99 = tpu.matmul %50, %98, %cst_118 {dimension_numbers = #tpu.dot_dimension_numbers<[1], [0], [0], [1], [0, 0, 1, 1], [], []>} : vector<32x256xf32>, vector<256x256xf32>, vector<32x256xf32> -> vector<32x256xf32>
    %100 = arith.addf %96, %99 : vector<32x256xf32>
    %c2_119 = arith.constant 2 : index
    %c0_120 = arith.constant 0 : index
    %c0_121 = arith.constant 0 : index
    %101 = vector.load %arg3[%c2_119, %c0_120, %c0_121] : memref<4x256x256xf32, #tpu.memory_space<vmem>>, vector<1x256x256xf32>
    %102 = vector.shape_cast %101 : vector<1x256x256xf32> to vector<256x256xf32>
    %cst_122 = arith.constant dense<0.000000e+00> : vector<32x256xf32>
    %103 = tpu.matmul %73, %102, %cst_122 {dimension_numbers = #tpu.dot_dimension_numbers<[1], [0], [0], [1], [0, 0, 1, 1], [], []>} : vector<32x256xf32>, vector<256x256xf32>, vector<32x256xf32> -> vector<32x256xf32>
    %104 = arith.addf %100, %103 : vector<32x256xf32>
    %c3_123 = arith.constant 3 : index
    %c0_124 = arith.constant 0 : index
    %c0_125 = arith.constant 0 : index
    %105 = vector.load %arg3[%c3_123, %c0_124, %c0_125] : memref<4x256x256xf32, #tpu.memory_space<vmem>>, vector<1x256x256xf32>
    %106 = vector.shape_cast %105 : vector<1x256x256xf32> to vector<256x256xf32>
    %cst_126 = arith.constant dense<0.000000e+00> : vector<32x256xf32>
    %107 = tpu.matmul %93, %106, %cst_126 {dimension_numbers = #tpu.dot_dimension_numbers<[1], [0], [0], [1], [0, 0, 1, 1], [], []>} : vector<32x256xf32>, vector<256x256xf32>, vector<32x256xf32> -> vector<32x256xf32>
    %108 = arith.addf %104, %107 : vector<32x256xf32>
    %c4 = arith.constant 4 : index
    %c0_127 = arith.constant 0 : index
    %109 = vector.load %arg4[%c4, %c0_127] : memref<5x256xf32, #tpu.memory_space<vmem>>, vector<1x256xf32>
    %110 = vector.broadcast %109 : vector<1x256xf32> to vector<32x256xf32>
    %111 = arith.addf %108, %110 : vector<32x256xf32>
    %112 = arith.addf %111, %4 : vector<32x256xf32>
    %113 = vector.shape_cast %112 : vector<32x256xf32> to vector<2x16x256xf32>
    %c0_128 = arith.constant 0 : index
    %c0_129 = arith.constant 0 : index
    %c0_130 = arith.constant 0 : index
    %114 = vector.load %arg5[%c0_128, %c0_129, %c0_130] : memref<2x16x256xf32, #tpu.memory_space<vmem>>, vector<2x16x256xf32>
    tpu.vector_store %arg5[%c0_128, %c0_129, %c0_130], %113 {strides = array<i32>} : memref<2x16x256xf32, #tpu.memory_space<vmem>>, vector<2x16x256xf32>,
    return
  }
  func.func @transform_0(%arg0: i32) -> (i32, i32, i32) {
    %c0_i32 = arith.constant 0 : i32
    %c0_i32_0 = arith.constant 0 : i32
    %c0_i32_1 = arith.constant 0 : i32
    return %arg0, %c0_i32, %c0_i32_0 : i32, i32, i32
  }
  func.func @transform_1(%arg0: i32) -> (i32, i32, i32, i32) {
    %c0_i32 = arith.constant 0 : i32
    %c0_i32_0 = arith.constant 0 : i32
    %c0_i32_1 = arith.constant 0 : i32
    %c0_i32_2 = arith.constant 0 : i32
    %c0_i32_3 = arith.constant 0 : i32
    return %c0_i32, %c0_i32_0, %c0_i32_1, %c0_i32_2 : i32, i32, i32, i32
  }
  func.func @transform_2(%arg0: i32) -> (i32, i32, i32) {
    %c0_i32 = arith.constant 0 : i32
    %c0_i32_0 = arith.constant 0 : i32
    %c0_i32_1 = arith.constant 0 : i32
    %c0_i32_2 = arith.constant 0 : i32
    return %c0_i32, %c0_i32_0, %c0_i32_1 : i32, i32, i32
  }
  func.func @transform_3(%arg0: i32) -> (i32, i32) {
    %c0_i32 = arith.constant 0 : i32
    %c0_i32_0 = arith.constant 0 : i32
    %c0_i32_1 = arith.constant 0 : i32
    return %c0_i32, %c0_i32_0 : i32, i32
  }
  func.func @transform_4(%arg0: i32) -> (i32, i32, i32) {
    %c0_i32 = arith.constant 0 : i32
    %c0_i32_0 = arith.constant 0 : i32
    %c0_i32_1 = arith.constant 0 : i32
    return %arg0, %c0_i32, %c0_i32_0 : i32, i32, i32
  }
}

</mosaic_0001>

<bundles_post_ra>
// kernel: tile.40
= control target key start
LH: loop header
LB: loop body
LE: loop exit
PB: predicated region body
PF: predicated region fallthrough
CT: control target
= control target key end

     0   :  { %s28_s0 = inlined_call_operand.vmem [shape: f32[16], index: 0, kind: input, shape index: {}]   ;;  %s29_s1 = inlined_call_operand.vmem [shape: f32[16,16], index: 1, kind: output, shape index: {}]  }
   0x1   :  { %v4_v0 = vld [vmem:[%s28_s0] ss:$0 sm:$0xff] }
   0x2   :  { %5 = vst [vmem:[%s29_s1] sm:$0xff] %v4_v0  ;;  %8 = vst [vmem:[%s29_s1 + $0x8] sm:$0xff] %v4_v0 }

// kernel: tile.48
= control target key start
LH: loop header
LB: loop body
LE: loop exit
PB: predicated region body
PF: predicated region fallthrough
CT: control target
= control target key end

     0   :  { %s7_s6 = smov 3  ;;  %s21_s9 = smov 3  ;;  %vm4_vm0 = vcmask 130048   ;;  %vm11_vm1 = vcmask 1048448   ;;  %vm18_vm2 = vcmask 917248   ;;  %vm25_vm3 = vcmask 786048   ;;  %s131_s0 = inlined_call_operand.vmem [shape: f32[16,16], index: 0, kind: input, shape index: {}]   ;;  %s132_s1 = inlined_call_operand.vmem [shape: f32[1,256], index: 1, kind: output, shape index: {}]  }
   0x1   :  { %v69_v0 = vld [vmem:[%s131_s0 + $0x7] ss:$8 sm:%s7_s6]   ;;  %s84_s10 = smov 112   ;;  %v71_v1 = vld [vmem:[%s131_s0 + $0x5] ss:$8 sm:%s21_s9]   ;;  %s14_s13 = smov 3 }
   0x2   :  { %9 = vrot.lane.b32.xlu0 %v69_v0, %s84_s10  ;;  %s85_s14 = smov 80   ;;  %v70_v2 = vld [vmem:[%s131_s0 + $0x6] ss:$8 sm:%s14_s13]   ;;  %s28_s17 = smov 3  ;;  %vm32_vm4 = vcmask 654848   ;;  %vm39_vm5 = vcmask 523648  }
   0x3   :  { %23 = vrot.lane.b32.xlu1 %v71_v1, %s85_s14  ;;  %v72_v3 = vld [vmem:[%s131_s0 + $0x4] ss:$8 sm:%s28_s17]   ;;  %s35_s20 = smov 3  ;;  %s42_s21 = smov 3  ;;  %vm46_vm6 = vcmask 392448   ;;  %vm53_vm7 = vcmask 261248  }
   0x4   :  { %s86_s22 = smov 96   ;;  %s87_s23 = smov 64   ;;  %v73_v4 = vld [vmem:[%s131_s0 + $0x3] ss:$8 sm:%s35_s20]   ;;  %v74_v5 = vld [vmem:[%s131_s0 + $0x2] ss:$8 sm:%s42_s21]  }
   0x5   :  { %s2_s26 = smov 3  ;;  %s49_s29 = smov 3 }
   0x6   :  { %16 = vrot.lane.b32.xlu0 %v70_v2, %s86_s22  ;;  %v3_v6 = vld [vmem:[%s131_s0] ss:$8 sm:%s2_s26]   ;;  %s88_s3 = smov 48   ;;  %s89_s4 = smov 32  }
   0x7   :  { %30 = vrot.lane.b32.xlu1 %v72_v3, %s87_s23  ;;  %5 = vst.msk [vmem:[#allocation0] ss:$8 sm:$0x3] %vm4_vm0, %v3_v6   ;;  %v75_v7 = vld [vmem:[%s131_s0 + $0x1] ss:$8 sm:%s49_s29]   ;;  %s90_s0 = smov 16  }
   0xa   :  { %37 = vrot.lane.b32.xlu0 %v73_v4, %s88_s3 }
   0xb   :  { %44 = vrot.lane.b32.xlu1 %v74_v5, %s89_s4 }
   0xe   :  { %51 = vrot.lane.b32.xlu0 %v75_v7, %s90_s0 }
  0x74   :  { %v10_v8 = vpop.permute.xlu0 %9  }
  0x75   :  { %12 = vst.msk [vmem:[#allocation0] ss:$8 sm:$0x3] %vm11_vm1, %v10_v8   ;;  %v24_v9 = vpop.permute.xlu1 %23  }
  0x78   :  { %v17_v10 = vpop.permute.xlu0 %16  }
  0x79   :  { %19 = vst.msk [vmem:[#allocation0] ss:$8 sm:$0x3] %vm18_vm2, %v17_v10   ;;  %v31_v11 = vpop.permute.xlu1 %30  }
  0x7a   :  { %26 = vst.msk [vmem:[#allocation0] ss:$8 sm:$0x3] %vm25_vm3, %v24_v9  }
  0x7b   :  { %33 = vst.msk [vmem:[#allocation0] ss:$8 sm:$0x3] %vm32_vm4, %v31_v11  }
  0x7c   :  { %v38_v12 = vpop.permute.xlu0 %37  }
  0x7d   :  { %40 = vst.msk [vmem:[#allocation0] ss:$8 sm:$0x3] %vm39_vm5, %v38_v12   ;;  %v45_v13 = vpop.permute.xlu1 %44  }
  0x7e   :  { %47 = vst.msk [vmem:[#allocation0] ss:$8 sm:$0x3] %vm46_vm6, %v45_v13  }
  0x80   :  { %v52_v14 = vpop.permute.xlu0 %51  }
  0x81   :  { %54 = vst.msk [vmem:[#allocation0] ss:$8 sm:$0x3] %vm53_vm7, %v52_v14  }
  0x88   :  { %v59_v15 = vld [vmem:[#allocation0] sm:$0x1]  ;;  %v64_v16 = vld [vmem:[#allocation0 + $0x8] sm:$0x1] }
  0x89   :  { %62 = vst [vmem:[%s132_s1] sm:$0x1] %v59_v15  ;;  %76 = vst [vmem:[%s132_s1 + $0x1] sm:$0x1] %v64_v16 }

// kernel: imd_module_speed_forward.1
= control target key start
LH: loop header
LB: loop body
LE: loop exit
PB: predicated region body
PF: predicated region fallthrough
CT: control target
= control target key end

     0   :  { %v17_v0 = vlaneseq  ;;  %v4033_v10 = vmov 0.0   ;;  %vm48_vm1 = vcmask 1040384   ;;  %vm113_vm2 = vcmask 1045504   ;;  %s7514_s1 = inlined_call_operand.vmem [shape: f32[4,3,256,256], index: 1, kind: input, shape index: {}]   ;;  %s7515_s0 = inlined_call_operand.vmem [shape: f32[2,16,256], index: 0, kind: input, shape index: {}]   ;;  %s7516_s3 = inlined_call_operand.vmem [shape: f32[5,256], index: 3, kind: input, shape index: {}]   ;;  %s7517_s2 = inlined_call_operand.vmem [shape: f32[4,256,256], index: 2, kind: input, shape index: {}]   ;;  %s7518_s4 = inlined_call_operand.vmem [shape: f32[2,16,256], index: 4, kind: output, shape index: {}]  }
   0x1   :  { %v3155_v1 = vld [vmem:[%s7514_s1 + $0x2f8] sm:$0xff]  ;;  %v3154_v3 = vld [vmem:[%s7514_s1 + $0x2f0] sm:$0xff]  ;;  %v3153_v5 = vld [vmem:[%s7514_s1 + $0x2e8] sm:$0xff] }
   0x2   :  { %v173_v2 = vld [vmem:[%s7514_s1 + $0xf8] sm:$0xff]  ;;  %271 = vmatprep.subr.mxu0 %v3155_v1  ;;  %v172_v4 = vld [vmem:[%s7514_s1 + $0xf0] sm:$0xff]  ;;  %v171_v6 = vld [vmem:[%s7514_s1 + $0xe8] sm:$0xff]  ;;  %vm19_vm0 = vcmp.lt.s32.totalorder %v17_v0, 256 }
   0x3   :  { %360 = vmatprep.subr.mxu1 %v173_v2  ;;  %272 = vmatpush1.msra.mxu0 %v3154_v3  ;;  %v3152_v7 = vld [vmem:[%s7514_s1 + $0x2e0] sm:$0xff]  ;;  %v3151_v9 = vld [vmem:[%s7514_s1 + $0x2d8] sm:$0xff]  ;;  %21 = vst.msk [vmem:[#allocation2] ss:$8 sm:$0x3] %vm19_vm0, %v4033_v10  ;;  %v3150_v12 = vld [vmem:[%s7514_s1 + $0x2d0] sm:$0xff] }
   0x4   :  { %361 = vmatpush1.msra.mxu1 %v172_v4  ;;  %v170_v8 = vld [vmem:[%s7514_s1 + $0xe0] sm:$0xff]  ;;  %24 = vst.msk [vmem:[#allocation2 + $0x30] ss:$8 sm:$0x3] %vm19_vm0, %v4033_v10  ;;  %273 = vmatprep.subr.mxu0 %v3153_v5  ;;  %v169_v11 = vld [vmem:[%s7514_s1 + $0xd8] sm:$0xff]  ;;  %v168_v13 = vld [vmem:[%s7514_s1 + $0xd0] sm:$0xff] }
   0x5   :  { %27 = vst.msk [vmem:[#allocation2 + $0x21] ss:$8 sm:$0x3] %vm19_vm0, %v4033_v10  ;;  %30 = vst.msk [vmem:[#allocation2 + $0x51] ss:$8 sm:$0x3] %vm19_vm0, %v4033_v10  ;;  %362 = vmatprep.subr.mxu1 %v171_v6  ;;  %274 = vmatpush1.msra.mxu0 %v3152_v7 }
   0x6   :  { %363 = vmatpush1.msra.mxu1 %v170_v8  ;;  %v3149_v14 = vld [vmem:[%s7514_s1 + $0x2c8] sm:$0xff]  ;;  %275 = vmatprep.subr.mxu0 %v3151_v9  ;;  %v3148_v16 = vld [vmem:[%s7514_s1 + $0x2c0] sm:$0xff]  ;;  %v3147_v18 = vld [vmem:[%s7514_s1 + $0x2b8] sm:$0xff] }
   0x7   :  { %v167_v15 = vld [vmem:[%s7514_s1 + $0xc8] sm:$0xff]  ;;  %364 = vmatprep.subr.mxu1 %v169_v11  ;;  %v166_v17 = vld [vmem:[%s7514_s1 + $0xc0] sm:$0xff]  ;;  %276 = vmatpush1.msra.mxu0 %v3150_v12  ;;  %v165_v19 = vld [vmem:[%s7514_s1 + $0xb8] sm:$0xff] }
   0x8   :  { %365 = vmatpush1.msra.mxu1 %v168_v13  ;;  %277 = vmatprep.subr.mxu0 %v3149_v14  ;;  %v3146_v20 = vld [vmem:[%s7514_s1 + $0x2b0] sm:$0xff]  ;;  %v3145_v22 = vld [vmem:[%s7514_s1 + $0x2a8] sm:$0xff]  ;;  %v3144_v24 = vld [vmem:[%s7514_s1 + $0x2a0] sm:$0xff] }
   0x9   :  { %366 = vmatprep.subr.mxu1 %v167_v15  ;;  %v164_v21 = vld [vmem:[%s7514_s1 + $0xb0] sm:$0xff]  ;;  %278 = vmatpush1.msra.mxu0 %v3148_v16  ;;  %v163_v23 = vld [vmem:[%s7514_s1 + $0xa8] sm:$0xff]  ;;  %v162_v25 = vld [vmem:[%s7514_s1 + $0xa0] sm:$0xff] }
   0xa   :  { %367 = vmatpush1.msra.mxu1 %v166_v17  ;;  %279 = vmatprep.subr.mxu0 %v3147_v18  ;;  %v3143_v26 = vld [vmem:[%s7514_s1 + $0x298] sm:$0xff]  ;;  %v3142_v28 = vld [vmem:[%s7514_s1 + $0x290] sm:$0xff]  ;;  %v3141_v30 = vld [vmem:[%s7514_s1 + $0x288] sm:$0xff] }
   0xb   :  { %368 = vmatprep.subr.mxu1 %v165_v19  ;;  %280 = vmatpush1.msra.mxu0 %v3146_v20  ;;  %v161_v27 = vld [vmem:[%s7514_s1 + $0x98] sm:$0xff]  ;;  %v160_v29 = vld [vmem:[%s7514_s1 + $0x90] sm:$0xff]  ;;  %v159_v31 = vld [vmem:[%s7514_s1 + $0x88] sm:$0xff] }
   0xc   :  { %369 = vmatpush1.msra.mxu1 %v164_v21  ;;  %281 = vmatprep.subr.mxu0 %v3145_v22  ;;  %v3140_v32 = vld [vmem:[%s7514_s1 + $0x280] sm:$0xff]  ;;  %v3139_v34 = vld [vmem:[%s7514_s1 + $0x278] sm:$0xff]  ;;  %v3138_v36 = vld [vmem:[%s7514_s1 + $0x270] sm:$0xff] }
   0xd   :  { %370 = vmatprep.subr.mxu1 %v163_v23  ;;  %282 = vmatpush1.msra.mxu0 %v3144_v24  ;;  %v158_v33 = vld [vmem:[%s7514_s1 + $0x80] sm:$0xff]  ;;  %v157_v35 = vld [vmem:[%s7514_s1 + $0x78] sm:$0xff]  ;;  %v156_v37 = vld [vmem:[%s7514_s1 + $0x70] sm:$0xff] }
   0xe   :  { %371 = vmatpush1.msra.mxu1 %v162_v25  ;;  %283 = vmatprep.subr.mxu0 %v3143_v26  ;;  %v3137_v38 = vld [vmem:[%s7514_s1 + $0x268] sm:$0xff]  ;;  %v3136_v40 = vld [vmem:[%s7514_s1 + $0x260] sm:$0xff]  ;;  %v3135_v42 = vld [vmem:[%s7514_s1 + $0x258] sm:$0xff] }
   0xf   :  { %372 = vmatprep.subr.mxu1 %v161_v27  ;;  %284 = vmatpush1.msra.mxu0 %v3142_v28  ;;  %v155_v39 = vld [vmem:[%s7514_s1 + $0x68] sm:$0xff]  ;;  %v154_v41 = vld [vmem:[%s7514_s1 + $0x60] sm:$0xff]  ;;  %v153_v43 = vld [vmem:[%s7514_s1 + $0x58] sm:$0xff] }
  0x10   :  { %373 = vmatpush1.msra.mxu1 %v160_v29  ;;  %285 = vmatprep.subr.mxu0 %v3141_v30  ;;  %v3134_v44 = vld [vmem:[%s7514_s1 + $0x250] sm:$0xff]  ;;  %v3133_v46 = vld [vmem:[%s7514_s1 + $0x248] sm:$0xff]  ;;  %v3132_v48 = vld [vmem:[%s7514_s1 + $0x240] sm:$0xff] }
  0x11   :  { %374 = vmatprep.subr.mxu1 %v159_v31  ;;  %286 = vmatpush1.msra.mxu0 %v3140_v32  ;;  %v152_v45 = vld [vmem:[%s7514_s1 + $0x50] sm:$0xff]  ;;  %v151_v47 = vld [vmem:[%s7514_s1 + $0x48] sm:$0xff]  ;;  %v150_v49 = vld [vmem:[%s7514_s1 + $0x40] sm:$0xff] }
  0x12   :  { %375 = vmatpush1.msra.mxu1 %v158_v33  ;;  %287 = vmatprep.subr.mxu0 %v3139_v34  ;;  %v3131_v50 = vld [vmem:[%s7514_s1 + $0x238] sm:$0xff]  ;;  %v3130_v52 = vld [vmem:[%s7514_s1 + $0x230] sm:$0xff]  ;;  %v3129_v54 = vld [vmem:[%s7514_s1 + $0x228] sm:$0xff] }
  0x13   :  { %376 = vmatprep.subr.mxu1 %v157_v35  ;;  %288 = vmatpush1.msra.mxu0 %v3138_v36  ;;  %v149_v51 = vld [vmem:[%s7514_s1 + $0x38] sm:$0xff]  ;;  %v148_v53 = vld [vmem:[%s7514_s1 + $0x30] sm:$0xff]  ;;  %v147_v55 = vld [vmem:[%s7514_s1 + $0x28] sm:$0xff] }
  0x14   :  { %377 = vmatpush1.msra.mxu1 %v156_v37  ;;  %289 = vmatprep.subr.mxu0 %v3137_v38  ;;  %v3128_v56 = vld [vmem:[%s7514_s1 + $0x220] sm:$0xff]  ;;  %v3127_v58 = vld [vmem:[%s7514_s1 + $0x218] sm:$0xff]  ;;  %v3126_v60 = vld [vmem:[%s7514_s1 + $0x210] sm:$0xff] }
  0x15   :  { %378 = vmatprep.subr.mxu1 %v155_v39  ;;  %290 = vmatpush1.msra.mxu0 %v3136_v40  ;;  %v146_v57 = vld [vmem:[%s7514_s1 + $0x20] sm:$0xff]  ;;  %v145_v59 = vld [vmem:[%s7514_s1 + $0x18] sm:$0xff]  ;;  %v144_v61 = vld [vmem:[%s7514_s1 + $0x10] sm:$0xff] }
  0x16   :  { %379 = vmatpush1.msra.mxu1 %v154_v41  ;;  %291 = vmatprep.subr.mxu0 %v3135_v42  ;;  %v3125_v62 = vld [vmem:[%s7514_s1 + $0x208] sm:$0xff]  ;;  %v3124_v1 = vld [vmem:[%s7514_s1 + $0x200] sm:$0xff]  ;;  %v3187_v3 = vld [vmem:[%s7514_s1 + $0x3f8] sm:$0xff] }
  0x17   :  { %380 = vmatprep.subr.mxu1 %v153_v43  ;;  %292 = vmatpush1.msra.mxu0 %v3134_v44  ;;  %v143_v63 = vld [vmem:[%s7514_s1 + $0x8] sm:$0xff]  ;;  %v142_v2 = vld [vmem:[%s7514_s1] sm:$0xff]  ;;  %v205_v4 = vld [vmem:[%s7514_s1 + $0x1f8] sm:$0xff] }
  0x18   :  { %381 = vmatpush1.msra.mxu1 %v152_v45  ;;  %293 = vmatprep.subr.mxu0 %v3133_v46  ;;  %v3186_v5 = vld [vmem:[%s7514_s1 + $0x3f0] sm:$0xff]  ;;  %v3185_v7 = vld [vmem:[%s7514_s1 + $0x3e8] sm:$0xff]  ;;  %v3184_v9 = vld [vmem:[%s7514_s1 + $0x3e0] sm:$0xff] }
  0x19   :  { %382 = vmatprep.subr.mxu1 %v151_v47  ;;  %294 = vmatpush1.msra.mxu0 %v3132_v48  ;;  %v204_v6 = vld [vmem:[%s7514_s1 + $0x1f0] sm:$0xff]  ;;  %v203_v8 = vld [vmem:[%s7514_s1 + $0x1e8] sm:$0xff]  ;;  %v202_v10 = vld [vmem:[%s7514_s1 + $0x1e0] sm:$0xff] }
  0x1a   :  { %383 = vmatpush1.msra.mxu1 %v150_v49  ;;  %295 = vmatprep.subr.mxu0 %v3131_v50  ;;  %v3183_v11 = vld [vmem:[%s7514_s1 + $0x3d8] sm:$0xff]  ;;  %v3182_v13 = vld [vmem:[%s7514_s1 + $0x3d0] sm:$0xff]  ;;  %v3181_v15 = vld [vmem:[%s7514_s1 + $0x3c8] sm:$0xff] }
  0x1b   :  { %384 = vmatprep.subr.mxu1 %v149_v51  ;;  %296 = vmatpush1.msra.mxu0 %v3130_v52  ;;  %v201_v12 = vld [vmem:[%s7514_s1 + $0x1d8] sm:$0xff]  ;;  %v200_v14 = vld [vmem:[%s7514_s1 + $0x1d0] sm:$0xff]  ;;  %v199_v16 = vld [vmem:[%s7514_s1 + $0x1c8] sm:$0xff] }
  0x1c   :  { %385 = vmatpush1.msra.mxu1 %v148_v53  ;;  %297 = vmatprep.subr.mxu0 %v3129_v54  ;;  %v3180_v17 = vld [vmem:[%s7514_s1 + $0x3c0] sm:$0xff]  ;;  %v3179_v19 = vld [vmem:[%s7514_s1 + $0x3b8] sm:$0xff]  ;;  %v3178_v21 = vld [vmem:[%s7514_s1 + $0x3b0] sm:$0xff] }
  0x1d   :  { %386 = vmatprep.subr.mxu1 %v147_v55  ;;  %298 = vmatpush1.msra.mxu0 %v3128_v56  ;;  %v198_v18 = vld [vmem:[%s7514_s1 + $0x1c0] sm:$0xff]  ;;  %v197_v20 = vld [vmem:[%s7514_s1 + $0x1b8] sm:$0xff]  ;;  %v196_v22 = vld [vmem:[%s7514_s1 + $0x1b0] sm:$0xff] }
  0x1e   :  { %387 = vmatpush1.msra.mxu1 %v146_v57  ;;  %299 = vmatprep.subr.mxu0 %v3127_v58  ;;  %v3177_v23 = vld [vmem:[%s7514_s1 + $0x3a8] sm:$0xff]  ;;  %v3176_v25 = vld [vmem:[%s7514_s1 + $0x3a0] sm:$0xff]  ;;  %v3175_v27 = vld [vmem:[%s7514_s1 + $0x398] sm:$0xff] }
  0x1f   :  { %388 = vmatprep.subr.mxu1 %v145_v59  ;;  %300 = vmatpush1.msra.mxu0 %v3126_v60  ;;  %v195_v24 = vld [vmem:[%s7514_s1 + $0x1a8] sm:$0xff]  ;;  %v194_v26 = vld [vmem:[%s7514_s1 + $0x1a0] sm:$0xff]  ;;  %v193_v28 = vld [vmem:[%s7514_s1 + $0x198] sm:$0xff] }
  0x20   :  { %389 = vmatpush1.msra.mxu1 %v144_v61  ;;  %301 = vmatprep.subr.mxu0 %v3125_v62  ;;  %v4333_v29 = vld [vmem:[%s7515_s0 + $0x8] sm:$0xff]  ;;  %v3174_v30 = vld [vmem:[%s7514_s1 + $0x390] sm:$0xff]  ;;  %v4345_v33 = vld [vmem:[%s7515_s0] sm:$0xff] }
  0x21   :  { %390 = vmatprep.subr.mxu1 %v143_v63  ;;  %302 = vmatpush1.msra.mxu0 %v3124_v1  ;;  %v192_v31 = vld [vmem:[%s7514_s1 + $0x190] sm:$0xff]  ;;  %v50_v32 = vrot.slane %v4333_v29, 7  ;;  %v3173_v34 = vld [vmem:[%s7514_s1 + $0x388] sm:$0xff]  ;;  %v49_v36 = vrot.slane %v4345_v33, 7  ;;  %v3172_v37 = vld [vmem:[%s7514_s1 + $0x380] sm:$0xff] }
  0x22   :  { %391 = vmatpush1.msra.mxu1 %v142_v2  ;;  %303 = vmatprep.subr.mxu0 %v3187_v3  ;;  %v191_v35 = vld [vmem:[%s7514_s1 + $0x188] sm:$0xff]  ;;  %v190_v38 = vld [vmem:[%s7514_s1 + $0x180] sm:$0xff]  ;;  %v3171_v39 = vld [vmem:[%s7514_s1 + $0x378] sm:$0xff] }
  0x23   :  { %392 = vmatprep.subr.mxu1 %v205_v4  ;;  %304 = vmatpush2.msra.mxu0 %v3186_v5  ;;  %74 = vst [vmem:[#allocation2 + $0x8] sm:$0xfe] %v50_v32  ;;  %v189_v40 = vld [vmem:[%s7514_s1 + $0x178] sm:$0xff]  ;;  %73 = vst [vmem:[#allocation2] sm:$0xfe] %v49_v36  ;;  %v3170_v41 = vld [vmem:[%s7514_s1 + $0x370] sm:$0xff] }
  0x24   :  { %393 = vmatpush2.msra.mxu1 %v204_v6  ;;  %305 = vmatprep.subr.mxu0 %v3185_v7  ;;  %v188_v42 = vld [vmem:[%s7514_s1 + $0x170] sm:$0xff]  ;;  %v3169_v43 = vld [vmem:[%s7514_s1 + $0x368] sm:$0xff]  ;;  %v3168_v45 = vld [vmem:[%s7514_s1 + $0x360] sm:$0xff] }
  0x25   :  { %394 = vmatprep.subr.mxu1 %v203_v8  ;;  %306 = vmatpush2.msra.mxu0 %v3184_v9  ;;  %v187_v44 = vld [vmem:[%s7514_s1 + $0x168] sm:$0xff]  ;;  %v186_v46 = vld [vmem:[%s7514_s1 + $0x160] sm:$0xff]  ;;  %v3167_v47 = vld [vmem:[%s7514_s1 + $0x358] sm:$0xff] }
  0x26   :  { %395 = vmatpush2.msra.mxu1 %v202_v10  ;;  %307 = vmatprep.subr.mxu0 %v3183_v11  ;;  %v185_v48 = vld [vmem:[%s7514_s1 + $0x158] sm:$0xff]  ;;  %v3166_v49 = vld [vmem:[%s7514_s1 + $0x350] sm:$0xff]  ;;  %v3165_v51 = vld [vmem:[%s7514_s1 + $0x348] sm:$0xff] }
  0x27   :  { %396 = vmatprep.subr.mxu1 %v201_v12  ;;  %308 = vmatpush2.msra.mxu0 %v3182_v13  ;;  %v184_v50 = vld [vmem:[%s7514_s1 + $0x150] sm:$0xff]  ;;  %v183_v52 = vld [vmem:[%s7514_s1 + $0x148] sm:$0xff]  ;;  %v3164_v53 = vld [vmem:[%s7514_s1 + $0x340] sm:$0xff] }
  0x28   :  { %397 = vmatpush2.msra.mxu1 %v200_v14  ;;  %309 = vmatprep.subr.mxu0 %v3181_v15  ;;  %v182_v54 = vld [vmem:[%s7514_s1 + $0x140] sm:$0xff]  ;;  %v3163_v55 = vld [vmem:[%s7514_s1 + $0x338] sm:$0xff]  ;;  %v3162_v57 = vld [vmem:[%s7514_s1 + $0x330] sm:$0xff] }
  0x29   :  { %398 = vmatprep.subr.mxu1 %v199_v16  ;;  %310 = vmatpush2.msra.mxu0 %v3180_v17  ;;  %v181_v56 = vld [vmem:[%s7514_s1 + $0x138] sm:$0xff]  ;;  %v180_v58 = vld [vmem:[%s7514_s1 + $0x130] sm:$0xff]  ;;  %v3161_v59 = vld [vmem:[%s7514_s1 + $0x328] sm:$0xff] }
  0x2a   :  { %399 = vmatpush2.msra.mxu1 %v198_v18  ;;  %311 = vmatprep.subr.mxu0 %v3179_v19  ;;  %v179_v60 = vld [vmem:[%s7514_s1 + $0x128] sm:$0xff]  ;;  %v3160_v61 = vld [vmem:[%s7514_s1 + $0x320] sm:$0xff]  ;;  %v3159_v63 = vld [vmem:[%s7514_s1 + $0x318] sm:$0xff] }
  0x2b   :  { %400 = vmatprep.subr.mxu1 %v197_v20  ;;  %312 = vmatpush2.msra.mxu0 %v3178_v21  ;;  %v178_v62 = vld [vmem:[%s7514_s1 + $0x120] sm:$0xff]  ;;  %v177_v1 = vld [vmem:[%s7514_s1 + $0x118] sm:$0xff]  ;;  %v3158_v2 = vld [vmem:[%s7514_s1 + $0x310] sm:$0xff] }
  0x2c   :  { %401 = vmatpush2.msra.mxu1 %v196_v22  ;;  %313 = vmatprep.subr.mxu0 %v3177_v23  ;;  %v176_v3 = vld [vmem:[%s7514_s1 + $0x110] sm:$0xff]  ;;  %v3157_v4 = vld [vmem:[%s7514_s1 + $0x308] sm:$0xff]  ;;  %v35_v6 = vld [vmem:[%s7515_s0 + $0x18] sm:$0xff] }
  0x2d   :  { %402 = vmatprep.subr.mxu1 %v195_v24  ;;  %314 = vmatpush2.msra.mxu0 %v3176_v25  ;;  %v175_v5 = vld [vmem:[%s7514_s1 + $0x108] sm:$0xff]  ;;  %v3156_v7 = vld [vmem:[%s7514_s1 + $0x300] sm:$0xff]  ;;  %v53_v8 = vrot.slane %v35_v6, 7  ;;  %v34_v9 = vld [vmem:[%s7515_s0 + $0x10] sm:$0xff] }
  0x2e   :  { %403 = vmatpush2.msra.mxu1 %v194_v26  ;;  %315 = vmatprep.subr.mxu0 %v3175_v27  ;;  %v174_v10 = vld [vmem:[%s7514_s1 + $0x100] sm:$0xff]  ;;  %v86_v11 = vld [vmem:[#allocation2 + $0x8] sm:$0xff]  ;;  %v51_v12 = vrot.slane %v34_v9, 7  ;;  %v3219_v17 = vld [vmem:[%s7514_s1 + $0x4f8] sm:$0xff] }
  0x2f   :  { %404 = vmatprep.subr.mxu1 %v193_v28  ;;  %316 = vmatpush2.msra.mxu0 %v3174_v30  ;;  %v37_v13 = vld [vmem:[%s7515_s0 + $0x28] sm:$0xff]  ;;  %v85_v14 = vld [vmem:[#allocation2] sm:$0xff]  ;;  %78 = vst [vmem:[#allocation2 + $0x28] sm:$0x1] %v53_v8  ;;  %v39_v19 = vld [vmem:[%s7515_s0 + $0x38] sm:$0xff]  ;;  %v4485_v21 = vsel %vm48_vm1, %v50_v32, %v53_v8 }
  0x30   :  { %405 = vmatpush2.msra.mxu1 %v192_v31  ;;  %317 = vmatprep.subr.mxu0 %v3173_v34  ;;  %v56_v15 = vrot.slane %v37_v13, 7  ;;  %v36_v16 = vld [vmem:[%s7515_s0 + $0x20] sm:$0xff]  ;;  %77 = vst [vmem:[#allocation2 + $0x20] sm:$0x1] %v51_v12  ;;  %v3218_v20 = vld [vmem:[%s7514_s1 + $0x4f0] sm:$0xff]  ;;  %v59_v22 = vrot.slane %v39_v19, 7  ;;  %v4500_v27 = vsel %vm48_vm1, %v49_v36, %v51_v12 }
  0x31   :  { %406 = vmatprep.subr.mxu1 %v191_v35  ;;  %318 = vmatpush2.msra.mxu0 %v3172_v37  ;;  %v55_v18 = vrot.slane %v36_v16, 7  ;;  %v38_v23 = vld [vmem:[%s7515_s0 + $0x30] sm:$0xff]  ;;  %v3217_v24 = vld [vmem:[%s7514_s1 + $0x4e8] sm:$0xff]  ;;  %v3216_v26 = vld [vmem:[%s7514_s1 + $0x4e0] sm:$0xff]  ;;  %v118_v36 = vrot.slane %v4485_v21, 2 }
  0x32   :  { %407 = vmatpush2.msra.mxu1 %v190_v38  ;;  %319 = vmatprep.subr.mxu0 %v3171_v39  ;;  %80 = vst [vmem:[#allocation2 + $0x38] sm:$0xfe] %v56_v15  ;;  %v57_v25 = vrot.slane %v38_v23, 7  ;;  %84 = vst [vmem:[#allocation2 + $0x58] sm:$0x1] %v59_v22  ;;  %v3215_v28 = vld [vmem:[%s7514_s1 + $0x4d8] sm:$0xff] }
  0x33   :  { %408 = vmatprep.subr.mxu1 %v189_v40  ;;  %320 = vmatpush2.msra.mxu0 %v3170_v41  ;;  %79 = vst [vmem:[#allocation2 + $0x30] sm:$0xfe] %v55_v18  ;;  %v3213_v30 = vld [vmem:[%s7514_s1 + $0x4c8] sm:$0xff]  ;;  %v3212_v32 = vld [vmem:[%s7514_s1 + $0x4c0] sm:$0xff]  ;;  %v3210_v35 = vld [vmem:[%s7514_s1 + $0x4b0] sm:$0xff]  ;;  %v4527_v40 = vsel %vm48_vm1, %v56_v15, %v59_v22 }
  0x34   :  { %409 = vmatpush2.msra.mxu1 %v188_v42  ;;  %321 = vmatprep.subr.mxu0 %v3169_v43  ;;  %83 = vst [vmem:[#allocation2 + $0x50] sm:$0x1] %v57_v25  ;;  %v94_v31 = vld [vmem:[#allocation2 + $0x8] sm:$0xfc]  ;;  %v3208_v41 = vld [vmem:[%s7514_s1 + $0x4a0] sm:$0xff]  ;;  %v4533_v42 = vsel %vm48_vm1, %v55_v18, %v57_v25  ;;  %v3207_v43 = vld [vmem:[%s7514_s1 + $0x498] sm:$0xff] }
  0x35   :  { %410 = vmatprep.subr.mxu1 %v187_v44  ;;  %322 = vmatpush2.msra.mxu0 %v3168_v45  ;;  %v117_v38 = vrot.slane %v94_v31, 2  ;;  %v3209_v39 = vld [vmem:[%s7514_s1 + $0x4a8] sm:$0xff]  ;;  %v3206_v44 = vld [vmem:[%s7514_s1 + $0x490] sm:$0xff]  ;;  %v3244_v8 = vld [vmem:[%s7514_s1 + $0x5c0] sm:$0xff] }
  0x36   :  { %411 = vmatpush2.msra.mxu1 %v186_v46  ;;  %323 = vmatprep.subr.mxu0 %v3167_v47  ;;  %v3205_v46 = vld [vmem:[%s7514_s1 + $0x488] sm:$0xff]  ;;  %v3204_v47 = vld [vmem:[%s7514_s1 + $0x480] sm:$0xff]  ;;  %v3234_v18 = vld [vmem:[%s7514_s1 + $0x570] sm:$0xff] }
  0x37   :  { %412 = vmatprep.subr.mxu1 %v185_v48  ;;  %324 = vmatpush2.msra.mxu0 %v3166_v49  ;;  %v119_v45 = vsel %vm113_vm2, %v117_v38, %v118_v36  ;;  %v3203_v48 = vld [vmem:[%s7514_s1 + $0x478] sm:$0xff]  ;;  %v3202_v49 = vld [vmem:[%s7514_s1 + $0x470] sm:$0xff]  ;;  %v3240_v12 = vld [vmem:[%s7514_s1 + $0x5a0] sm:$0xff] }
  0x38   :  { %413 = vmatpush2.msra.mxu1 %v184_v50  ;;  %325 = vmatprep.subr.mxu0 %v3165_v51  ;;  %v3201_v50 = vld [vmem:[%s7514_s1 + $0x468] sm:$0xff]  ;;  %v3200_v51 = vld [vmem:[%s7514_s1 + $0x460] sm:$0xff]  ;;  %v3231_v22 = vld [vmem:[%s7514_s1 + $0x558] sm:$0xff] }
  0x39   :  { %414 = vmatprep.subr.mxu1 %v183_v52  ;;  %326 = vmatpush2.msra.mxu0 %v3164_v53  ;;  %v90_v34 = vld [vmem:[#allocation2 + $0x38] sm:$0xff]  ;;  %v3198_v53 = vld [vmem:[%s7514_s1 + $0x450] sm:$0xff]  ;;  %v3237_v15 = vld [vmem:[%s7514_s1 + $0x588] sm:$0xff] }
  0x3a   :  { %415 = vmatpush2.msra.mxu1 %v182_v54  ;;  %327 = vmatprep.subr.mxu0 %v3163_v55  ;;  %v89_v37 = vld [vmem:[#allocation2 + $0x30] sm:$0xff]  ;;  %v3199_v52 = vld [vmem:[%s7514_s1 + $0x458] sm:$0xff]  ;;  %v3197_v54 = vld [vmem:[%s7514_s1 + $0x448] sm:$0xff] }
  0x3b   :  { %416 = vmatprep.subr.mxu1 %v181_v56  ;;  %328 = vmatpush2.msra.mxu0 %v3162_v57  ;;  %v3196_v55 = vld [vmem:[%s7514_s1 + $0x440] sm:$0xff]  ;;  %v3195_v56 = vld [vmem:[%s7514_s1 + $0x438] sm:$0xff]  ;;  %v3194_v57 = vld [vmem:[%s7514_s1 + $0x430] sm:$0xff] }
  0x3c   :  { %417 = vmatpush2.msra.mxu1 %v180_v58  ;;  %329 = vmatprep.subr.mxu0 %v3161_v59  ;;  %v3193_v58 = vld [vmem:[%s7514_s1 + $0x428] sm:$0xff]  ;;  %v3192_v59 = vld [vmem:[%s7514_s1 + $0x420] sm:$0xff] }
  0x3d   :  { %418 = vmatprep.subr.mxu1 %v179_v60  ;;  %330 = vmatpush2.msra.mxu0 %v3160_v61  ;;  %v3191_v60 = vld [vmem:[%s7514_s1 + $0x418] sm:$0xff]  ;;  %v3190_v61 = vld [vmem:[%s7514_s1 + $0x410] sm:$0xff]  ;;  %v3228_v25 = vld [vmem:[%s7514_s1 + $0x540] sm:$0xff] }
  0x3e   :  { %419 = vmatpush2.msra.mxu1 %v178_v62  ;;  %331 = vmatprep.subr.mxu0 %v3159_v63  ;;  %v3189_v62 = vld [vmem:[%s7514_s1 + $0x408] sm:$0xff]  ;;  %v3188_v63 = vld [vmem:[%s7514_s1 + $0x400] sm:$0xff] }
  0x3f   :  { %420 = vmatprep.subr.mxu1 %v177_v1  ;;  %332 = vmatpush2.msra.mxu0 %v3158_v2  ;;  %v3251_v1 = vld [vmem:[%s7514_s1 + $0x5f8] sm:$0xff]  ;;  %v3250_v2 = vld [vmem:[%s7514_s1 + $0x5f0] sm:$0xff]  ;;  %v96_v31 = vld [vmem:[#allocation2 + $0x28] sm:$0x3] }
  0x40   :  { %421 = vmatpush2.msra.mxu1 %v176_v3  ;;  %333 = vmatprep.subr.mxu0 %v3157_v4  ;;  %v3249_v3 = vld [vmem:[%s7514_s1 + $0x5e8] sm:$0xff]  ;;  %v3248_v4 = vld [vmem:[%s7514_s1 + $0x5e0] sm:$0xff]  ;;  %v122_v38 = vrot.slane %v96_v31, 2  ;;  %v3326_v31 = vld [vmem:[%s7514_s1 + $0x850] sm:$0xff] }
  0x41   :  { %422 = vmatprep.subr.mxu1 %v175_v5  ;;  %334 = vmatpush2.msra.mxu0 %v3156_v7  ;;  %v3247_v5 = vld [vmem:[%s7514_s1 + $0x5d8] sm:$0xff]  ;;  %v3245_v7 = vld [vmem:[%s7514_s1 + $0x5c8] sm:$0xff] }
  0x42   :  { %335 = vmatprep.mubr.f32.mxu0 %v4333_v29  ;;  %423 = vmatpush2.msra.mxu1 %v174_v10  ;;  %v3214_v29 = vld [vmem:[%s7514_s1 + $0x4d0] sm:$0xff] }
  0x43   :  { %424 = vmatprep.mubr.f32.mxu1 %v86_v11  ;;  %336 = vmatmul.mubr.f32.vlgmr.msra.gmra.mxu0 %v4345_v33  ;;  %v3211_v33 = vld [vmem:[%s7514_s1 + $0x4b8] sm:$0xff]  ;;  %v3242_v10 = vld [vmem:[%s7514_s1 + $0x5b0] sm:$0xff]  ;;  %v3241_v11 = vld [vmem:[%s7514_s1 + $0x5a8] sm:$0xff] }
  0x44   :  { %425 = vmatmul.mubr.f32.vlgmr.msra.gmra.mxu1 %v85_v14  ;;  %514 = vmatprep.subr.mxu0 %v3219_v17  ;;  %v3238_v14 = vld [vmem:[%s7514_s1 + $0x590] sm:$0xff]  ;;  %v3235_v17 = vld [vmem:[%s7514_s1 + $0x578] sm:$0xff] }
  0x45   :  { %341 = vmatprep.mubr.f32.mxu0 %v35_v6  ;;  %515 = vmatpush1.msra.mxu0 %v3218_v20  ;;  %v3246_v6 = vld [vmem:[%s7514_s1 + $0x5d0] sm:$0xff]  ;;  %v3232_v20 = vld [vmem:[%s7514_s1 + $0x560] sm:$0xff] }
  0x46   :  { %430 = vmatprep.mubr.f32.mxu1 %v4485_v21  ;;  %516 = vmatprep.subr.mxu0 %v3217_v24  ;;  %v3229_v24 = vld [vmem:[%s7514_s1 + $0x548] sm:$0xff]  ;;  %v3347_v21 = vld [vmem:[%s7514_s1 + $0x8f8] sm:$0xff] }
  0x47   :  { %517 = vmatpush1.msra.mxu0 %v3216_v26  ;;  %v3227_v26 = vld [vmem:[%s7514_s1 + $0x538] sm:$0xff]  ;;  %877 = vmatprep.subr.mxu1 %v3347_v21  ;;  %v3378_v21 = vld [vmem:[%s7514_s1 + $0x9f0] sm:$0xff] }
  0x48   :  { %431 = vmatmul.mubr.f32.gmra.mxu1 %v4500_v27  ;;  %518 = vmatprep.subr.mxu0 %v3215_v28  ;;  %v3226_v28 = vld [vmem:[%s7514_s1 + $0x530] sm:$0xff] }
  0x49   :  { %342 = vmatmul.mubr.f32.gmra.mxu0 %v34_v9  ;;  %436 = vmatprep.mubr.f32.mxu1 %v90_v34  ;;  %v3243_v9 = vld [vmem:[%s7514_s1 + $0x5b8] sm:$0xff] }
  0x4a   :  { %519 = vmatpush1.msra.mxu0 %v3214_v29  ;;  %347 = vmatprep.mubr.f32.mxu0 %v37_v13  ;;  %v3239_v13 = vld [vmem:[%s7514_s1 + $0x598] sm:$0xff]  ;;  %v93_v29 = vld [vmem:[#allocation2] sm:$0xfc] }
  0x4b   :  { %520 = vmatprep.subr.mxu0 %v3213_v30  ;;  %v3225_v30 = vld [vmem:[%s7514_s1 + $0x528] sm:$0xff]  ;;  %v3223_v34 = vld [vmem:[%s7514_s1 + $0x518] sm:$0xff] }
  0x4c   :  { %521 = vmatpush1.msra.mxu0 %v3212_v32  ;;  %437 = vmatmul.mubr.f32.gmra.mxu1 %v89_v37  ;;  %v3224_v32 = vld [vmem:[%s7514_s1 + $0x520] sm:$0xff]  ;;  %v3222_v37 = vld [vmem:[%s7514_s1 + $0x510] sm:$0xff] }
  0x4d   :  { %522 = vmatprep.subr.mxu0 %v3211_v33  ;;  %348 = vmatmul.mubr.f32.gmra.mxu0 %v36_v16  ;;  %v3236_v16 = vld [vmem:[%s7514_s1 + $0x580] sm:$0xff]  ;;  %v115_v33 = vrot.slane %v4500_v27, 2 }
  0x4e   :  { %523 = vmatpush1.msra.mxu0 %v3210_v35  ;;  %353 = vmatprep.mubr.f32.mxu0 %v39_v19  ;;  %v3233_v19 = vld [vmem:[%s7514_s1 + $0x568] sm:$0xff]  ;;  %v114_v35 = vrot.slane %v93_v29, 2  ;;  %v3220_v27 = vld [vmem:[%s7514_s1 + $0x500] sm:$0xff]  ;;  %v3327_v29 = vld [vmem:[%s7514_s1 + $0x858] sm:$0xff] }
  0x4f   :  { %524 = vmatprep.subr.mxu0 %v3209_v39  ;;  %442 = vmatprep.mubr.f32.mxu1 %v4527_v40  ;;  %v95_v39 = vld [vmem:[#allocation2 + $0x20] sm:$0x3] }
  0x50   :  { %525 = vmatpush1.msra.mxu0 %v3208_v41  ;;  %443 = vmatmul.mubr.f32.gmra.mxu1 %v4533_v42  ;;  %v3221_v41 = vld [vmem:[%s7514_s1 + $0x508] sm:$0xff] }
  0x51   :  { %526 = vmatprep.subr.mxu0 %v3207_v43  ;;  %354 = vmatmul.mubr.f32.gmra.mxu0 %v38_v23  ;;  %v3230_v23 = vld [vmem:[%s7514_s1 + $0x550] sm:$0xff]  ;;  %v98_v43 = vld [vmem:[#allocation2 + $0x38] sm:$0xfc] }
  0x52   :  { %527 = vmatpush1.msra.mxu0 %v3206_v44  ;;  %578 = vmatprep.mubr.f32.mxu0 %v119_v45  ;;  %v116_v44 = vsel %vm113_vm2, %v114_v35, %v115_v33  ;;  %v120_v45 = vrot.slane %v95_v39, 2  ;;  %v3324_v35 = vld [vmem:[%s7514_s1 + $0x840] sm:$0xff]  ;;  %v3266_v39 = vld [vmem:[%s7514_s1 + $0x670] sm:$0xff] }
  0x53   :  { %528 = vmatprep.subr.mxu0 %v3205_v46  ;;  %v128_v46 = vrot.slane %v4527_v40, 2 }
  0x54   :  { %529 = vmatpush1.msra.mxu0 %v3204_v47  ;;  %v123_v47 = vsel %vm113_vm2, %v118_v36, %v122_v38  ;;  %v3346_v36 = vld [vmem:[%s7514_s1 + $0x8f0] sm:$0xff]  ;;  %v3323_v38 = vld [vmem:[%s7514_s1 + $0x838] sm:$0xff] }
  0x55   :  { %530 = vmatprep.subr.mxu0 %v3203_v48  ;;  %v127_v48 = vrot.slane %v98_v43, 2  ;;  %878 = vmatpush1.msra.mxu1 %v3346_v36  ;;  %v3265_v43 = vld [vmem:[%s7514_s1 + $0x668] sm:$0xff] }
  0x56   :  { %531 = vmatpush1.msra.mxu0 %v3202_v49  ;;  %v97_v49 = vld [vmem:[#allocation2 + $0x30] sm:$0xfc]  ;;  %v3257_v36 = vld [vmem:[%s7514_s1 + $0x628] sm:$0xff] }
  0x57   :  { %532 = vmatprep.subr.mxu0 %v3201_v50  ;;  %v100_v50 = vld [vmem:[#allocation2 + $0x58] sm:$0x3] }
  0x58   :  { %533 = vmatpush1.msra.mxu0 %v3200_v51  ;;  %v125_v51 = vrot.slane %v4533_v42, 2  ;;  %v132_v40 = vrot.slane %v100_v50, 2  ;;  %v3345_v42 = vld [vmem:[%s7514_s1 + $0x8e8] sm:$0xff] }
  0x59   :  { %534 = vmatprep.subr.mxu0 %v3199_v52  ;;  %v121_v52 = vsel %vm113_vm2, %v115_v33, %v120_v45  ;;  %879 = vmatprep.subr.mxu1 %v3345_v42  ;;  %v3325_v33 = vld [vmem:[%s7514_s1 + $0x848] sm:$0xff]  ;;  %v3320_v45 = vld [vmem:[%s7514_s1 + $0x820] sm:$0xff] }
  0x5a   :  { %535 = vmatpush1.msra.mxu0 %v3198_v53  ;;  %v124_v53 = vrot.slane %v97_v49, 2  ;;  %v3318_v49 = vld [vmem:[%s7514_s1 + $0x810] sm:$0xff]  ;;  %v3261_v50 = vld [vmem:[%s7514_s1 + $0x648] sm:$0xff] }
  0x5b   :  { %536 = vmatprep.subr.mxu0 %v3197_v54  ;;  %v99_v54 = vld [vmem:[#allocation2 + $0x50] sm:$0x3]  ;;  %v3377_v42 = vld [vmem:[%s7514_s1 + $0x9e8] sm:$0xff] }
  0x5c   :  { %537 = vmatpush1.msra.mxu0 %v3196_v55  ;;  %v129_v55 = vsel %vm113_vm2, %v127_v48, %v128_v46  ;;  %v3262_v48 = vld [vmem:[%s7514_s1 + $0x650] sm:$0xff] }
  0x5d   :  { %538 = vmatprep.subr.mxu0 %v3195_v56  ;;  %v3344_v56 = vld [vmem:[%s7514_s1 + $0x8e0] sm:$0xff] }
  0x5e   :  { %539 = vmatpush1.msra.mxu0 %v3194_v57  ;;  %v3343_v57 = vld [vmem:[%s7514_s1 + $0x8d8] sm:$0xff]  ;;  %880 = vmatpush1.msra.mxu1 %v3344_v56  ;;  %v3256_v56 = vld [vmem:[%s7514_s1 + $0x620] sm:$0xff] }
  0x5f   :  { %540 = vmatprep.subr.mxu0 %v3193_v58  ;;  %v126_v58 = vsel %vm113_vm2, %v124_v53, %v125_v51  ;;  %881 = vmatprep.subr.mxu1 %v3343_v57  ;;  %v3316_v53 = vld [vmem:[%s7514_s1 + $0x800] sm:$0xff] }
  0x60   :  { %541 = vmatpush1.msra.mxu0 %v3192_v59  ;;  %v130_v59 = vrot.slane %v99_v54, 2  ;;  %v3259_v54 = vld [vmem:[%s7514_s1 + $0x638] sm:$0xff]  ;;  %v3376_v57 = vld [vmem:[%s7514_s1 + $0x9e0] sm:$0xff] }
  0x61   :  { %542 = vmatprep.subr.mxu0 %v3191_v60  ;;  %v3342_v60 = vld [vmem:[%s7514_s1 + $0x8d0] sm:$0xff] }
  0x62   :  { %543 = vmatpush1.msra.mxu0 %v3190_v61  ;;  %v133_v61 = vsel %vm113_vm2, %v128_v46, %v132_v40  ;;  %882 = vmatpush1.msra.mxu1 %v3342_v60  ;;  %v3263_v46 = vld [vmem:[%s7514_s1 + $0x658] sm:$0xff]  ;;  %v3258_v40 = vld [vmem:[%s7514_s1 + $0x630] sm:$0xff] }
  0x63   :  { %544 = vmatprep.subr.mxu0 %v3189_v62  ;;  %v3341_v62 = vld [vmem:[%s7514_s1 + $0x8c8] sm:$0xff]  ;;  %v3254_v60 = vld [vmem:[%s7514_s1 + $0x610] sm:$0xff] }
  0x64   :  { %545 = vmatpush1.msra.mxu0 %v3188_v63  ;;  %v3283_v63 = vld [vmem:[%s7514_s1 + $0x6f8] sm:$0xff]  ;;  %883 = vmatprep.subr.mxu1 %v3341_v62  ;;  %v3253_v62 = vld [vmem:[%s7514_s1 + $0x608] sm:$0xff] }
  0x65   :  { %546 = vmatprep.subr.mxu0 %v3251_v1  ;;  %v3340_v1 = vld [vmem:[%s7514_s1 + $0x8c0] sm:$0xff] }
  0x66   :  { %547 = vmatpush2.msra.mxu0 %v3250_v2  ;;  %v3282_v2 = vld [vmem:[%s7514_s1 + $0x6f0] sm:$0xff]  ;;  %884 = vmatpush1.msra.mxu1 %v3340_v1  ;;  %v3252_v1 = vld [vmem:[%s7514_s1 + $0x600] sm:$0xff] }
  0x67   :  { %548 = vmatprep.subr.mxu0 %v3249_v3  ;;  %v3339_v3 = vld [vmem:[%s7514_s1 + $0x8b8] sm:$0xff] }
  0x68   :  { %549 = vmatpush2.msra.mxu0 %v3248_v4  ;;  %v3281_v4 = vld [vmem:[%s7514_s1 + $0x6e8] sm:$0xff]  ;;  %885 = vmatprep.subr.mxu1 %v3339_v3  ;;  %v3315_v3 = vld [vmem:[%s7514_s1 + $0x7f8] sm:$0xff] }
  0x69   :  { %550 = vmatprep.subr.mxu0 %v3247_v5  ;;  %v131_v5 = vsel %vm113_vm2, %v125_v51, %v130_v59  ;;  %v3317_v51 = vld [vmem:[%s7514_s1 + $0x808] sm:$0xff]  ;;  %v3375_v59 = vld [vmem:[%s7514_s1 + $0x9d8] sm:$0xff] }
  0x6a   :  { %551 = vmatpush2.msra.mxu0 %v3246_v6  ;;  %v3338_v6 = vld [vmem:[%s7514_s1 + $0x8b0] sm:$0xff] }
  0x6b   :  { %552 = vmatprep.subr.mxu0 %v3245_v7  ;;  %v3337_v7 = vld [vmem:[%s7514_s1 + $0x8a8] sm:$0xff]  ;;  %886 = vmatpush1.msra.mxu1 %v3338_v6  ;;  %v3370_v6 = vld [vmem:[%s7514_s1 + $0x9b0] sm:$0xff] }
  0x6c   :  { %553 = vmatpush2.msra.mxu0 %v3244_v8  ;;  %v3280_v8 = vld [vmem:[%s7514_s1 + $0x6e0] sm:$0xff]  ;;  %887 = vmatprep.subr.mxu1 %v3337_v7  ;;  %v3313_v7 = vld [vmem:[%s7514_s1 + $0x7e8] sm:$0xff] }
  0x6d   :  { %554 = vmatprep.subr.mxu0 %v3243_v9  ;;  %v3336_v9 = vld [vmem:[%s7514_s1 + $0x8a0] sm:$0xff] }
  0x6e   :  { %555 = vmatpush2.msra.mxu0 %v3242_v10  ;;  %v3279_v10 = vld [vmem:[%s7514_s1 + $0x6d8] sm:$0xff]  ;;  %888 = vmatpush1.msra.mxu1 %v3336_v9  ;;  %v3312_v9 = vld [vmem:[%s7514_s1 + $0x7e0] sm:$0xff] }
  0x6f   :  { %556 = vmatprep.subr.mxu0 %v3241_v11  ;;  %v3335_v11 = vld [vmem:[%s7514_s1 + $0x898] sm:$0xff] }
  0x70   :  { %557 = vmatpush2.msra.mxu0 %v3240_v12  ;;  %v3278_v12 = vld [vmem:[%s7514_s1 + $0x6d0] sm:$0xff]  ;;  %889 = vmatprep.subr.mxu1 %v3335_v11  ;;  %v3311_v11 = vld [vmem:[%s7514_s1 + $0x7d8] sm:$0xff] }
  0x71   :  { %558 = vmatprep.subr.mxu0 %v3239_v13  ;;  %v3334_v13 = vld [vmem:[%s7514_s1 + $0x890] sm:$0xff] }
  0x72   :  { %559 = vmatpush2.msra.mxu0 %v3238_v14  ;;  %v3277_v14 = vld [vmem:[%s7514_s1 + $0x6c8] sm:$0xff]  ;;  %890 = vmatpush1.msra.mxu1 %v3334_v13  ;;  %v3310_v13 = vld [vmem:[%s7514_s1 + $0x7d0] sm:$0xff] }
  0x73   :  { %560 = vmatprep.subr.mxu0 %v3237_v15  ;;  %v3333_v15 = vld [vmem:[%s7514_s1 + $0x888] sm:$0xff] }
  0x74   :  { %561 = vmatpush2.msra.mxu0 %v3236_v16  ;;  %v3276_v16 = vld [vmem:[%s7514_s1 + $0x6c0] sm:$0xff]  ;;  %891 = vmatprep.subr.mxu1 %v3333_v15  ;;  %v3309_v15 = vld [vmem:[%s7514_s1 + $0x7c8] sm:$0xff] }
  0x75   :  { %562 = vmatprep.subr.mxu0 %v3235_v17  ;;  %v3332_v17 = vld [vmem:[%s7514_s1 + $0x880] sm:$0xff] }
  0x76   :  { %563 = vmatpush2.msra.mxu0 %v3234_v18  ;;  %v3275_v18 = vld [vmem:[%s7514_s1 + $0x6b8] sm:$0xff]  ;;  %892 = vmatpush1.msra.mxu1 %v3332_v17  ;;  %v3308_v17 = vld [vmem:[%s7514_s1 + $0x7c0] sm:$0xff] }
  0x77   :  { %564 = vmatprep.subr.mxu0 %v3233_v19  ;;  %v3331_v19 = vld [vmem:[%s7514_s1 + $0x878] sm:$0xff] }
  0x78   :  { %565 = vmatpush2.msra.mxu0 %v3232_v20  ;;  %v3274_v20 = vld [vmem:[%s7514_s1 + $0x6b0] sm:$0xff]  ;;  %893 = vmatprep.subr.mxu1 %v3331_v19  ;;  %v3307_v19 = vld [vmem:[%s7514_s1 + $0x7b8] sm:$0xff] }
  0x79   :  { %566 = vmatprep.subr.mxu0 %v3231_v22  ;;  %v3330_v22 = vld [vmem:[%s7514_s1 + $0x870] sm:$0xff] }
  0x7a   :  { %567 = vmatpush2.msra.mxu0 %v3230_v23  ;;  %v3273_v23 = vld [vmem:[%s7514_s1 + $0x6a8] sm:$0xff]  ;;  %894 = vmatpush1.msra.mxu1 %v3330_v22  ;;  %v3306_v22 = vld [vmem:[%s7514_s1 + $0x7b0] sm:$0xff] }
  0x7b   :  { %568 = vmatprep.subr.mxu0 %v3229_v24  ;;  %v3329_v24 = vld [vmem:[%s7514_s1 + $0x868] sm:$0xff] }
  0x7c   :  { %569 = vmatpush2.msra.mxu0 %v3228_v25  ;;  %v3272_v25 = vld [vmem:[%s7514_s1 + $0x6a0] sm:$0xff]  ;;  %895 = vmatprep.subr.mxu1 %v3329_v24  ;;  %v3361_v24 = vld [vmem:[%s7514_s1 + $0x968] sm:$0xff] }
  0x7d   :  { %570 = vmatprep.subr.mxu0 %v3227_v26  ;;  %v3328_v26 = vld [vmem:[%s7514_s1 + $0x860] sm:$0xff] }
  0x7e   :  { %571 = vmatpush2.msra.mxu0 %v3226_v28  ;;  %v3271_v28 = vld [vmem:[%s7514_s1 + $0x698] sm:$0xff]  ;;  %896 = vmatpush1.msra.mxu1 %v3328_v26 }
  0x7f   :  { %572 = vmatprep.subr.mxu0 %v3225_v30  ;;  %v3270_v30 = vld [vmem:[%s7514_s1 + $0x690] sm:$0xff]  ;;  %897 = vmatprep.subr.mxu1 %v3327_v29  ;;  %v3359_v26 = vld [vmem:[%s7514_s1 + $0x958] sm:$0xff]  ;;  %v3305_v29 = vld [vmem:[%s7514_s1 + $0x7a8] sm:$0xff] }
  0x80   :  { %573 = vmatpush2.msra.mxu0 %v3224_v32  ;;  %v3269_v32 = vld [vmem:[%s7514_s1 + $0x688] sm:$0xff]  ;;  %898 = vmatpush1.msra.mxu1 %v3326_v31  ;;  %v3304_v31 = vld [vmem:[%s7514_s1 + $0x7a0] sm:$0xff] }
  0x81   :  { %574 = vmatprep.subr.mxu0 %v3223_v34  ;;  %v3268_v34 = vld [vmem:[%s7514_s1 + $0x680] sm:$0xff]  ;;  %899 = vmatprep.subr.mxu1 %v3325_v33  ;;  %v3303_v33 = vld [vmem:[%s7514_s1 + $0x798] sm:$0xff] }
  0x82   :  { %575 = vmatpush2.msra.mxu0 %v3222_v37  ;;  %v3267_v37 = vld [vmem:[%s7514_s1 + $0x678] sm:$0xff]  ;;  %900 = vmatpush1.msra.mxu1 %v3324_v35  ;;  %v3302_v35 = vld [vmem:[%s7514_s1 + $0x790] sm:$0xff] }
  0x83   :  { %576 = vmatprep.subr.mxu0 %v3221_v41  ;;  %v3322_v41 = vld [vmem:[%s7514_s1 + $0x830] sm:$0xff]  ;;  %901 = vmatprep.subr.mxu1 %v3323_v38  ;;  %v3301_v38 = vld [vmem:[%s7514_s1 + $0x788] sm:$0xff] }
  0x84   :  { %577 = vmatpush2.msra.mxu0 %v3220_v27  ;;  %v3321_v27 = vld [vmem:[%s7514_s1 + $0x828] sm:$0xff]  ;;  %902 = vmatpush1.msra.mxu1 %v3322_v41  ;;  %v3300_v41 = vld [vmem:[%s7514_s1 + $0x780] sm:$0xff] }
  0x85   :  { %579 = vmatmul.mubr.f32.vlgmr.msra.gmra.mxu0 %v116_v44  ;;  %966 = vmatprep.subr.mxu0 %v3283_v63  ;;  %v3264_v44 = vld [vmem:[%s7514_s1 + $0x660] sm:$0xff]  ;;  %v3373_v63 = vld [vmem:[%s7514_s1 + $0x9c8] sm:$0xff] }
  0x86   :  { %584 = vmatprep.mubr.f32.mxu0 %v123_v47  ;;  %967 = vmatpush1.msra.mxu0 %v3282_v2  ;;  %v3319_v47 = vld [vmem:[%s7514_s1 + $0x818] sm:$0xff]  ;;  %v3372_v2 = vld [vmem:[%s7514_s1 + $0x9c0] sm:$0xff] }
  0x87   :  { %968 = vmatprep.subr.mxu0 %v3281_v4  ;;  %903 = vmatprep.subr.mxu1 %v3321_v27  ;;  %v3371_v4 = vld [vmem:[%s7514_s1 + $0x9b8] sm:$0xff] }
  0x88   :  { %969 = vmatpush1.msra.mxu0 %v3280_v8  ;;  %904 = vmatpush1.msra.mxu1 %v3320_v45  ;;  %v3369_v8 = vld [vmem:[%s7514_s1 + $0x9a8] sm:$0xff]  ;;  %v3299_v27 = vld [vmem:[%s7514_s1 + $0x778] sm:$0xff]  ;;  %v3298_v45 = vld [vmem:[%s7514_s1 + $0x770] sm:$0xff] }
  0x89   :  { %585 = vmatmul.mubr.f32.gmra.mxu0 %v121_v52  ;;  %970 = vmatprep.subr.mxu0 %v3279_v10  ;;  %v3260_v52 = vld [vmem:[%s7514_s1 + $0x640] sm:$0xff] }
  0x8a   :  { %590 = vmatprep.mubr.f32.mxu0 %v129_v55  ;;  %971 = vmatpush1.msra.mxu0 %v3278_v12  ;;  %v3379_v55 = vld [vmem:[%s7514_s1 + $0x9f8] sm:$0xff]  ;;  %v3368_v10 = vld [vmem:[%s7514_s1 + $0x9a0] sm:$0xff] }
  0x8b   :  { %972 = vmatprep.subr.mxu0 %v3277_v14  ;;  %905 = vmatprep.subr.mxu1 %v3319_v47  ;;  %v3367_v12 = vld [vmem:[%s7514_s1 + $0x998] sm:$0xff]  ;;  %v3366_v14 = vld [vmem:[%s7514_s1 + $0x990] sm:$0xff]  ;;  %v3297_v47 = vld [vmem:[%s7514_s1 + $0x768] sm:$0xff] }
  0x8c   :  { %973 = vmatpush1.msra.mxu0 %v3276_v16  ;;  %906 = vmatpush1.msra.mxu1 %v3318_v49  ;;  %v3365_v16 = vld [vmem:[%s7514_s1 + $0x988] sm:$0xff]  ;;  %v3296_v49 = vld [vmem:[%s7514_s1 + $0x760] sm:$0xff] }
  0x8d   :  { %591 = vmatmul.mubr.f32.gmra.mxu0 %v126_v58  ;;  %974 = vmatprep.subr.mxu0 %v3275_v18  ;;  %v3255_v58 = vld [vmem:[%s7514_s1 + $0x618] sm:$0xff]  ;;  %v3364_v18 = vld [vmem:[%s7514_s1 + $0x980] sm:$0xff] }
  0x8e   :  { %596 = vmatprep.mubr.f32.mxu0 %v133_v61  ;;  %975 = vmatpush1.msra.mxu0 %v3274_v20  ;;  %v3374_v61 = vld [vmem:[%s7514_s1 + $0x9d0] sm:$0xff]  ;;  %v3363_v20 = vld [vmem:[%s7514_s1 + $0x978] sm:$0xff] }
  0x8f   :  { %976 = vmatprep.subr.mxu0 %v3273_v23  ;;  %907 = vmatprep.subr.mxu1 %v3317_v51  ;;  %v3362_v23 = vld [vmem:[%s7514_s1 + $0x970] sm:$0xff]  ;;  %v3295_v51 = vld [vmem:[%s7514_s1 + $0x758] sm:$0xff] }
  0x90   :  { %977 = vmatpush1.msra.mxu0 %v3272_v25  ;;  %908 = vmatpush1.msra.mxu1 %v3316_v53  ;;  %v3360_v25 = vld [vmem:[%s7514_s1 + $0x960] sm:$0xff]  ;;  %v3411_v53 = vld [vmem:[%s7514_s1 + $0xaf8] sm:$0xff] }
  0x91   :  { %597 = vmatmul.mubr.f32.gmra.mxu0 %v131_v5  ;;  %978 = vmatprep.subr.mxu0 %v3271_v28  ;;  %v3314_v5 = vld [vmem:[%s7514_s1 + $0x7f0] sm:$0xff] }
  0x92   :  { %979 = vmatpush1.msra.mxu0 %v3270_v30  ;;  %909 = vmatprep.subr.mxu1 %v3379_v55  ;;  %v3358_v28 = vld [vmem:[%s7514_s1 + $0x950] sm:$0xff]  ;;  %v3357_v30 = vld [vmem:[%s7514_s1 + $0x948] sm:$0xff]  ;;  %v3292_v55 = vld [vmem:[%s7514_s1 + $0x740] sm:$0xff] }
  0x93   :  { %980 = vmatprep.subr.mxu0 %v3269_v32  ;;  %910 = vmatpush2.msra.mxu1 %v3378_v21  ;;  %v3356_v32 = vld [vmem:[%s7514_s1 + $0x940] sm:$0xff]  ;;  %v3290_v21 = vld [vmem:[%s7514_s1 + $0x730] sm:$0xff] }
  0x94   :  { %981 = vmatpush1.msra.mxu0 %v3268_v34  ;;  %911 = vmatprep.subr.mxu1 %v3377_v42  ;;  %v3355_v34 = vld [vmem:[%s7514_s1 + $0x938] sm:$0xff]  ;;  %v3288_v42 = vld [vmem:[%s7514_s1 + $0x720] sm:$0xff] }
  0x95   :  { %982 = vmatprep.subr.mxu0 %v3267_v37  ;;  %912 = vmatpush2.msra.mxu1 %v3376_v57  ;;  %v3354_v37 = vld [vmem:[%s7514_s1 + $0x930] sm:$0xff] }
  0x96   :  { %983 = vmatpush1.msra.mxu0 %v3266_v39  ;;  %913 = vmatprep.subr.mxu1 %v3375_v59  ;;  %v3353_v39 = vld [vmem:[%s7514_s1 + $0x928] sm:$0xff]  ;;  %v3286_v57 = vld [vmem:[%s7514_s1 + $0x710] sm:$0xff]  ;;  %v3284_v59 = vld [vmem:[%s7514_s1 + $0x700] sm:$0xff] }
  0x97   :  { %984 = vmatprep.subr.mxu0 %v3265_v43  ;;  %914 = vmatpush2.msra.mxu1 %v3374_v61  ;;  %v3352_v43 = vld [vmem:[%s7514_s1 + $0x920] sm:$0xff] }
  0x98   :  { %985 = vmatpush1.msra.mxu0 %v3264_v44  ;;  %915 = vmatprep.subr.mxu1 %v3373_v63  ;;  %v3351_v44 = vld [vmem:[%s7514_s1 + $0x918] sm:$0xff] }
  0x99   :  { %986 = vmatprep.subr.mxu0 %v3263_v46  ;;  %916 = vmatpush2.msra.mxu1 %v3372_v2  ;;  %v3350_v46 = vld [vmem:[%s7514_s1 + $0x910] sm:$0xff] }
  0x9a   :  { %987 = vmatpush1.msra.mxu0 %v3262_v48  ;;  %917 = vmatprep.subr.mxu1 %v3371_v4  ;;  %v3349_v48 = vld [vmem:[%s7514_s1 + $0x908] sm:$0xff] }
  0x9b   :  { %988 = vmatprep.subr.mxu0 %v3261_v50  ;;  %918 = vmatpush2.msra.mxu1 %v3370_v6  ;;  %v3348_v50 = vld [vmem:[%s7514_s1 + $0x900] sm:$0xff]  ;;  %v614_v6 = vshrl.u32 %v17_v0, 7 }
  0x9c   :  { %989 = vmatpush1.msra.mxu0 %v3260_v52  ;;  %919 = vmatprep.subr.mxu1 %v3369_v8  ;;  %v3294_v52 = vld [vmem:[%s7514_s1 + $0x750] sm:$0xff] }
  0x9d   :  { %990 = vmatprep.subr.mxu0 %v3259_v54  ;;  %920 = vmatpush2.msra.mxu1 %v3368_v10  ;;  %v3293_v54 = vld [vmem:[%s7514_s1 + $0x748] sm:$0xff] }
  0x9e   :  { %991 = vmatpush1.msra.mxu0 %v3258_v40  ;;  %921 = vmatprep.subr.mxu1 %v3367_v12  ;;  %v3291_v40 = vld [vmem:[%s7514_s1 + $0x738] sm:$0xff]  ;;  %v611_v10 = vld [vmem:[%s7516_s3] ss:$8 sm:$0x3]  ;;  %v5101_v12 = vsub.s32 1, %v614_v6 }
  0x9f   :  { %992 = vmatprep.subr.mxu0 %v3257_v36  ;;  %922 = vmatpush2.msra.mxu1 %v3366_v14  ;;  %v3289_v36 = vld [vmem:[%s7514_s1 + $0x728] sm:$0xff] }
  0xa0   :  { %993 = vmatpush1.msra.mxu0 %v3256_v56  ;;  %923 = vmatprep.subr.mxu1 %v3365_v16  ;;  %v3287_v56 = vld [vmem:[%s7514_s1 + $0x718] sm:$0xff]  ;;  %v620_v0 = vrot.slane %v611_v10, %v5101_v12 }
  0xa1   :  { %994 = vmatprep.subr.mxu0 %v3255_v58  ;;  %924 = vmatpush2.msra.mxu1 %v3364_v18  ;;  %v3285_v58 = vld [vmem:[%s7514_s1 + $0x708] sm:$0xff] }
  0xa2   :  { %995 = vmatpush1.msra.mxu0 %v3254_v60  ;;  %925 = vmatprep.subr.mxu1 %v3363_v20 }
  0xa3   :  { %996 = vmatprep.subr.mxu0 %v3253_v62  ;;  %926 = vmatpush2.msra.mxu1 %v3362_v23 }
  0xa4   :  { %997 = vmatpush1.msra.mxu0 %v3252_v1  ;;  %927 = vmatprep.subr.mxu1 %v3361_v24 }
  0xa5   :  { %998 = vmatprep.subr.mxu0 %v3315_v3  ;;  %928 = vmatpush2.msra.mxu1 %v3360_v25 }
  0xa6   :  { %999 = vmatpush2.msra.mxu0 %v3314_v5  ;;  %929 = vmatprep.subr.mxu1 %v3359_v26 }
  0xa7   :  { %1000 = vmatprep.subr.mxu0 %v3313_v7  ;;  %930 = vmatpush2.msra.mxu1 %v3358_v28 }
  0xa8   :  { %1001 = vmatpush2.msra.mxu0 %v3312_v9  ;;  %931 = vmatprep.subr.mxu1 %v3357_v30  ;;  %v5096_v9 = vsub.s32 0, %v614_v6 }
  0xa9   :  { %1002 = vmatprep.subr.mxu0 %v3311_v11  ;;  %932 = vmatpush2.msra.mxu1 %v3356_v32 }
  0xaa   :  { %1003 = vmatpush2.msra.mxu0 %v3310_v13  ;;  %933 = vmatprep.subr.mxu1 %v3355_v34 }
  0xab   :  { %1004 = vmatprep.subr.mxu0 %v3309_v15  ;;  %934 = vmatpush2.msra.mxu1 %v3354_v37  ;;  %v616_v15 = vrot.slane %v611_v10, %v5096_v9  ;;  %v3404_v10 = vld [vmem:[%s7514_s1 + $0xac0] sm:$0xff] }
  0xac   :  { %1005 = vmatpush2.msra.mxu0 %v3308_v17  ;;  %935 = vmatprep.subr.mxu1 %v3353_v39 }
  0xad   :  { %1006 = vmatprep.subr.mxu0 %v3307_v19  ;;  %936 = vmatpush2.msra.mxu1 %v3352_v43 }
  0xae   :  { %1007 = vmatpush2.msra.mxu0 %v3306_v22  ;;  %937 = vmatprep.subr.mxu1 %v3351_v44 }
  0xaf   :  { %1008 = vmatprep.subr.mxu0 %v3305_v29  ;;  %938 = vmatpush2.msra.mxu1 %v3350_v46 }
  0xb0   :  { %1009 = vmatpush2.msra.mxu0 %v3304_v31  ;;  %939 = vmatprep.subr.mxu1 %v3349_v48 }
  0xb1   :  { %1010 = vmatprep.subr.mxu0 %v3303_v33  ;;  %940 = vmatpush2.msra.mxu1 %v3348_v50 }
  0xb2   :  { %1011 = vmatpush2.msra.mxu0 %v3302_v35  ;;  %1120 = vmatprep.subr.mxu1 %v3411_v53  ;;  %v3410_v53 = vld [vmem:[%s7514_s1 + $0xaf0] sm:$0xff] }
  0xb3   :  { %1012 = vmatprep.subr.mxu0 %v3301_v38 }
  0xb4   :  { %1013 = vmatpush2.msra.mxu0 %v3300_v41 }
  0xb5   :  { %1014 = vmatprep.subr.mxu0 %v3299_v27 }
  0xb6   :  { %1015 = vmatpush2.msra.mxu0 %v3298_v45 }
  0xb7   :  { %1016 = vmatprep.subr.mxu0 %v3297_v47 }
  0xb8   :  { %1017 = vmatpush2.msra.mxu0 %v3296_v49 }
  0xb9   :  { %1018 = vmatprep.subr.mxu0 %v3295_v51 }
  0xba   :  { %1019 = vmatpush2.msra.mxu0 %v3294_v52 }
  0xbb   :  { %1020 = vmatprep.subr.mxu0 %v3293_v54 }
  0xbc   :  { %1021 = vmatpush2.msra.mxu0 %v3292_v55 }
  0xbd   :  { %1022 = vmatprep.subr.mxu0 %v3291_v40 }
  0xbe   :  { %1023 = vmatpush2.msra.mxu0 %v3290_v21 }
  0xbf   :  { %1024 = vmatprep.subr.mxu0 %v3289_v36  ;;  %v3409_v36 = vld [vmem:[%s7514_s1 + $0xae8] sm:$0xff] }
  0xc0   :  { %1025 = vmatpush2.msra.mxu0 %v3288_v42 }
  0xc1   :  { %1026 = vmatprep.subr.mxu0 %v3287_v56 }
  0xc2   :  { %1027 = vmatpush2.msra.mxu0 %v3286_v57 }
  0xc3   :  { %1028 = vmatprep.subr.mxu0 %v3285_v58  ;;  %v3408_v58 = vld [vmem:[%s7514_s1 + $0xae0] sm:$0xff] }
  0xc4   :  { %1029 = vmatpush2.msra.mxu0 %v3284_v59 }
 0x103   :  { %v337_v60 = vpop.f32.mrf.mxu0 }
 0x104   :  { %v426_v1 = vpop.f32.mrf.mxu1 }
 0x105   :  { %v339_v61 = vpop.f32.mrf.mxu0  ;;  %v427_v14 = vadd.f32 %v426_v1, %v337_v60 }
 0x106   :  { %v428_v3 = vpop.f32.mrf.mxu1 }
 0x107   :  { %v429_v17 = vadd.f32 %v428_v3, %v339_v61  ;;  %v3407_v61 = vld [vmem:[%s7514_s1 + $0xad8] sm:$0xff] }
 0x108   :  { %v432_v4 = vpop.f32.mrf.mxu1 }
 0x109   :  { %v343_v62 = vpop.f32.mrf.mxu0 }
 0x10a   :  { %v434_v7 = vpop.f32.mrf.mxu1  ;;  %v433_v22 = vadd.f32 %v432_v4, %v343_v62  ;;  %v3406_v4 = vld [vmem:[%s7514_s1 + $0xad0] sm:$0xff] }
 0x10b   :  { %v345_v63 = vpop.f32.mrf.mxu0 }
 0x10c   :  { %v438_v11 = vpop.f32.mrf.mxu1  ;;  %v435_v26 = vadd.f32 %v434_v7, %v345_v63 }
 0x10d   :  { %v349_v2 = vpop.f32.mrf.mxu0 }
 0x10e   :  { %v440_v18 = vpop.f32.mrf.mxu1  ;;  %v439_v32 = vadd.f32 %v438_v11, %v349_v2 }
 0x10f   :  { %v351_v5 = vpop.f32.mrf.mxu0 }
 0x110   :  { %v444_v28 = vpop.f32.mrf.mxu1  ;;  %v441_v39 = vadd.f32 %v440_v18, %v351_v5  ;;  %v3405_v5 = vld [vmem:[%s7514_s1 + $0xac8] sm:$0xff] }
 0x111   :  { %v355_v8 = vpop.f32.mrf.mxu0 }
 0x112   :  { %v446_v43 = vpop.f32.mrf.mxu1  ;;  %v445_v47 = vadd.f32 %v444_v28, %v355_v8  ;;  %v3399_v28 = vld [vmem:[%s7514_s1 + $0xa98] sm:$0xff] }
 0x113   :  { %v357_v13 = vpop.f32.mrf.mxu0 }
 0x114   :  { %v447_v55 = vadd.f32 %v446_v43, %v357_v13  ;;  %v3403_v13 = vld [vmem:[%s7514_s1 + $0xab8] sm:$0xff] }
 0x145   :  { %v580_v16 = vpop.f32.mrf.mxu0 }
 0x146   :  { %v603_v19 = vadd.f32 %v580_v16, %v427_v14 }
 0x147   :  { %v582_v20 = vpop.f32.mrf.mxu0 }
 0x148   :  { %v623_v23 = vadd.f32 %v616_v15, %v603_v19  ;;  %v604_v24 = vadd.f32 %v582_v20, %v429_v17  ;;  %v3402_v17 = vld [vmem:[%s7514_s1 + $0xab0] sm:$0xff] }
 0x149   :  { %v586_v25 = vpop.f32.mrf.mxu0 }
 0x14a   :  { %v631_v29 = vmul.f32 0.05, %v623_v23  ;;  %v624_v30 = vadd.f32 %v620_v0, %v604_v24  ;;  %v605_v31 = vadd.f32 %v586_v25, %v433_v22  ;;  %v3400_v22 = vld [vmem:[%s7514_s1 + $0xaa0] sm:$0xff] }
 0x14b   :  { %v588_v33 = vpop.f32.mrf.mxu0 }
 0x14c   :  { %v5105_v34 = vmax.f32 %v623_v23, %v631_v29  ;;  %v632_v35 = vmul.f32 0.05, %v624_v30  ;;  %v625_v37 = vadd.f32 %v616_v15, %v605_v31  ;;  %v606_v38 = vadd.f32 %v588_v33, %v435_v26  ;;  %v3398_v31 = vld [vmem:[%s7514_s1 + $0xa90] sm:$0xff]  ;;  %v3397_v33 = vld [vmem:[%s7514_s1 + $0xa88] sm:$0xff] }
 0x14d   :  { %v592_v41 = vpop.f32.mrf.mxu0 }
 0x14e   :  { %v655_v27 = vrot.slane %v5105_v34, 7  ;;  %v633_v44 = vmul.f32 0.05, %v625_v37  ;;  %v626_v45 = vadd.f32 %v620_v0, %v606_v38  ;;  %v607_v46 = vadd.f32 %v592_v41, %v439_v32  ;;  %v3394_v41 = vld [vmem:[%s7514_s1 + $0xa70] sm:$0xff] }
 0x14f   :  { %v594_v48 = vpop.f32.mrf.mxu0  ;;  %v5108_v49 = vmax.f32 %v624_v30, %v632_v35  ;;  %v3396_v35 = vld [vmem:[%s7514_s1 + $0xa80] sm:$0xff] }
 0x150   :  { %679 = vst [vmem:[#allocation2] sm:$0xfe] %v655_v27  ;;  %v634_v50 = vmul.f32 0.05, %v626_v45  ;;  %v627_v51 = vadd.f32 %v616_v15, %v607_v46  ;;  %v608_v52 = vadd.f32 %v594_v48, %v441_v39  ;;  %v5115_v54 = vmax.f32 %v625_v37, %v633_v44  ;;  %v3395_v39 = vld [vmem:[%s7514_s1 + $0xa78] sm:$0xff]  ;;  %v3392_v44 = vld [vmem:[%s7514_s1 + $0xa60] sm:$0xff] }
 0x151   :  { %v656_v40 = vrot.slane %v5108_v49, 7  ;;  %941 = vmatprep.mubr.f32.mxu1 %v5108_v49  ;;  %v598_v21 = vpop.f32.mrf.mxu0  ;;  %v3391_v46 = vld [vmem:[%s7514_s1 + $0xa58] sm:$0xff]  ;;  %v3390_v48 = vld [vmem:[%s7514_s1 + $0xa50] sm:$0xff] }
 0x152   :  { %v635_v42 = vmul.f32 0.05, %v627_v51  ;;  %v628_v56 = vadd.f32 %v620_v0, %v608_v52  ;;  %v609_v57 = vadd.f32 %v598_v21, %v445_v47  ;;  %942 = vmatmul.mubr.f32.vlgmr.msra.gmra.mxu1 %v5105_v34  ;;  %v5126_v59 = vmax.f32 %v626_v45, %v634_v50  ;;  %v3389_v50 = vld [vmem:[%s7514_s1 + $0xa48] sm:$0xff]  ;;  %v3384_v21 = vld [vmem:[%s7514_s1 + $0xa20] sm:$0xff] }
 0x153   :  { %680 = vst [vmem:[#allocation2 + $0x8] sm:$0xfe] %v656_v40  ;;  %1121 = vmatpush1.msra.mxu1 %v3410_v53  ;;  %v600_v60 = vpop.f32.mrf.mxu0  ;;  %v657_v62 = vrot.slane %v5115_v54, 7  ;;  %v3387_v53 = vld [vmem:[%s7514_s1 + $0xa38] sm:$0xff] }
 0x154   :  { %v636_v63 = vmul.f32 0.05, %v628_v56  ;;  %v629_v1 = vadd.f32 %v616_v15, %v609_v57  ;;  %1122 = vmatprep.subr.mxu1 %v3409_v36  ;;  %v610_v2 = vadd.f32 %v600_v60, %v447_v55  ;;  %v659_v3 = vrot.slane %v5126_v59, 7  ;;  %947 = vmatprep.mubr.f32.mxu1 %v5126_v59  ;;  %v3386_v55 = vld [vmem:[%s7514_s1 + $0xa30] sm:$0xff]  ;;  %v3383_v36 = vld [vmem:[%s7514_s1 + $0xa18] sm:$0xff]  ;;  %v3380_v57 = vld [vmem:[%s7514_s1 + $0xa00] sm:$0xff] }
 0x155   :  { %1123 = vmatpush1.msra.mxu1 %v3408_v58  ;;  %683 = vst [vmem:[#allocation2 + $0x20] sm:$0x1] %v657_v62  ;;  %v5140_v6 = vmax.f32 %v627_v51, %v635_v42  ;;  %v5196_v38 = vsel %vm48_vm1, %v655_v27, %v657_v62  ;;  %v3393_v27 = vld [vmem:[%s7514_s1 + $0xa68] sm:$0xff]  ;;  %v3388_v51 = vld [vmem:[%s7514_s1 + $0xa40] sm:$0xff]  ;;  %v3382_v42 = vld [vmem:[%s7514_s1 + $0xa10] sm:$0xff] }
 0x156   :  { %v637_v7 = vmul.f32 0.05, %v629_v1  ;;  %v630_v8 = vadd.f32 %v620_v0, %v610_v2  ;;  %684 = vst [vmem:[#allocation2 + $0x28] sm:$0x1] %v659_v3  ;;  %1124 = vmatprep.subr.mxu1 %v3407_v61  ;;  %948 = vmatmul.mubr.f32.gmra.mxu1 %v5115_v54  ;;  %v5146_v11 = vmax.f32 %v628_v56, %v636_v63  ;;  %v3401_v0 = vld [vmem:[%s7514_s1 + $0xaa8] sm:$0xff]  ;;  %v3443_v58 = vld [vmem:[%s7514_s1 + $0xbf8] sm:$0xff] }
 0x157   :  { %1125 = vmatpush1.msra.mxu1 %v3406_v4  ;;  %v661_v14 = vrot.slane %v5140_v6, 7  ;;  %v5160_v19 = vsel %vm48_vm1, %v656_v40, %v659_v3  ;;  %v691_v26 = vld [vmem:[#allocation2] sm:$0xff]  ;;  %v3385_v40 = vld [vmem:[%s7514_s1 + $0xa28] sm:$0xff]  ;;  %v3442_v60 = vld [vmem:[%s7514_s1 + $0xbf0] sm:$0xff] }
 0x158   :  { %v638_v15 = vmul.f32 0.05, %v630_v8  ;;  %1126 = vmatprep.subr.mxu1 %v3405_v5  ;;  %v662_v16 = vrot.slane %v5146_v11, 7  ;;  %953 = vmatprep.mubr.f32.mxu1 %v5146_v11  ;;  %v5157_v18 = vmax.f32 %v629_v1, %v637_v7  ;;  %v723_v32 = vrot.slane %v5160_v19, 2  ;;  %v3381_v56 = vld [vmem:[%s7514_s1 + $0xa08] sm:$0xff]  ;;  %v3440_v62 = vld [vmem:[%s7514_s1 + $0xbe0] sm:$0xff] }
 0x159   :  { %1127 = vmatpush1.msra.mxu1 %v3404_v10  ;;  %685 = vst [vmem:[#allocation2 + $0x30] sm:$0xfe] %v661_v14  ;;  %v3441_v61 = vld [vmem:[%s7514_s1 + $0xbe8] sm:$0xff]  ;;  %v3439_v63 = vld [vmem:[%s7514_s1 + $0xbd8] sm:$0xff]  ;;  %v3438_v1 = vld [vmem:[%s7514_s1 + $0xbd0] sm:$0xff] }
 0x15a   :  { %686 = vst [vmem:[#allocation2 + $0x38] sm:$0xfe] %v662_v16  ;;  %1128 = vmatprep.subr.mxu1 %v3403_v13  ;;  %954 = vmatmul.mubr.f32.gmra.mxu1 %v5140_v6  ;;  %v692_v20 = vld [vmem:[#allocation2 + $0x8] sm:$0xff]  ;;  %v5171_v23 = vmax.f32 %v630_v8, %v638_v15  ;;  %v663_v24 = vrot.slane %v5157_v18, 7  ;;  %v3436_v3 = vld [vmem:[%s7514_s1 + $0xbc0] sm:$0xff]  ;;  %v3435_v4 = vld [vmem:[%s7514_s1 + $0xbb8] sm:$0xff] }
 0x15b   :  { %v700_v25 = vld [vmem:[#allocation2 + $0x8] sm:$0xfc]  ;;  %1129 = vmatpush1.msra.mxu1 %v3402_v17  ;;  %1030 = vmatprep.mubr.f32.mxu0 %v692_v20  ;;  %v3434_v5 = vld [vmem:[%s7514_s1 + $0xbb0] sm:$0xff]  ;;  %v3432_v8 = vld [vmem:[%s7514_s1 + $0xba0] sm:$0xff] }
 0x15c   :  { %v722_v29 = vrot.slane %v700_v25, 2  ;;  %1130 = vmatprep.subr.mxu1 %v3401_v0  ;;  %1031 = vmatmul.mubr.f32.vlgmr.msra.gmra.mxu0 %v691_v26  ;;  %v665_v30 = vrot.slane %v5171_v23, 7  ;;  %689 = vst [vmem:[#allocation2 + $0x50] sm:$0x1] %v663_v24  ;;  %v5231_v52 = vsel %vm48_vm1, %v661_v14, %v663_v24  ;;  %v3437_v2 = vld [vmem:[%s7514_s1 + $0xbc8] sm:$0xff]  ;;  %v3431_v10 = vld [vmem:[%s7514_s1 + $0xb98] sm:$0xff] }
 0x15d   :  { %1131 = vmatpush1.msra.mxu1 %v3400_v22  ;;  %959 = vmatprep.mubr.f32.mxu1 %v5171_v23  ;;  %v3433_v7 = vld [vmem:[%s7514_s1 + $0xba8] sm:$0xff]  ;;  %v3430_v13 = vld [vmem:[%s7514_s1 + $0xb90] sm:$0xff]  ;;  %v3428_v15 = vld [vmem:[%s7514_s1 + $0xb80] sm:$0xff] }
 0x15e   :  { %690 = vst [vmem:[#allocation2 + $0x58] sm:$0x1] %v665_v30  ;;  %1132 = vmatprep.subr.mxu1 %v3399_v28  ;;  %960 = vmatmul.mubr.f32.gmra.mxu1 %v5157_v18  ;;  %v724_v37 = vsel %vm113_vm2, %v722_v29, %v723_v32  ;;  %v5216_v47 = vsel %vm48_vm1, %v662_v16, %v665_v30  ;;  %v3429_v14 = vld [vmem:[%s7514_s1 + $0xb88] sm:$0xff]  ;;  %v3427_v16 = vld [vmem:[%s7514_s1 + $0xb78] sm:$0xff]  ;;  %v3426_v17 = vld [vmem:[%s7514_s1 + $0xb70] sm:$0xff] }
 0x15f   :  { %1133 = vmatpush1.msra.mxu1 %v3398_v31  ;;  %1036 = vmatprep.mubr.f32.mxu0 %v5160_v19  ;;  %v3425_v0 = vld [vmem:[%s7514_s1 + $0xb68] sm:$0xff]  ;;  %v3424_v20 = vld [vmem:[%s7514_s1 + $0xb60] sm:$0xff]  ;;  %v3423_v22 = vld [vmem:[%s7514_s1 + $0xb58] sm:$0xff] }
 0x160   :  { %1134 = vmatprep.subr.mxu1 %v3397_v33  ;;  %1037 = vmatmul.mubr.f32.gmra.mxu0 %v5196_v38  ;;  %v695_v45 = vld [vmem:[#allocation2 + $0x30] sm:$0xff]  ;;  %v3421_v25 = vld [vmem:[%s7514_s1 + $0xb48] sm:$0xff]  ;;  %v3420_v26 = vld [vmem:[%s7514_s1 + $0xb40] sm:$0xff] }
 0x161   :  { %1135 = vmatpush1.msra.mxu1 %v3396_v35  ;;  %v696_v43 = vld [vmem:[#allocation2 + $0x38] sm:$0xff]  ;;  %1184 = vmatprep.mubr.f32.mxu1 %v724_v37  ;;  %v3422_v24 = vld [vmem:[%s7514_s1 + $0xb50] sm:$0xff]  ;;  %v3417_v30 = vld [vmem:[%s7514_s1 + $0xb28] sm:$0xff] }
 0x162   :  { %1136 = vmatprep.subr.mxu1 %v3395_v39  ;;  %1042 = vmatprep.mubr.f32.mxu0 %v696_v43  ;;  %v3419_v28 = vld [vmem:[%s7514_s1 + $0xb38] sm:$0xff]  ;;  %v3418_v29 = vld [vmem:[%s7514_s1 + $0xb30] sm:$0xff]  ;;  %v3416_v31 = vld [vmem:[%s7514_s1 + $0xb20] sm:$0xff] }
 0x163   :  { %1137 = vmatpush1.msra.mxu1 %v3394_v41  ;;  %v699_v33 = vld [vmem:[#allocation2] sm:$0xfc]  ;;  %v3415_v35 = vld [vmem:[%s7514_s1 + $0xb18] sm:$0xff]  ;;  %v702_v37 = vld [vmem:[#allocation2 + $0x28] sm:$0x3] }
 0x164   :  { %1138 = vmatprep.subr.mxu1 %v3393_v27  ;;  %1043 = vmatmul.mubr.f32.gmra.mxu0 %v695_v45  ;;  %v3414_v39 = vld [vmem:[%s7514_s1 + $0xb10] sm:$0xff]  ;;  %v3413_v41 = vld [vmem:[%s7514_s1 + $0xb08] sm:$0xff]  ;;  %v719_v43 = vrot.slane %v699_v33, 2  ;;  %v3412_v27 = vld [vmem:[%s7514_s1 + $0xb00] sm:$0xff] }
 0x165   :  { %1139 = vmatpush1.msra.mxu1 %v3392_v44  ;;  %1048 = vmatprep.mubr.f32.mxu0 %v5216_v47  ;;  %v727_v44 = vrot.slane %v702_v37, 2  ;;  %v701_v45 = vld [vmem:[#allocation2 + $0x20] sm:$0x3]  ;;  %v3468_v37 = vld [vmem:[%s7514_s1 + $0xcb8] sm:$0xff] }
 0x166   :  { %1140 = vmatprep.subr.mxu1 %v3391_v46  ;;  %v720_v46 = vrot.slane %v5196_v38, 2  ;;  %v3469_v33 = vld [vmem:[%s7514_s1 + $0xcc0] sm:$0xff] }
 0x167   :  { %1141 = vmatpush1.msra.mxu1 %v3390_v48  ;;  %v704_v48 = vld [vmem:[#allocation2 + $0x38] sm:$0xfc] }
 0x168   :  { %1142 = vmatprep.subr.mxu1 %v3389_v50  ;;  %1049 = vmatmul.mubr.f32.gmra.mxu0 %v5231_v52  ;;  %v721_v50 = vsel %vm113_vm2, %v719_v43, %v720_v46  ;;  %v3466_v43 = vld [vmem:[%s7514_s1 + $0xca8] sm:$0xff] }
 0x169   :  { %1143 = vmatpush1.msra.mxu1 %v3388_v51  ;;  %v725_v51 = vrot.slane %v701_v45, 2  ;;  %v3518_v45 = vld [vmem:[%s7514_s1 + $0xe48] sm:$0xff] }
 0x16a   :  { %1144 = vmatprep.subr.mxu1 %v3387_v53  ;;  %v728_v53 = vsel %vm113_vm2, %v723_v32, %v727_v44  ;;  %v3465_v44 = vld [vmem:[%s7514_s1 + $0xca0] sm:$0xff] }
 0x16b   :  { %1145 = vmatpush1.msra.mxu1 %v3386_v55  ;;  %v732_v55 = vrot.slane %v704_v48, 2  ;;  %v726_v38 = vsel %vm113_vm2, %v720_v46, %v725_v51  ;;  %v3464_v46 = vld [vmem:[%s7514_s1 + $0xc98] sm:$0xff]  ;;  %v3517_v48 = vld [vmem:[%s7514_s1 + $0xe40] sm:$0xff] }
 0x16c   :  { %1146 = vmatprep.subr.mxu1 %v3385_v40  ;;  %v703_v40 = vld [vmem:[#allocation2 + $0x30] sm:$0xfc]  ;;  %v3516_v51 = vld [vmem:[%s7514_s1 + $0xe38] sm:$0xff] }
 0x16d   :  { %1147 = vmatpush1.msra.mxu1 %v3384_v21  ;;  %v706_v21 = vld [vmem:[#allocation2 + $0x58] sm:$0x3] }
 0x16e   :  { %1148 = vmatprep.subr.mxu1 %v3383_v36  ;;  %v733_v36 = vrot.slane %v5216_v47, 2 }
 0x16f   :  { %1149 = vmatpush1.msra.mxu1 %v3382_v42  ;;  %v729_v42 = vrot.slane %v703_v40, 2  ;;  %v3461_v40 = vld [vmem:[%s7514_s1 + $0xc80] sm:$0xff] }
 0x170   :  { %1150 = vmatprep.subr.mxu1 %v3381_v56  ;;  %v734_v56 = vsel %vm113_vm2, %v732_v55, %v733_v36  ;;  %v3515_v55 = vld [vmem:[%s7514_s1 + $0xe30] sm:$0xff] }
 0x171   :  { %1151 = vmatpush1.msra.mxu1 %v3380_v57  ;;  %v737_v57 = vrot.slane %v706_v21, 2  ;;  %v3514_v21 = vld [vmem:[%s7514_s1 + $0xe28] sm:$0xff] }
 0x172   :  { %1152 = vmatprep.subr.mxu1 %v3443_v58  ;;  %v705_v58 = vld [vmem:[#allocation2 + $0x50] sm:$0x3] }
 0x173   :  { %1153 = vmatpush2.msra.mxu1 %v3442_v60  ;;  %v730_v60 = vrot.slane %v5231_v52, 2  ;;  %v735_v32 = vrot.slane %v705_v58, 2  ;;  %v3538_v52 = vld [vmem:[%s7514_s1 + $0xee8] sm:$0xff]  ;;  %v3511_v58 = vld [vmem:[%s7514_s1 + $0xe10] sm:$0xff] }
 0x174   :  { %1154 = vmatprep.subr.mxu1 %v3441_v61  ;;  %v738_v61 = vsel %vm113_vm2, %v733_v36, %v737_v57  ;;  %v3460_v36 = vld [vmem:[%s7514_s1 + $0xc78] sm:$0xff]  ;;  %v3458_v57 = vld [vmem:[%s7514_s1 + $0xc68] sm:$0xff] }
 0x175   :  { %1155 = vmatpush2.msra.mxu1 %v3440_v62  ;;  %v731_v19 = vsel %vm113_vm2, %v729_v42, %v730_v60  ;;  %v736_v47 = vsel %vm113_vm2, %v730_v60, %v735_v32  ;;  %v3540_v62 = vld [vmem:[%s7514_s1 + $0xef8] sm:$0xff]  ;;  %v3459_v42 = vld [vmem:[%s7514_s1 + $0xc70] sm:$0xff]  ;;  %v3457_v60 = vld [vmem:[%s7514_s1 + $0xc60] sm:$0xff] }
 0x176   :  { %1156 = vmatprep.subr.mxu1 %v3439_v63  ;;  %v3539_v63 = vld [vmem:[%s7514_s1 + $0xef0] sm:$0xff]  ;;  %1484 = vmatprep.subr.mxu0 %v3540_v62  ;;  %v3456_v32 = vld [vmem:[%s7514_s1 + $0xc58] sm:$0xff] }
 0x177   :  { %1157 = vmatpush2.msra.mxu1 %v3438_v1  ;;  %1485 = vmatpush1.msra.mxu0 %v3539_v63  ;;  %v3537_v1 = vld [vmem:[%s7514_s1 + $0xee0] sm:$0xff]  ;;  %v3572_v62 = vld [vmem:[%s7514_s1 + $0xff8] sm:$0xff]  ;;  %v3454_v63 = vld [vmem:[%s7514_s1 + $0xc48] sm:$0xff] }
 0x178   :  { %1158 = vmatprep.subr.mxu1 %v3437_v2  ;;  %1486 = vmatprep.subr.mxu0 %v3538_v52  ;;  %v3536_v2 = vld [vmem:[%s7514_s1 + $0xed8] sm:$0xff]  ;;  %v3571_v52 = vld [vmem:[%s7514_s1 + $0xff0] sm:$0xff] }
 0x179   :  { %1159 = vmatpush2.msra.mxu1 %v3436_v3  ;;  %1487 = vmatpush1.msra.mxu0 %v3537_v1  ;;  %v3535_v3 = vld [vmem:[%s7514_s1 + $0xed0] sm:$0xff]  ;;  %v3453_v1 = vld [vmem:[%s7514_s1 + $0xc40] sm:$0xff] }
 0x17a   :  { %1160 = vmatprep.subr.mxu1 %v3435_v4  ;;  %v3534_v4 = vld [vmem:[%s7514_s1 + $0xec8] sm:$0xff]  ;;  %1488 = vmatprep.subr.mxu0 %v3536_v2 }
 0x17b   :  { %1161 = vmatpush2.msra.mxu1 %v3434_v5  ;;  %1489 = vmatpush1.msra.mxu0 %v3535_v3  ;;  %v3533_v5 = vld [vmem:[%s7514_s1 + $0xec0] sm:$0xff]  ;;  %v3570_v2 = vld [vmem:[%s7514_s1 + $0xfe8] sm:$0xff]  ;;  %v3452_v3 = vld [vmem:[%s7514_s1 + $0xc38] sm:$0xff] }
 0x17c   :  { %1162 = vmatprep.subr.mxu1 %v3433_v7  ;;  %v3532_v7 = vld [vmem:[%s7514_s1 + $0xeb8] sm:$0xff]  ;;  %1490 = vmatprep.subr.mxu0 %v3534_v4  ;;  %v3569_v4 = vld [vmem:[%s7514_s1 + $0xfe0] sm:$0xff] }
 0x17d   :  { %1163 = vmatpush2.msra.mxu1 %v3432_v8  ;;  %1491 = vmatpush1.msra.mxu0 %v3533_v5  ;;  %v3531_v8 = vld [vmem:[%s7514_s1 + $0xeb0] sm:$0xff] }
 0x17e   :  { %1164 = vmatprep.subr.mxu1 %v3431_v10  ;;  %v3530_v10 = vld [vmem:[%s7514_s1 + $0xea8] sm:$0xff]  ;;  %1492 = vmatprep.subr.mxu0 %v3532_v7  ;;  %v3451_v5 = vld [vmem:[%s7514_s1 + $0xc30] sm:$0xff]  ;;  %v3568_v7 = vld [vmem:[%s7514_s1 + $0xfd8] sm:$0xff] }
 0x17f   :  { %1165 = vmatpush2.msra.mxu1 %v3430_v13  ;;  %1493 = vmatpush1.msra.mxu0 %v3531_v8  ;;  %v3529_v13 = vld [vmem:[%s7514_s1 + $0xea0] sm:$0xff]  ;;  %v3450_v8 = vld [vmem:[%s7514_s1 + $0xc28] sm:$0xff] }
 0x180   :  { %1166 = vmatprep.subr.mxu1 %v3429_v14  ;;  %v3476_v14 = vld [vmem:[%s7514_s1 + $0xcf8] sm:$0xff]  ;;  %1494 = vmatprep.subr.mxu0 %v3530_v10  ;;  %v3567_v10 = vld [vmem:[%s7514_s1 + $0xfd0] sm:$0xff] }
 0x181   :  { %1167 = vmatpush2.msra.mxu1 %v3428_v15  ;;  %v3528_v15 = vld [vmem:[%s7514_s1 + $0xe98] sm:$0xff]  ;;  %1495 = vmatpush1.msra.mxu0 %v3529_v13  ;;  %v3449_v13 = vld [vmem:[%s7514_s1 + $0xc20] sm:$0xff] }
 0x182   :  { %1168 = vmatprep.subr.mxu1 %v3427_v16  ;;  %v3475_v16 = vld [vmem:[%s7514_s1 + $0xcf0] sm:$0xff]  ;;  %1496 = vmatprep.subr.mxu0 %v3528_v15  ;;  %v3448_v15 = vld [vmem:[%s7514_s1 + $0xc18] sm:$0xff] }
 0x183   :  { %1169 = vmatpush2.msra.mxu1 %v3426_v17  ;;  %v3527_v17 = vld [vmem:[%s7514_s1 + $0xe90] sm:$0xff] }
 0x184   :  { %1170 = vmatprep.subr.mxu1 %v3425_v0  ;;  %v3474_v0 = vld [vmem:[%s7514_s1 + $0xce8] sm:$0xff]  ;;  %1497 = vmatpush1.msra.mxu0 %v3527_v17  ;;  %v3447_v17 = vld [vmem:[%s7514_s1 + $0xc10] sm:$0xff] }
 0x185   :  { %1171 = vmatpush2.msra.mxu1 %v3424_v20  ;;  %v3526_v20 = vld [vmem:[%s7514_s1 + $0xe88] sm:$0xff] }
 0x186   :  { %1172 = vmatprep.subr.mxu1 %v3423_v22  ;;  %v3473_v22 = vld [vmem:[%s7514_s1 + $0xce0] sm:$0xff]  ;;  %1498 = vmatprep.subr.mxu0 %v3526_v20  ;;  %v3446_v20 = vld [vmem:[%s7514_s1 + $0xc08] sm:$0xff] }
 0x187   :  { %1173 = vmatpush2.msra.mxu1 %v3422_v24  ;;  %v3525_v24 = vld [vmem:[%s7514_s1 + $0xe80] sm:$0xff] }
 0x188   :  { %1174 = vmatprep.subr.mxu1 %v3421_v25  ;;  %v3472_v25 = vld [vmem:[%s7514_s1 + $0xcd8] sm:$0xff]  ;;  %1499 = vmatpush1.msra.mxu0 %v3525_v24  ;;  %v3445_v24 = vld [vmem:[%s7514_s1 + $0xc00] sm:$0xff] }
 0x189   :  { %1175 = vmatpush2.msra.mxu1 %v3420_v26  ;;  %v3524_v26 = vld [vmem:[%s7514_s1 + $0xe78] sm:$0xff] }
 0x18a   :  { %1176 = vmatprep.subr.mxu1 %v3419_v28  ;;  %v3471_v28 = vld [vmem:[%s7514_s1 + $0xcd0] sm:$0xff]  ;;  %1500 = vmatprep.subr.mxu0 %v3524_v26  ;;  %v3508_v26 = vld [vmem:[%s7514_s1 + $0xdf8] sm:$0xff] }
 0x18b   :  { %1177 = vmatpush2.msra.mxu1 %v3418_v29  ;;  %v3523_v29 = vld [vmem:[%s7514_s1 + $0xe70] sm:$0xff] }
 0x18c   :  { %1178 = vmatprep.subr.mxu1 %v3417_v30  ;;  %v3470_v30 = vld [vmem:[%s7514_s1 + $0xcc8] sm:$0xff]  ;;  %1501 = vmatpush1.msra.mxu0 %v3523_v29  ;;  %v3507_v29 = vld [vmem:[%s7514_s1 + $0xdf0] sm:$0xff] }
 0x18d   :  { %1179 = vmatpush2.msra.mxu1 %v3416_v31  ;;  %v3522_v31 = vld [vmem:[%s7514_s1 + $0xe68] sm:$0xff] }
 0x18e   :  { %1180 = vmatprep.subr.mxu1 %v3415_v35  ;;  %v3521_v35 = vld [vmem:[%s7514_s1 + $0xe60] sm:$0xff]  ;;  %1502 = vmatprep.subr.mxu0 %v3522_v31  ;;  %v3506_v31 = vld [vmem:[%s7514_s1 + $0xde8] sm:$0xff] }
 0x18f   :  { %1181 = vmatpush2.msra.mxu1 %v3414_v39  ;;  %v3467_v39 = vld [vmem:[%s7514_s1 + $0xcb0] sm:$0xff]  ;;  %1503 = vmatpush1.msra.mxu0 %v3521_v35  ;;  %v3505_v35 = vld [vmem:[%s7514_s1 + $0xde0] sm:$0xff] }
 0x190   :  { %1182 = vmatprep.subr.mxu1 %v3413_v41  ;;  %v3520_v41 = vld [vmem:[%s7514_s1 + $0xe58] sm:$0xff] }
 0x191   :  { %1183 = vmatpush2.msra.mxu1 %v3412_v27  ;;  %v3519_v27 = vld [vmem:[%s7514_s1 + $0xe50] sm:$0xff]  ;;  %1504 = vmatprep.subr.mxu0 %v3520_v41  ;;  %v3557_v41 = vld [vmem:[%s7514_s1 + $0xf80] sm:$0xff] }
 0x192   :  { %1185 = vmatmul.mubr.f32.vlgmr.msra.gmra.mxu1 %v721_v50  ;;  %1573 = vmatprep.subr.mxu1 %v3476_v14  ;;  %v3463_v50 = vld [vmem:[%s7514_s1 + $0xc90] sm:$0xff]  ;;  %v3566_v14 = vld [vmem:[%s7514_s1 + $0xfc8] sm:$0xff] }
 0x193   :  { %1190 = vmatprep.mubr.f32.mxu1 %v728_v53  ;;  %1574 = vmatpush1.msra.mxu1 %v3475_v16  ;;  %v3462_v53 = vld [vmem:[%s7514_s1 + $0xc88] sm:$0xff]  ;;  %v3565_v16 = vld [vmem:[%s7514_s1 + $0xfc0] sm:$0xff] }
 0x194   :  { %1575 = vmatprep.subr.mxu1 %v3474_v0  ;;  %1505 = vmatpush1.msra.mxu0 %v3519_v27  ;;  %v3564_v0 = vld [vmem:[%s7514_s1 + $0xfb8] sm:$0xff] }
 0x195   :  { %1576 = vmatpush1.msra.mxu1 %v3473_v22  ;;  %1506 = vmatprep.subr.mxu0 %v3518_v45  ;;  %v3563_v22 = vld [vmem:[%s7514_s1 + $0xfb0] sm:$0xff]  ;;  %v3556_v27 = vld [vmem:[%s7514_s1 + $0xf78] sm:$0xff] }
 0x196   :  { %1191 = vmatmul.mubr.f32.gmra.mxu1 %v726_v38  ;;  %1577 = vmatprep.subr.mxu1 %v3472_v25  ;;  %v3513_v38 = vld [vmem:[%s7514_s1 + $0xe20] sm:$0xff]  ;;  %v3562_v25 = vld [vmem:[%s7514_s1 + $0xfa8] sm:$0xff]  ;;  %v3555_v45 = vld [vmem:[%s7514_s1 + $0xf70] sm:$0xff] }
 0x197   :  { %1196 = vmatprep.mubr.f32.mxu1 %v734_v56  ;;  %1578 = vmatpush1.msra.mxu1 %v3471_v28  ;;  %v3512_v56 = vld [vmem:[%s7514_s1 + $0xe18] sm:$0xff]  ;;  %v3561_v28 = vld [vmem:[%s7514_s1 + $0xfa0] sm:$0xff] }
 0x198   :  { %1579 = vmatprep.subr.mxu1 %v3470_v30  ;;  %1507 = vmatpush1.msra.mxu0 %v3517_v48  ;;  %v3560_v30 = vld [vmem:[%s7514_s1 + $0xf98] sm:$0xff]  ;;  %v3554_v48 = vld [vmem:[%s7514_s1 + $0xf68] sm:$0xff] }
 0x199   :  { %1580 = vmatpush1.msra.mxu1 %v3469_v33  ;;  %1508 = vmatprep.subr.mxu0 %v3516_v51  ;;  %v3559_v33 = vld [vmem:[%s7514_s1 + $0xf90] sm:$0xff]  ;;  %v3553_v51 = vld [vmem:[%s7514_s1 + $0xf60] sm:$0xff] }
 0x19a   :  { %1197 = vmatmul.mubr.f32.gmra.mxu1 %v731_v19  ;;  %1581 = vmatprep.subr.mxu1 %v3468_v37  ;;  %v3510_v19 = vld [vmem:[%s7514_s1 + $0xe08] sm:$0xff] }
 0x19b   :  { %1202 = vmatprep.mubr.f32.mxu1 %v738_v61  ;;  %1582 = vmatpush1.msra.mxu1 %v3467_v39  ;;  %v3509_v61 = vld [vmem:[%s7514_s1 + $0xe00] sm:$0xff]  ;;  %v3558_v37 = vld [vmem:[%s7514_s1 + $0xf88] sm:$0xff]  ;;  %v3504_v39 = vld [vmem:[%s7514_s1 + $0xdd8] sm:$0xff] }
 0x19c   :  { %1583 = vmatprep.subr.mxu1 %v3466_v43  ;;  %1509 = vmatpush1.msra.mxu0 %v3515_v55  ;;  %v3503_v43 = vld [vmem:[%s7514_s1 + $0xdd0] sm:$0xff]  ;;  %v3552_v55 = vld [vmem:[%s7514_s1 + $0xf58] sm:$0xff] }
 0x19d   :  { %1584 = vmatpush1.msra.mxu1 %v3465_v44  ;;  %1510 = vmatprep.subr.mxu0 %v3514_v21  ;;  %v3502_v44 = vld [vmem:[%s7514_s1 + $0xdc8] sm:$0xff] }
 0x19e   :  { %1203 = vmatmul.mubr.f32.gmra.mxu1 %v736_v47  ;;  %1585 = vmatprep.subr.mxu1 %v3464_v46  ;;  %v3455_v47 = vld [vmem:[%s7514_s1 + $0xc50] sm:$0xff]  ;;  %v3501_v46 = vld [vmem:[%s7514_s1 + $0xdc0] sm:$0xff]  ;;  %v3498_v21 = vld [vmem:[%s7514_s1 + $0xda8] sm:$0xff] }
 0x19f   :  { %1586 = vmatpush1.msra.mxu1 %v3463_v50  ;;  %1511 = vmatpush1.msra.mxu0 %v3513_v38  ;;  %v3500_v50 = vld [vmem:[%s7514_s1 + $0xdb8] sm:$0xff]  ;;  %v3497_v38 = vld [vmem:[%s7514_s1 + $0xda0] sm:$0xff] }
 0x1a0   :  { %1587 = vmatprep.subr.mxu1 %v3462_v53  ;;  %1512 = vmatprep.subr.mxu0 %v3512_v56  ;;  %v3499_v53 = vld [vmem:[%s7514_s1 + $0xdb0] sm:$0xff]  ;;  %v3496_v56 = vld [vmem:[%s7514_s1 + $0xd98] sm:$0xff] }
 0x1a1   :  { %1588 = vmatpush1.msra.mxu1 %v3461_v40  ;;  %1513 = vmatpush1.msra.mxu0 %v3511_v58  ;;  %v3551_v40 = vld [vmem:[%s7514_s1 + $0xf50] sm:$0xff] }
 0x1a2   :  { %1589 = vmatprep.subr.mxu1 %v3460_v36  ;;  %1514 = vmatprep.subr.mxu0 %v3510_v19  ;;  %v3550_v36 = vld [vmem:[%s7514_s1 + $0xf48] sm:$0xff]  ;;  %v3495_v58 = vld [vmem:[%s7514_s1 + $0xd90] sm:$0xff] }
 0x1a3   :  { %1590 = vmatpush1.msra.mxu1 %v3459_v42  ;;  %1515 = vmatpush1.msra.mxu0 %v3509_v61  ;;  %v3549_v42 = vld [vmem:[%s7514_s1 + $0xf40] sm:$0xff]  ;;  %v3494_v19 = vld [vmem:[%s7514_s1 + $0xd88] sm:$0xff] }
 0x1a4   :  { %1591 = vmatprep.subr.mxu1 %v3458_v57  ;;  %1516 = vmatprep.subr.mxu0 %v3572_v62  ;;  %v3548_v57 = vld [vmem:[%s7514_s1 + $0xf38] sm:$0xff]  ;;  %v3493_v61 = vld [vmem:[%s7514_s1 + $0xd80] sm:$0xff] }
 0x1a5   :  { %1592 = vmatpush1.msra.mxu1 %v3457_v60  ;;  %1517 = vmatpush2.msra.mxu0 %v3571_v52  ;;  %v3547_v60 = vld [vmem:[%s7514_s1 + $0xf30] sm:$0xff]  ;;  %v3492_v62 = vld [vmem:[%s7514_s1 + $0xd78] sm:$0xff] }
 0x1a6   :  { %1593 = vmatprep.subr.mxu1 %v3456_v32  ;;  %1518 = vmatprep.subr.mxu0 %v3570_v2  ;;  %v3546_v32 = vld [vmem:[%s7514_s1 + $0xf28] sm:$0xff]  ;;  %v3491_v52 = vld [vmem:[%s7514_s1 + $0xd70] sm:$0xff] }
 0x1a7   :  { %1594 = vmatpush1.msra.mxu1 %v3455_v47  ;;  %1519 = vmatpush2.msra.mxu0 %v3569_v4  ;;  %v3545_v47 = vld [vmem:[%s7514_s1 + $0xf20] sm:$0xff]  ;;  %v3490_v2 = vld [vmem:[%s7514_s1 + $0xd68] sm:$0xff] }
 0x1a8   :  { %1595 = vmatprep.subr.mxu1 %v3454_v63  ;;  %1520 = vmatprep.subr.mxu0 %v3568_v7  ;;  %v3544_v63 = vld [vmem:[%s7514_s1 + $0xf18] sm:$0xff]  ;;  %v3489_v4 = vld [vmem:[%s7514_s1 + $0xd60] sm:$0xff] }
 0x1a9   :  { %1596 = vmatpush1.msra.mxu1 %v3453_v1  ;;  %1521 = vmatpush2.msra.mxu0 %v3567_v10  ;;  %v3543_v1 = vld [vmem:[%s7514_s1 + $0xf10] sm:$0xff]  ;;  %v3488_v7 = vld [vmem:[%s7514_s1 + $0xd58] sm:$0xff] }
 0x1aa   :  { %1597 = vmatprep.subr.mxu1 %v3452_v3  ;;  %1522 = vmatprep.subr.mxu0 %v3566_v14  ;;  %v3542_v3 = vld [vmem:[%s7514_s1 + $0xf08] sm:$0xff]  ;;  %v3604_v10 = vld [vmem:[%s7514_s1 + $0x10f8] sm:$0xff]  ;;  %v3485_v14 = vld [vmem:[%s7514_s1 + $0xd40] sm:$0xff] }
 0x1ab   :  { %1598 = vmatpush1.msra.mxu1 %v3451_v5  ;;  %1523 = vmatpush2.msra.mxu0 %v3565_v16  ;;  %v3541_v5 = vld [vmem:[%s7514_s1 + $0xf00] sm:$0xff]  ;;  %v3483_v16 = vld [vmem:[%s7514_s1 + $0xd30] sm:$0xff] }
 0x1ac   :  { %1599 = vmatprep.subr.mxu1 %v3450_v8  ;;  %1524 = vmatprep.subr.mxu0 %v3564_v0  ;;  %v3487_v8 = vld [vmem:[%s7514_s1 + $0xd50] sm:$0xff]  ;;  %v3481_v0 = vld [vmem:[%s7514_s1 + $0xd20] sm:$0xff] }
 0x1ad   :  { %1600 = vmatpush1.msra.mxu1 %v3449_v13  ;;  %1525 = vmatpush2.msra.mxu0 %v3563_v22  ;;  %v3486_v13 = vld [vmem:[%s7514_s1 + $0xd48] sm:$0xff]  ;;  %v3479_v22 = vld [vmem:[%s7514_s1 + $0xd10] sm:$0xff] }
 0x1ae   :  { %1601 = vmatprep.subr.mxu1 %v3448_v15  ;;  %1526 = vmatprep.subr.mxu0 %v3562_v25  ;;  %v3484_v15 = vld [vmem:[%s7514_s1 + $0xd38] sm:$0xff]  ;;  %v3477_v25 = vld [vmem:[%s7514_s1 + $0xd00] sm:$0xff] }
 0x1af   :  { %1602 = vmatpush1.msra.mxu1 %v3447_v17  ;;  %1527 = vmatpush2.msra.mxu0 %v3561_v28  ;;  %v3482_v17 = vld [vmem:[%s7514_s1 + $0xd28] sm:$0xff] }
 0x1b0   :  { %1603 = vmatprep.subr.mxu1 %v3446_v20  ;;  %1528 = vmatprep.subr.mxu0 %v3560_v30  ;;  %v3480_v20 = vld [vmem:[%s7514_s1 + $0xd18] sm:$0xff] }
 0x1b1   :  { %1604 = vmatpush1.msra.mxu1 %v3445_v24  ;;  %1529 = vmatpush2.msra.mxu0 %v3559_v33  ;;  %v3478_v24 = vld [vmem:[%s7514_s1 + $0xd08] sm:$0xff] }
 0x1b2   :  { %1605 = vmatprep.subr.mxu1 %v3508_v26  ;;  %1530 = vmatprep.subr.mxu0 %v3558_v37 }
 0x1b3   :  { %1606 = vmatpush2.msra.mxu1 %v3507_v29  ;;  %1531 = vmatpush2.msra.mxu0 %v3557_v41 }
 0x1b4   :  { %1607 = vmatprep.subr.mxu1 %v3506_v31  ;;  %1532 = vmatprep.subr.mxu0 %v3556_v27  ;;  %v3444_v27 = vld [vmem:[%s7516_s3 + $0x1] ss:$8 sm:$0x3] }
 0x1b5   :  { %1608 = vmatpush2.msra.mxu1 %v3505_v35  ;;  %1533 = vmatpush2.msra.mxu0 %v3555_v45 }
 0x1b6   :  { %1609 = vmatprep.subr.mxu1 %v3504_v39  ;;  %1534 = vmatprep.subr.mxu0 %v3554_v48  ;;  %v1223_v48 = vrot.slane %v3444_v27, %v5096_v9 }
 0x1b7   :  { %1610 = vmatpush2.msra.mxu1 %v3503_v43  ;;  %1535 = vmatpush2.msra.mxu0 %v3553_v51 }
 0x1b8   :  { %1611 = vmatprep.subr.mxu1 %v3502_v44  ;;  %1536 = vmatprep.subr.mxu0 %v3552_v55 }
 0x1b9   :  { %1612 = vmatpush2.msra.mxu1 %v3501_v46  ;;  %1537 = vmatpush2.msra.mxu0 %v3551_v40  ;;  %v1227_v40 = vrot.slane %v3444_v27, %v5101_v12 }
 0x1ba   :  { %1613 = vmatprep.subr.mxu1 %v3500_v50  ;;  %1538 = vmatprep.subr.mxu0 %v3550_v36 }
 0x1bb   :  { %1614 = vmatpush2.msra.mxu1 %v3499_v53  ;;  %1539 = vmatpush2.msra.mxu0 %v3549_v42 }
 0x1bc   :  { %1615 = vmatprep.subr.mxu1 %v3498_v21  ;;  %1540 = vmatprep.subr.mxu0 %v3548_v57 }
 0x1bd   :  { %1616 = vmatpush2.msra.mxu1 %v3497_v38  ;;  %1541 = vmatpush2.msra.mxu0 %v3547_v60 }
 0x1be   :  { %1617 = vmatprep.subr.mxu1 %v3496_v56  ;;  %1542 = vmatprep.subr.mxu0 %v3546_v32 }
 0x1bf   :  { %1618 = vmatpush2.msra.mxu1 %v3495_v58  ;;  %1543 = vmatpush2.msra.mxu0 %v3545_v47 }
 0x1c0   :  { %1619 = vmatprep.subr.mxu1 %v3494_v19  ;;  %1544 = vmatprep.subr.mxu0 %v3544_v63 }
 0x1c1   :  { %1620 = vmatpush2.msra.mxu1 %v3493_v61  ;;  %1545 = vmatpush2.msra.mxu0 %v3543_v1 }
 0x1c2   :  { %1621 = vmatprep.subr.mxu1 %v3492_v62  ;;  %1546 = vmatprep.subr.mxu0 %v3542_v3 }
 0x1c3   :  { %1622 = vmatpush2.msra.mxu1 %v3491_v52  ;;  %1547 = vmatpush2.msra.mxu0 %v3541_v5 }
 0x1c4   :  { %1623 = vmatprep.subr.mxu1 %v3490_v2  ;;  %1727 = vmatprep.subr.mxu0 %v3604_v10 }
 0x1c5   :  { %1624 = vmatpush2.msra.mxu1 %v3489_v4 }
 0x1c6   :  { %1625 = vmatprep.subr.mxu1 %v3488_v7 }
 0x1c7   :  { %1626 = vmatpush2.msra.mxu1 %v3487_v8 }
 0x1c8   :  { %1627 = vmatprep.subr.mxu1 %v3486_v13 }
 0x1c9   :  { %1628 = vmatpush2.msra.mxu1 %v3485_v14 }
 0x1ca   :  { %1629 = vmatprep.subr.mxu1 %v3484_v15 }
 0x1cb   :  { %1630 = vmatpush2.msra.mxu1 %v3483_v16 }
 0x1cc   :  { %1631 = vmatprep.subr.mxu1 %v3482_v17 }
 0x1cd   :  { %1632 = vmatpush2.msra.mxu1 %v3481_v0 }
 0x1ce   :  { %1633 = vmatprep.subr.mxu1 %v3480_v20  ;;  %v3603_v20 = vld [vmem:[%s7514_s1 + $0x10f0] sm:$0xff] }
 0x1cf   :  { %1634 = vmatpush2.msra.mxu1 %v3479_v22 }
 0x1d0   :  { %1635 = vmatprep.subr.mxu1 %v3478_v24 }
 0x1d1   :  { %1636 = vmatpush2.msra.mxu1 %v3477_v25 }
 0x212   :  { %v943_v26 = vpop.f32.mrf.mxu1 }
 0x214   :  { %v945_v28 = vpop.f32.mrf.mxu1 }
 0x216   :  { %v949_v29 = vpop.f32.mrf.mxu1 }
 0x218   :  { %v951_v31 = vpop.f32.mrf.mxu1 }
 0x21a   :  { %v955_v35 = vpop.f32.mrf.mxu1 }
 0x21c   :  { %v1032_v30 = vpop.f32.mrf.mxu0  ;;  %v957_v39 = vpop.f32.mrf.mxu1 }
 0x21d   :  { %v1033_v46 = vadd.f32 %v1032_v30, %v943_v26 }
 0x21e   :  { %v1034_v33 = vpop.f32.mrf.mxu0  ;;  %v961_v43 = vpop.f32.mrf.mxu1 }
 0x21f   :  { %v1035_v51 = vadd.f32 %v1034_v33, %v945_v28  ;;  %v3602_v28 = vld [vmem:[%s7514_s1 + $0x10e8] sm:$0xff]  ;;  %v3601_v33 = vld [vmem:[%s7514_s1 + $0x10e0] sm:$0xff] }
 0x220   :  { %v1038_v37 = vpop.f32.mrf.mxu0  ;;  %v963_v45 = vpop.f32.mrf.mxu1 }
 0x221   :  { %v1039_v36 = vadd.f32 %v1038_v37, %v949_v29 }
 0x222   :  { %v1040_v41 = vpop.f32.mrf.mxu0 }
 0x223   :  { %v1041_v57 = vadd.f32 %v1040_v41, %v951_v31 }
 0x224   :  { %v1044_v44 = vpop.f32.mrf.mxu0 }
 0x225   :  { %v1045_v61 = vadd.f32 %v1044_v44, %v955_v35 }
 0x226   :  { %v1046_v53 = vpop.f32.mrf.mxu0 }
 0x227   :  { %v1047_v2 = vadd.f32 %v1046_v53, %v957_v39  ;;  %v3600_v39 = vld [vmem:[%s7514_s1 + $0x10d8] sm:$0xff] }
 0x228   :  { %v1050_v58 = vpop.f32.mrf.mxu0 }
 0x229   :  { %v1051_v13 = vadd.f32 %v1050_v58, %v961_v43 }
 0x22a   :  { %v1052_v4 = vpop.f32.mrf.mxu0 }
 0x22b   :  { %v1053_v24 = vadd.f32 %v1052_v4, %v963_v45  ;;  %v3591_v4 = vld [vmem:[%s7514_s1 + $0x1090] sm:$0xff] }
 0x252   :  { %v1186_v50 = vpop.f32.mrf.mxu1 }
 0x253   :  { %v1209_v55 = vadd.f32 %v1186_v50, %v1033_v46  ;;  %v3599_v46 = vld [vmem:[%s7514_s1 + $0x10d0] sm:$0xff]  ;;  %v3598_v50 = vld [vmem:[%s7514_s1 + $0x10c8] sm:$0xff] }
 0x254   :  { %v1188_v21 = vpop.f32.mrf.mxu1 }
 0x255   :  { %v1230_v38 = vadd.f32 %v1223_v48, %v1209_v55  ;;  %v1210_v42 = vadd.f32 %v1188_v21, %v1035_v51  ;;  %v3597_v55 = vld [vmem:[%s7514_s1 + $0x10c0] sm:$0xff] }
 0x256   :  { %v1192_v56 = vpop.f32.mrf.mxu1 }
 0x257   :  { %v1238_v60 = vmul.f32 0.05, %v1230_v38  ;;  %v1231_v19 = vadd.f32 %v1227_v40, %v1210_v42  ;;  %v1211_v32 = vadd.f32 %v1192_v56, %v1039_v36  ;;  %v3596_v36 = vld [vmem:[%s7514_s1 + $0x10b8] sm:$0xff]  ;;  %v3595_v56 = vld [vmem:[%s7514_s1 + $0x10b0] sm:$0xff] }
 0x258   :  { %v1194_v47 = vpop.f32.mrf.mxu1 }
 0x259   :  { %v5758_v62 = vmax.f32 %v1230_v38, %v1238_v60  ;;  %v1239_v63 = vmul.f32 0.05, %v1231_v19  ;;  %v1232_v52 = vadd.f32 %v1223_v48, %v1211_v32  ;;  %v1212_v1 = vadd.f32 %v1194_v47, %v1041_v57  ;;  %v3594_v60 = vld [vmem:[%s7514_s1 + $0x10a8] sm:$0xff]  ;;  %v3593_v32 = vld [vmem:[%s7514_s1 + $0x10a0] sm:$0xff] }
 0x25a   :  { %v1198_v3 = vpop.f32.mrf.mxu1 }
 0x25b   :  { %v1262_v5 = vrot.slane %v5758_v62, 7  ;;  %v1240_v7 = vmul.f32 0.05, %v1232_v52  ;;  %v1233_v8 = vadd.f32 %v1227_v40, %v1212_v1  ;;  %v1213_v10 = vadd.f32 %v1198_v3, %v1045_v61  ;;  %v3592_v1 = vld [vmem:[%s7514_s1 + $0x1098] sm:$0xff] }
 0x25c   :  { %v1200_v14 = vpop.f32.mrf.mxu1  ;;  %v5761_v15 = vmax.f32 %v1231_v19, %v1239_v63 }
 0x25d   :  { %1286 = vst [vmem:[#allocation2] sm:$0xfe] %v1262_v5  ;;  %v1241_v16 = vmul.f32 0.05, %v1233_v8  ;;  %v1234_v17 = vadd.f32 %v1223_v48, %v1213_v10  ;;  %v1214_v0 = vadd.f32 %v1200_v14, %v1047_v2  ;;  %v5768_v22 = vmax.f32 %v1232_v52, %v1240_v7  ;;  %v3589_v10 = vld [vmem:[%s7514_s1 + $0x1080] sm:$0xff] }
 0x25e   :  { %v1263_v25 = vrot.slane %v5761_v15, 7  ;;  %1548 = vmatprep.mubr.f32.mxu0 %v5761_v15  ;;  %v1204_v26 = vpop.f32.mrf.mxu1 }
 0x25f   :  { %v1242_v29 = vmul.f32 0.05, %v1234_v17  ;;  %v1235_v30 = vadd.f32 %v1227_v40, %v1214_v0  ;;  %v1215_v31 = vadd.f32 %v1204_v26, %v1051_v13  ;;  %1549 = vmatmul.mubr.f32.vlgmr.msra.gmra.mxu0 %v5758_v62  ;;  %v5779_v35 = vmax.f32 %v1233_v8, %v1241_v16  ;;  %v3590_v8 = vld [vmem:[%s7514_s1 + $0x1088] sm:$0xff]  ;;  %v3588_v16 = vld [vmem:[%s7514_s1 + $0x1078] sm:$0xff] }
 0x260   :  { %1287 = vst [vmem:[#allocation2 + $0x8] sm:$0xfe] %v1263_v25  ;;  %1728 = vmatpush1.msra.mxu0 %v3603_v20  ;;  %v1206_v37 = vpop.f32.mrf.mxu1  ;;  %v1264_v41 = vrot.slane %v5768_v22, 7  ;;  %v3585_v20 = vld [vmem:[%s7514_s1 + $0x1060] sm:$0xff] }
 0x261   :  { %v1243_v43 = vmul.f32 0.05, %v1235_v30  ;;  %v1236_v27 = vadd.f32 %v1223_v48, %v1215_v31  ;;  %1729 = vmatprep.subr.mxu0 %v3602_v28  ;;  %v1216_v44 = vadd.f32 %v1206_v37, %v1053_v24  ;;  %v1266_v45 = vrot.slane %v5779_v35, 7  ;;  %1554 = vmatprep.mubr.f32.mxu0 %v5779_v35  ;;  %v3583_v28 = vld [vmem:[%s7514_s1 + $0x1050] sm:$0xff] }
 0x262   :  { %1730 = vmatpush1.msra.mxu0 %v3601_v33  ;;  %1290 = vst [vmem:[#allocation2 + $0x20] sm:$0x1] %v1264_v41  ;;  %v5793_v51 = vmax.f32 %v1234_v17, %v1242_v29  ;;  %v5849_v14 = vsel %vm48_vm1, %v1262_v5, %v1264_v41  ;;  %v3587_v17 = vld [vmem:[%s7514_s1 + $0x1070] sm:$0xff]  ;;  %v3586_v5 = vld [vmem:[%s7514_s1 + $0x1068] sm:$0xff]  ;;  %v3580_v33 = vld [vmem:[%s7514_s1 + $0x1038] sm:$0xff] }
 0x263   :  { %v1244_v53 = vmul.f32 0.05, %v1236_v27  ;;  %v1237_v48 = vadd.f32 %v1227_v40, %v1216_v44  ;;  %1291 = vst [vmem:[#allocation2 + $0x28] sm:$0x1] %v1266_v45  ;;  %1731 = vmatprep.subr.mxu0 %v3600_v39  ;;  %1555 = vmatmul.mubr.f32.gmra.mxu0 %v5768_v22  ;;  %v5799_v21 = vmax.f32 %v1235_v30, %v1243_v43  ;;  %v3582_v29 = vld [vmem:[%s7514_s1 + $0x1048] sm:$0xff]  ;;  %v3581_v30 = vld [vmem:[%s7514_s1 + $0x1040] sm:$0xff] }
 0x264   :  { %1732 = vmatpush1.msra.mxu0 %v3599_v46  ;;  %v1268_v38 = vrot.slane %v5793_v51, 7  ;;  %v5813_v58 = vsel %vm48_vm1, %v1263_v25, %v1266_v45  ;;  %v1298_v52 = vld [vmem:[#allocation2] sm:$0xff]  ;;  %v3584_v25 = vld [vmem:[%s7514_s1 + $0x1058] sm:$0xff]  ;;  %v3579_v37 = vld [vmem:[%s7514_s1 + $0x1030] sm:$0xff] }
 0x265   :  { %v1245_v42 = vmul.f32 0.05, %v1237_v48  ;;  %1733 = vmatprep.subr.mxu0 %v3598_v50  ;;  %v1269_v40 = vrot.slane %v5799_v21, 7  ;;  %1560 = vmatprep.mubr.f32.mxu0 %v5799_v21  ;;  %v5810_v57 = vmax.f32 %v1236_v27, %v1244_v53  ;;  %v1330_v7 = vrot.slane %v5813_v58, 2  ;;  %v3578_v39 = vld [vmem:[%s7514_s1 + $0x1028] sm:$0xff]  ;;  %v3577_v41 = vld [vmem:[%s7514_s1 + $0x1020] sm:$0xff] }
 0x266   :  { %1734 = vmatpush1.msra.mxu0 %v3597_v55  ;;  %1292 = vst [vmem:[#allocation2 + $0x30] sm:$0xfe] %v1268_v38  ;;  %v3576_v43 = vld [vmem:[%s7514_s1 + $0x1018] sm:$0xff]  ;;  %v3575_v27 = vld [vmem:[%s7514_s1 + $0x1010] sm:$0xff]  ;;  %v3574_v44 = vld [vmem:[%s7514_s1 + $0x1008] sm:$0xff] }
 0x267   :  { %1293 = vst [vmem:[#allocation2 + $0x38] sm:$0xfe] %v1269_v40  ;;  %1735 = vmatprep.subr.mxu0 %v3596_v36  ;;  %1561 = vmatmul.mubr.f32.gmra.mxu0 %v5793_v51  ;;  %v1299_v19 = vld [vmem:[#allocation2 + $0x8] sm:$0xff]  ;;  %v5824_v61 = vmax.f32 %v1237_v48, %v1245_v42  ;;  %v1270_v47 = vrot.slane %v5810_v57, 7  ;;  %v3573_v45 = vld [vmem:[%s7514_s1 + $0x1000] sm:$0xff]  ;;  %v3636_v46 = vld [vmem:[%s7514_s1 + $0x11f8] sm:$0xff] }
 0x268   :  { %v1307_v63 = vld [vmem:[#allocation2 + $0x8] sm:$0xfc]  ;;  %1736 = vmatpush1.msra.mxu0 %v3595_v56  ;;  %1637 = vmatprep.mubr.f32.mxu1 %v1299_v19  ;;  %v3635_v50 = vld [vmem:[%s7514_s1 + $0x11f0] sm:$0xff]  ;;  %v3633_v48 = vld [vmem:[%s7514_s1 + $0x11e0] sm:$0xff] }
 0x269   :  { %v1329_v2 = vrot.slane %v1307_v63, 2  ;;  %1737 = vmatprep.subr.mxu0 %v3594_v60  ;;  %1638 = vmatmul.mubr.f32.vlgmr.msra.gmra.mxu1 %v1298_v52  ;;  %v1272_v3 = vrot.slane %v5824_v61, 7  ;;  %1296 = vst [vmem:[#allocation2 + $0x50] sm:$0x1] %v1270_v47  ;;  %v5884_v31 = vsel %vm48_vm1, %v1268_v38, %v1270_v47  ;;  %v3634_v53 = vld [vmem:[%s7514_s1 + $0x11e8] sm:$0xff]  ;;  %v3632_v55 = vld [vmem:[%s7514_s1 + $0x11d8] sm:$0xff] }
 0x26a   :  { %1738 = vmatpush1.msra.mxu0 %v3593_v32  ;;  %1566 = vmatprep.mubr.f32.mxu0 %v5824_v61  ;;  %v3631_v36 = vld [vmem:[%s7514_s1 + $0x11d0] sm:$0xff]  ;;  %v3630_v38 = vld [vmem:[%s7514_s1 + $0x11c8] sm:$0xff]  ;;  %v3629_v42 = vld [vmem:[%s7514_s1 + $0x11c0] sm:$0xff] }
 0x26b   :  { %1297 = vst [vmem:[#allocation2 + $0x58] sm:$0x1] %v1272_v3  ;;  %1739 = vmatprep.subr.mxu0 %v3592_v1  ;;  %1567 = vmatmul.mubr.f32.gmra.mxu0 %v5810_v57  ;;  %v1331_v13 = vsel %vm113_vm2, %v1329_v2, %v1330_v7  ;;  %v5869_v26 = vsel %vm48_vm1, %v1269_v40, %v1272_v3  ;;  %v3628_v40 = vld [vmem:[%s7514_s1 + $0x11b8] sm:$0xff]  ;;  %v3627_v56 = vld [vmem:[%s7514_s1 + $0x11b0] sm:$0xff]  ;;  %v3626_v60 = vld [vmem:[%s7514_s1 + $0x11a8] sm:$0xff] }
 0x26c   :  { %1740 = vmatpush1.msra.mxu0 %v3591_v4  ;;  %1643 = vmatprep.mubr.f32.mxu1 %v5813_v58  ;;  %v3625_v19 = vld [vmem:[%s7514_s1 + $0x11a0] sm:$0xff]  ;;  %v3624_v32 = vld [vmem:[%s7514_s1 + $0x1198] sm:$0xff]  ;;  %v3623_v47 = vld [vmem:[%s7514_s1 + $0x1190] sm:$0xff] }
 0x26d   :  { %1741 = vmatprep.subr.mxu0 %v3590_v8  ;;  %1644 = vmatmul.mubr.f32.gmra.mxu1 %v5849_v14  ;;  %v1302_v24 = vld [vmem:[#allocation2 + $0x30] sm:$0xff]  ;;  %v3622_v63 = vld [vmem:[%s7514_s1 + $0x1188] sm:$0xff]  ;;  %v3621_v52 = vld [vmem:[%s7514_s1 + $0x1180] sm:$0xff] }
 0x26e   :  { %1742 = vmatpush1.msra.mxu0 %v3589_v10  ;;  %v1303_v0 = vld [vmem:[#allocation2 + $0x38] sm:$0xff]  ;;  %1791 = vmatprep.mubr.f32.mxu0 %v1331_v13  ;;  %v3619_v2 = vld [vmem:[%s7514_s1 + $0x1170] sm:$0xff]  ;;  %v3618_v3 = vld [vmem:[%s7514_s1 + $0x1168] sm:$0xff] }
 0x26f   :  { %1743 = vmatprep.subr.mxu0 %v3588_v16  ;;  %1649 = vmatprep.mubr.f32.mxu1 %v1303_v0  ;;  %v3620_v1 = vld [vmem:[%s7514_s1 + $0x1178] sm:$0xff]  ;;  %v3617_v4 = vld [vmem:[%s7514_s1 + $0x1160] sm:$0xff]  ;;  %v3615_v10 = vld [vmem:[%s7514_s1 + $0x1150] sm:$0xff] }
 0x270   :  { %1744 = vmatpush1.msra.mxu0 %v3587_v17  ;;  %v3616_v8 = vld [vmem:[%s7514_s1 + $0x1158] sm:$0xff]  ;;  %v3614_v13 = vld [vmem:[%s7514_s1 + $0x1148] sm:$0xff]  ;;  %v3613_v16 = vld [vmem:[%s7514_s1 + $0x1140] sm:$0xff] }
 0x271   :  { %1745 = vmatprep.subr.mxu0 %v3586_v5  ;;  %1650 = vmatmul.mubr.f32.gmra.mxu1 %v1302_v24  ;;  %v3612_v17 = vld [vmem:[%s7514_s1 + $0x1138] sm:$0xff]  ;;  %v3611_v0 = vld [vmem:[%s7514_s1 + $0x1130] sm:$0xff]  ;;  %v3610_v5 = vld [vmem:[%s7514_s1 + $0x1128] sm:$0xff] }
 0x272   :  { %1746 = vmatpush1.msra.mxu0 %v3585_v20  ;;  %1655 = vmatprep.mubr.f32.mxu1 %v5869_v26  ;;  %v3609_v20 = vld [vmem:[%s7514_s1 + $0x1120] sm:$0xff] }
 0x273   :  { %1747 = vmatprep.subr.mxu0 %v3584_v25  ;;  %v1306_v24 = vld [vmem:[#allocation2] sm:$0xfc]  ;;  %v3608_v25 = vld [vmem:[%s7514_s1 + $0x1118] sm:$0xff] }
 0x274   :  { %1748 = vmatpush1.msra.mxu0 %v3583_v28  ;;  %v1309_v28 = vld [vmem:[#allocation2 + $0x28] sm:$0x3] }
 0x275   :  { %1749 = vmatprep.subr.mxu0 %v3582_v29  ;;  %1656 = vmatmul.mubr.f32.gmra.mxu1 %v5884_v31  ;;  %v3607_v29 = vld [vmem:[%s7514_s1 + $0x1110] sm:$0xff] }
 0x276   :  { %1750 = vmatpush1.msra.mxu0 %v3581_v30  ;;  %v3606_v30 = vld [vmem:[%s7514_s1 + $0x1108] sm:$0xff] }
 0x277   :  { %1751 = vmatprep.subr.mxu0 %v3580_v33  ;;  %v1326_v33 = vrot.slane %v1306_v24, 2  ;;  %v3719_v24 = vld [vmem:[%s7514_s1 + $0x1488] sm:$0xff] }
 0x278   :  { %1752 = vmatpush1.msra.mxu0 %v3579_v37  ;;  %v3605_v37 = vld [vmem:[%s7514_s1 + $0x1100] sm:$0xff] }
 0x279   :  { %1753 = vmatprep.subr.mxu0 %v3578_v39  ;;  %v1334_v39 = vrot.slane %v1309_v28, 2  ;;  %v3718_v28 = vld [vmem:[%s7514_s1 + $0x1480] sm:$0xff] }
 0x27a   :  { %1754 = vmatpush1.msra.mxu0 %v3577_v41  ;;  %v1308_v41 = vld [vmem:[#allocation2 + $0x20] sm:$0x3] }
 0x27b   :  { %1755 = vmatprep.subr.mxu0 %v3576_v43  ;;  %v1327_v43 = vrot.slane %v5849_v14, 2 }
 0x27c   :  { %1756 = vmatpush1.msra.mxu0 %v3575_v27  ;;  %v1311_v27 = vld [vmem:[#allocation2 + $0x38] sm:$0xfc] }
 0x27d   :  { %1757 = vmatprep.subr.mxu0 %v3574_v44  ;;  %v1328_v44 = vsel %vm113_vm2, %v1326_v33, %v1327_v43  ;;  %v3663_v33 = vld [vmem:[%s7514_s1 + $0x12c8] sm:$0xff] }
 0x27e   :  { %1758 = vmatpush1.msra.mxu0 %v3573_v45  ;;  %v1332_v45 = vrot.slane %v1308_v41, 2  ;;  %v3715_v41 = vld [vmem:[%s7514_s1 + $0x1468] sm:$0xff] }
 0x27f   :  { %1759 = vmatprep.subr.mxu0 %v3636_v46  ;;  %v1335_v46 = vsel %vm113_vm2, %v1330_v7, %v1334_v39  ;;  %v3662_v39 = vld [vmem:[%s7514_s1 + $0x12c0] sm:$0xff] }
 0x280   :  { %1760 = vmatpush2.msra.mxu0 %v3635_v50  ;;  %v1339_v50 = vrot.slane %v1311_v27, 2  ;;  %v1333_v14 = vsel %vm113_vm2, %v1327_v43, %v1332_v45  ;;  %v3661_v43 = vld [vmem:[%s7514_s1 + $0x12b8] sm:$0xff]  ;;  %v3714_v27 = vld [vmem:[%s7514_s1 + $0x1460] sm:$0xff]  ;;  %v3659_v45 = vld [vmem:[%s7514_s1 + $0x12a8] sm:$0xff] }
 0x281   :  { %1761 = vmatprep.subr.mxu0 %v3634_v53  ;;  %v1310_v53 = vld [vmem:[#allocation2 + $0x30] sm:$0xfc] }
 0x282   :  { %1762 = vmatpush2.msra.mxu0 %v3633_v48  ;;  %v1313_v48 = vld [vmem:[#allocation2 + $0x58] sm:$0x3] }
 0x283   :  { %1763 = vmatprep.subr.mxu0 %v3632_v55  ;;  %v1340_v55 = vrot.slane %v5869_v26, 2 }
 0x284   :  { %1764 = vmatpush2.msra.mxu0 %v3631_v36  ;;  %v1336_v36 = vrot.slane %v1310_v53, 2  ;;  %v3712_v53 = vld [vmem:[%s7514_s1 + $0x1450] sm:$0xff] }
 0x285   :  { %1765 = vmatprep.subr.mxu0 %v3630_v38  ;;  %v1341_v38 = vsel %vm113_vm2, %v1339_v50, %v1340_v55  ;;  %v3658_v50 = vld [vmem:[%s7514_s1 + $0x12a0] sm:$0xff] }
 0x286   :  { %1766 = vmatpush2.msra.mxu0 %v3629_v42  ;;  %v1344_v42 = vrot.slane %v1313_v48, 2  ;;  %v3657_v48 = vld [vmem:[%s7514_s1 + $0x1298] sm:$0xff] }
 0x287   :  { %1767 = vmatprep.subr.mxu0 %v3628_v40  ;;  %v1312_v40 = vld [vmem:[#allocation2 + $0x50] sm:$0x3] }
 0x288   :  { %1768 = vmatpush2.msra.mxu0 %v3627_v56  ;;  %v1337_v56 = vrot.slane %v5884_v31, 2  ;;  %v1342_v7 = vrot.slane %v1312_v40, 2  ;;  %v3731_v31 = vld [vmem:[%s7514_s1 + $0x14e8] sm:$0xff]  ;;  %v3654_v40 = vld [vmem:[%s7514_s1 + $0x1280] sm:$0xff] }
 0x289   :  { %1769 = vmatprep.subr.mxu0 %v3626_v60  ;;  %v1345_v60 = vsel %vm113_vm2, %v1340_v55, %v1344_v42  ;;  %v3711_v55 = vld [vmem:[%s7514_s1 + $0x1448] sm:$0xff]  ;;  %v3709_v42 = vld [vmem:[%s7514_s1 + $0x1438] sm:$0xff] }
 0x28a   :  { %1770 = vmatpush2.msra.mxu0 %v3625_v19  ;;  %v1338_v58 = vsel %vm113_vm2, %v1336_v36, %v1337_v56  ;;  %v1343_v26 = vsel %vm113_vm2, %v1337_v56, %v1342_v7  ;;  %v3733_v19 = vld [vmem:[%s7514_s1 + $0x14f8] sm:$0xff]  ;;  %v3710_v36 = vld [vmem:[%s7514_s1 + $0x1440] sm:$0xff]  ;;  %v3708_v56 = vld [vmem:[%s7514_s1 + $0x1430] sm:$0xff] }
 0x28b   :  { %1771 = vmatprep.subr.mxu0 %v3624_v32  ;;  %v3732_v32 = vld [vmem:[%s7514_s1 + $0x14f0] sm:$0xff]  ;;  %2091 = vmatprep.subr.mxu1 %v3733_v19  ;;  %v3707_v7 = vld [vmem:[%s7514_s1 + $0x1428] sm:$0xff] }
 0x28c   :  { %1772 = vmatpush2.msra.mxu0 %v3623_v47  ;;  %2092 = vmatpush1.msra.mxu1 %v3732_v32  ;;  %v3730_v47 = vld [vmem:[%s7514_s1 + $0x14e0] sm:$0xff]  ;;  %v3651_v19 = vld [vmem:[%s7514_s1 + $0x1268] sm:$0xff]  ;;  %v3705_v32 = vld [vmem:[%s7514_s1 + $0x1418] sm:$0xff] }
 0x28d   :  { %1773 = vmatprep.subr.mxu0 %v3622_v63  ;;  %2093 = vmatprep.subr.mxu1 %v3731_v31  ;;  %v3729_v63 = vld [vmem:[%s7514_s1 + $0x14d8] sm:$0xff]  ;;  %v3650_v31 = vld [vmem:[%s7514_s1 + $0x1260] sm:$0xff] }
 0x28e   :  { %1774 = vmatpush2.msra.mxu0 %v3621_v52  ;;  %2094 = vmatpush1.msra.mxu1 %v3730_v47  ;;  %v3728_v52 = vld [vmem:[%s7514_s1 + $0x14d0] sm:$0xff] }
 0x28f   :  { %1775 = vmatprep.subr.mxu0 %v3620_v1  ;;  %v3727_v1 = vld [vmem:[%s7514_s1 + $0x14c8] sm:$0xff]  ;;  %2095 = vmatprep.subr.mxu1 %v3729_v63  ;;  %v3704_v47 = vld [vmem:[%s7514_s1 + $0x1410] sm:$0xff]  ;;  %v3649_v63 = vld [vmem:[%s7514_s1 + $0x1258] sm:$0xff] }
 0x290   :  { %1776 = vmatpush2.msra.mxu0 %v3619_v2  ;;  %2096 = vmatpush1.msra.mxu1 %v3728_v52  ;;  %v3726_v2 = vld [vmem:[%s7514_s1 + $0x14c0] sm:$0xff]  ;;  %v3703_v52 = vld [vmem:[%s7514_s1 + $0x1408] sm:$0xff] }
 0x291   :  { %1777 = vmatprep.subr.mxu0 %v3618_v3  ;;  %v3725_v3 = vld [vmem:[%s7514_s1 + $0x14b8] sm:$0xff]  ;;  %2097 = vmatprep.subr.mxu1 %v3727_v1  ;;  %v3648_v1 = vld [vmem:[%s7514_s1 + $0x1250] sm:$0xff] }
 0x292   :  { %1778 = vmatpush2.msra.mxu0 %v3617_v4  ;;  %2098 = vmatpush1.msra.mxu1 %v3726_v2  ;;  %v3724_v4 = vld [vmem:[%s7514_s1 + $0x14b0] sm:$0xff]  ;;  %v3702_v2 = vld [vmem:[%s7514_s1 + $0x1400] sm:$0xff] }
 0x293   :  { %1779 = vmatprep.subr.mxu0 %v3616_v8  ;;  %v3723_v8 = vld [vmem:[%s7514_s1 + $0x14a8] sm:$0xff]  ;;  %2099 = vmatprep.subr.mxu1 %v3725_v3 }
 0x294   :  { %1780 = vmatpush2.msra.mxu0 %v3615_v10  ;;  %v3669_v10 = vld [vmem:[%s7514_s1 + $0x12f8] sm:$0xff]  ;;  %2100 = vmatpush1.msra.mxu1 %v3724_v4  ;;  %v3647_v3 = vld [vmem:[%s7514_s1 + $0x1248] sm:$0xff] }
 0x295   :  { %1781 = vmatprep.subr.mxu0 %v3614_v13  ;;  %v3722_v13 = vld [vmem:[%s7514_s1 + $0x14a0] sm:$0xff]  ;;  %2101 = vmatprep.subr.mxu1 %v3723_v8  ;;  %v3765_v4 = vld [vmem:[%s7514_s1 + $0x15f8] sm:$0xff] }
 0x296   :  { %1782 = vmatpush2.msra.mxu0 %v3613_v16  ;;  %v3668_v16 = vld [vmem:[%s7514_s1 + $0x12f0] sm:$0xff]  ;;  %2102 = vmatpush1.msra.mxu1 %v3722_v13  ;;  %v3646_v8 = vld [vmem:[%s7514_s1 + $0x1240] sm:$0xff]  ;;  %v3645_v13 = vld [vmem:[%s7514_s1 + $0x1238] sm:$0xff] }
 0x297   :  { %1783 = vmatprep.subr.mxu0 %v3612_v17  ;;  %v3721_v17 = vld [vmem:[%s7514_s1 + $0x1498] sm:$0xff] }
 0x298   :  { %1784 = vmatpush2.msra.mxu0 %v3611_v0  ;;  %v3667_v0 = vld [vmem:[%s7514_s1 + $0x12e8] sm:$0xff]  ;;  %2103 = vmatprep.subr.mxu1 %v3721_v17  ;;  %v3644_v17 = vld [vmem:[%s7514_s1 + $0x1230] sm:$0xff] }
 0x299   :  { %1785 = vmatprep.subr.mxu0 %v3610_v5  ;;  %v3720_v5 = vld [vmem:[%s7514_s1 + $0x1490] sm:$0xff] }
 0x29a   :  { %1786 = vmatpush2.msra.mxu0 %v3609_v20  ;;  %v3666_v20 = vld [vmem:[%s7514_s1 + $0x12e0] sm:$0xff]  ;;  %2104 = vmatpush1.msra.mxu1 %v3720_v5  ;;  %v3643_v5 = vld [vmem:[%s7514_s1 + $0x1228] sm:$0xff] }
 0x29b   :  { %1787 = vmatprep.subr.mxu0 %v3608_v25  ;;  %v3665_v25 = vld [vmem:[%s7514_s1 + $0x12d8] sm:$0xff]  ;;  %2105 = vmatprep.subr.mxu1 %v3719_v24  ;;  %v3642_v24 = vld [vmem:[%s7514_s1 + $0x1220] sm:$0xff] }
 0x29c   :  { %1788 = vmatpush2.msra.mxu0 %v3607_v29  ;;  %v3664_v29 = vld [vmem:[%s7514_s1 + $0x12d0] sm:$0xff]  ;;  %2106 = vmatpush1.msra.mxu1 %v3718_v28  ;;  %v3641_v28 = vld [vmem:[%s7514_s1 + $0x1218] sm:$0xff] }
 0x29d   :  { %1789 = vmatprep.subr.mxu0 %v3606_v30  ;;  %v3717_v30 = vld [vmem:[%s7514_s1 + $0x1478] sm:$0xff] }
 0x29e   :  { %1790 = vmatpush2.msra.mxu0 %v3605_v37  ;;  %v3716_v37 = vld [vmem:[%s7514_s1 + $0x1470] sm:$0xff]  ;;  %2107 = vmatprep.subr.mxu1 %v3717_v30 }
 0x29f   :  { %1792 = vmatmul.mubr.f32.vlgmr.msra.gmra.mxu0 %v1328_v44  ;;  %2180 = vmatprep.subr.mxu0 %v3669_v10  ;;  %v3660_v44 = vld [vmem:[%s7514_s1 + $0x12b0] sm:$0xff] }
 0x2a0   :  { %1797 = vmatprep.mubr.f32.mxu0 %v1335_v46  ;;  %2181 = vmatpush1.msra.mxu0 %v3668_v16  ;;  %v3713_v46 = vld [vmem:[%s7514_s1 + $0x1458] sm:$0xff]  ;;  %v3764_v10 = vld [vmem:[%s7514_s1 + $0x15f0] sm:$0xff]  ;;  %v3763_v16 = vld [vmem:[%s7514_s1 + $0x15e8] sm:$0xff] }
 0x2a1   :  { %2182 = vmatprep.subr.mxu0 %v3667_v0  ;;  %2108 = vmatpush1.msra.mxu1 %v3716_v37  ;;  %v3762_v0 = vld [vmem:[%s7514_s1 + $0x15e0] sm:$0xff]  ;;  %v3640_v30 = vld [vmem:[%s7514_s1 + $0x1210] sm:$0xff]  ;;  %v3639_v37 = vld [vmem:[%s7514_s1 + $0x1208] sm:$0xff] }
 0x2a2   :  { %2183 = vmatpush1.msra.mxu0 %v3666_v20  ;;  %2109 = vmatprep.subr.mxu1 %v3715_v41  ;;  %v3761_v20 = vld [vmem:[%s7514_s1 + $0x15d8] sm:$0xff]  ;;  %v3638_v41 = vld [vmem:[%s7514_s1 + $0x1200] sm:$0xff] }
 0x2a3   :  { %1798 = vmatmul.mubr.f32.gmra.mxu0 %v1333_v14  ;;  %2184 = vmatprep.subr.mxu0 %v3665_v25  ;;  %v3656_v14 = vld [vmem:[%s7514_s1 + $0x1290] sm:$0xff] }
 0x2a4   :  { %1803 = vmatprep.mubr.f32.mxu0 %v1341_v38  ;;  %2185 = vmatpush1.msra.mxu0 %v3664_v29  ;;  %v3655_v38 = vld [vmem:[%s7514_s1 + $0x1288] sm:$0xff]  ;;  %v3760_v25 = vld [vmem:[%s7514_s1 + $0x15d0] sm:$0xff] }
 0x2a5   :  { %2186 = vmatprep.subr.mxu0 %v3663_v33  ;;  %2110 = vmatpush1.msra.mxu1 %v3714_v27  ;;  %v3759_v29 = vld [vmem:[%s7514_s1 + $0x15c8] sm:$0xff]  ;;  %v3758_v33 = vld [vmem:[%s7514_s1 + $0x15c0] sm:$0xff]  ;;  %v3701_v27 = vld [vmem:[%s7514_s1 + $0x13f8] sm:$0xff] }
 0x2a6   :  { %2187 = vmatpush1.msra.mxu0 %v3662_v39  ;;  %2111 = vmatprep.subr.mxu1 %v3713_v46  ;;  %v3757_v39 = vld [vmem:[%s7514_s1 + $0x15b8] sm:$0xff]  ;;  %v3754_v46 = vld [vmem:[%s7514_s1 + $0x15a0] sm:$0xff] }
 0x2a7   :  { %1804 = vmatmul.mubr.f32.gmra.mxu0 %v1338_v58  ;;  %2188 = vmatprep.subr.mxu0 %v3661_v43  ;;  %v3653_v58 = vld [vmem:[%s7514_s1 + $0x1278] sm:$0xff]  ;;  %v3756_v43 = vld [vmem:[%s7514_s1 + $0x15b0] sm:$0xff] }
 0x2a8   :  { %1809 = vmatprep.mubr.f32.mxu0 %v1345_v60  ;;  %2189 = vmatpush1.msra.mxu0 %v3660_v44  ;;  %v3652_v60 = vld [vmem:[%s7514_s1 + $0x1270] sm:$0xff]  ;;  %v3755_v44 = vld [vmem:[%s7514_s1 + $0x15a8] sm:$0xff] }
 0x2a9   :  { %2190 = vmatprep.subr.mxu0 %v3659_v45  ;;  %2112 = vmatpush1.msra.mxu1 %v3712_v53  ;;  %v3700_v45 = vld [vmem:[%s7514_s1 + $0x13f0] sm:$0xff]  ;;  %v3753_v53 = vld [vmem:[%s7514_s1 + $0x1598] sm:$0xff] }
 0x2aa   :  { %2191 = vmatpush1.msra.mxu0 %v3658_v50  ;;  %2113 = vmatprep.subr.mxu1 %v3711_v55  ;;  %v3699_v50 = vld [vmem:[%s7514_s1 + $0x13e8] sm:$0xff]  ;;  %v3752_v55 = vld [vmem:[%s7514_s1 + $0x1590] sm:$0xff] }
 0x2ab   :  { %1810 = vmatmul.mubr.f32.gmra.mxu0 %v1343_v26  ;;  %2192 = vmatprep.subr.mxu0 %v3657_v48  ;;  %v3706_v26 = vld [vmem:[%s7514_s1 + $0x1420] sm:$0xff] }
 0x2ac   :  { %2193 = vmatpush1.msra.mxu0 %v3656_v14  ;;  %2114 = vmatpush1.msra.mxu1 %v3710_v36  ;;  %v3698_v48 = vld [vmem:[%s7514_s1 + $0x13e0] sm:$0xff]  ;;  %v3697_v14 = vld [vmem:[%s7514_s1 + $0x13d8] sm:$0xff]  ;;  %v3751_v36 = vld [vmem:[%s7514_s1 + $0x1588] sm:$0xff] }
 0x2ad   :  { %2194 = vmatprep.subr.mxu0 %v3655_v38  ;;  %2115 = vmatprep.subr.mxu1 %v3709_v42  ;;  %v3696_v38 = vld [vmem:[%s7514_s1 + $0x13d0] sm:$0xff]  ;;  %v3750_v42 = vld [vmem:[%s7514_s1 + $0x1580] sm:$0xff] }
 0x2ae   :  { %2195 = vmatpush1.msra.mxu0 %v3654_v40  ;;  %2116 = vmatpush1.msra.mxu1 %v3708_v56  ;;  %v3695_v40 = vld [vmem:[%s7514_s1 + $0x13c8] sm:$0xff]  ;;  %v3749_v56 = vld [vmem:[%s7514_s1 + $0x1578] sm:$0xff] }
 0x2af   :  { %2196 = vmatprep.subr.mxu0 %v3653_v58  ;;  %2117 = vmatprep.subr.mxu1 %v3707_v7  ;;  %v3694_v58 = vld [vmem:[%s7514_s1 + $0x13c0] sm:$0xff]  ;;  %v3748_v7 = vld [vmem:[%s7514_s1 + $0x1570] sm:$0xff] }
 0x2b0   :  { %2197 = vmatpush1.msra.mxu0 %v3652_v60  ;;  %2118 = vmatpush1.msra.mxu1 %v3706_v26  ;;  %v3693_v60 = vld [vmem:[%s7514_s1 + $0x13b8] sm:$0xff]  ;;  %v3747_v26 = vld [vmem:[%s7514_s1 + $0x1568] sm:$0xff] }
 0x2b1   :  { %2198 = vmatprep.subr.mxu0 %v3651_v19  ;;  %2119 = vmatprep.subr.mxu1 %v3705_v32  ;;  %v3692_v19 = vld [vmem:[%s7514_s1 + $0x13b0] sm:$0xff]  ;;  %v3746_v32 = vld [vmem:[%s7514_s1 + $0x1560] sm:$0xff] }
 0x2b2   :  { %2199 = vmatpush1.msra.mxu0 %v3650_v31  ;;  %2120 = vmatpush1.msra.mxu1 %v3704_v47  ;;  %v3691_v31 = vld [vmem:[%s7514_s1 + $0x13a8] sm:$0xff]  ;;  %v3745_v47 = vld [vmem:[%s7514_s1 + $0x1558] sm:$0xff] }
 0x2b3   :  { %2200 = vmatprep.subr.mxu0 %v3649_v63  ;;  %2121 = vmatprep.subr.mxu1 %v3703_v52  ;;  %v3744_v63 = vld [vmem:[%s7514_s1 + $0x1550] sm:$0xff]  ;;  %v3690_v52 = vld [vmem:[%s7514_s1 + $0x13a0] sm:$0xff] }
 0x2b4   :  { %2201 = vmatpush1.msra.mxu0 %v3648_v1  ;;  %2122 = vmatpush1.msra.mxu1 %v3702_v2  ;;  %v3743_v1 = vld [vmem:[%s7514_s1 + $0x1548] sm:$0xff]  ;;  %v3689_v2 = vld [vmem:[%s7514_s1 + $0x1398] sm:$0xff] }
 0x2b5   :  { %2202 = vmatprep.subr.mxu0 %v3647_v3  ;;  %2123 = vmatprep.subr.mxu1 %v3765_v4  ;;  %v3742_v3 = vld [vmem:[%s7514_s1 + $0x1540] sm:$0xff]  ;;  %v3688_v4 = vld [vmem:[%s7514_s1 + $0x1390] sm:$0xff] }
 0x2b6   :  { %2203 = vmatpush1.msra.mxu0 %v3646_v8  ;;  %2124 = vmatpush2.msra.mxu1 %v3764_v10  ;;  %v3741_v8 = vld [vmem:[%s7514_s1 + $0x1538] sm:$0xff]  ;;  %v3687_v10 = vld [vmem:[%s7514_s1 + $0x1388] sm:$0xff] }
 0x2b7   :  { %2204 = vmatprep.subr.mxu0 %v3645_v13  ;;  %2125 = vmatprep.subr.mxu1 %v3763_v16  ;;  %v3740_v13 = vld [vmem:[%s7514_s1 + $0x1530] sm:$0xff]  ;;  %v3686_v16 = vld [vmem:[%s7514_s1 + $0x1380] sm:$0xff] }
 0x2b8   :  { %2205 = vmatpush1.msra.mxu0 %v3644_v17  ;;  %2126 = vmatpush2.msra.mxu1 %v3762_v0  ;;  %v3739_v17 = vld [vmem:[%s7514_s1 + $0x1528] sm:$0xff]  ;;  %v3685_v0 = vld [vmem:[%s7514_s1 + $0x1378] sm:$0xff] }
 0x2b9   :  { %2206 = vmatprep.subr.mxu0 %v3643_v5  ;;  %2127 = vmatprep.subr.mxu1 %v3761_v20  ;;  %v3738_v5 = vld [vmem:[%s7514_s1 + $0x1520] sm:$0xff]  ;;  %v3684_v20 = vld [vmem:[%s7514_s1 + $0x1370] sm:$0xff] }
 0x2ba   :  { %2207 = vmatpush1.msra.mxu0 %v3642_v24  ;;  %2128 = vmatpush2.msra.mxu1 %v3760_v25  ;;  %v3737_v24 = vld [vmem:[%s7514_s1 + $0x1518] sm:$0xff]  ;;  %v3683_v25 = vld [vmem:[%s7514_s1 + $0x1368] sm:$0xff] }
 0x2bb   :  { %2208 = vmatprep.subr.mxu0 %v3641_v28  ;;  %2129 = vmatprep.subr.mxu1 %v3759_v29  ;;  %v3736_v28 = vld [vmem:[%s7514_s1 + $0x1510] sm:$0xff]  ;;  %v3682_v29 = vld [vmem:[%s7514_s1 + $0x1360] sm:$0xff] }
 0x2bc   :  { %2209 = vmatpush1.msra.mxu0 %v3640_v30  ;;  %2130 = vmatpush2.msra.mxu1 %v3758_v33  ;;  %v3735_v30 = vld [vmem:[%s7514_s1 + $0x1508] sm:$0xff]  ;;  %v3681_v33 = vld [vmem:[%s7514_s1 + $0x1358] sm:$0xff] }
 0x2bd   :  { %2210 = vmatprep.subr.mxu0 %v3639_v37  ;;  %2131 = vmatprep.subr.mxu1 %v3757_v39  ;;  %v3734_v37 = vld [vmem:[%s7514_s1 + $0x1500] sm:$0xff]  ;;  %v3680_v39 = vld [vmem:[%s7514_s1 + $0x1350] sm:$0xff] }
 0x2be   :  { %2211 = vmatpush1.msra.mxu0 %v3638_v41  ;;  %2132 = vmatpush2.msra.mxu1 %v3756_v43  ;;  %v3679_v41 = vld [vmem:[%s7514_s1 + $0x1348] sm:$0xff]  ;;  %v3797_v43 = vld [vmem:[%s7514_s1 + $0x16f8] sm:$0xff] }
 0x2bf   :  { %2212 = vmatprep.subr.mxu0 %v3701_v27  ;;  %2133 = vmatprep.subr.mxu1 %v3755_v44  ;;  %v3678_v27 = vld [vmem:[%s7514_s1 + $0x1340] sm:$0xff]  ;;  %v3677_v44 = vld [vmem:[%s7514_s1 + $0x1338] sm:$0xff] }
 0x2c0   :  { %2213 = vmatpush2.msra.mxu0 %v3700_v45  ;;  %2134 = vmatpush2.msra.mxu1 %v3754_v46  ;;  %v3676_v45 = vld [vmem:[%s7514_s1 + $0x1330] sm:$0xff]  ;;  %v3675_v46 = vld [vmem:[%s7514_s1 + $0x1328] sm:$0xff] }
 0x2c1   :  { %2214 = vmatprep.subr.mxu0 %v3699_v50  ;;  %2135 = vmatprep.subr.mxu1 %v3753_v53  ;;  %v3674_v50 = vld [vmem:[%s7514_s1 + $0x1320] sm:$0xff]  ;;  %v3673_v53 = vld [vmem:[%s7514_s1 + $0x1318] sm:$0xff] }
 0x2c2   :  { %2215 = vmatpush2.msra.mxu0 %v3698_v48  ;;  %2136 = vmatpush2.msra.mxu1 %v3752_v55  ;;  %v3672_v48 = vld [vmem:[%s7514_s1 + $0x1310] sm:$0xff]  ;;  %v3671_v55 = vld [vmem:[%s7514_s1 + $0x1308] sm:$0xff] }
 0x2c3   :  { %2216 = vmatprep.subr.mxu0 %v3697_v14  ;;  %2137 = vmatprep.subr.mxu1 %v3751_v36  ;;  %v3670_v14 = vld [vmem:[%s7514_s1 + $0x1300] sm:$0xff]  ;;  %v3862_v36 = vld [vmem:[%s7517_s2 + $0x2f8] sm:$0xff] }
 0x2c4   :  { %2217 = vmatpush2.msra.mxu0 %v3696_v38  ;;  %2138 = vmatpush2.msra.mxu1 %v3750_v42 }
 0x2c5   :  { %2218 = vmatprep.subr.mxu0 %v3695_v40  ;;  %2139 = vmatprep.subr.mxu1 %v3749_v56 }
 0x2c6   :  { %2219 = vmatpush2.msra.mxu0 %v3694_v58  ;;  %2140 = vmatpush2.msra.mxu1 %v3748_v7 }
 0x2c7   :  { %2220 = vmatprep.subr.mxu0 %v3693_v60  ;;  %2141 = vmatprep.subr.mxu1 %v3747_v26 }
 0x2c8   :  { %2221 = vmatpush2.msra.mxu0 %v3692_v19  ;;  %2142 = vmatpush2.msra.mxu1 %v3746_v32 }
 0x2c9   :  { %2222 = vmatprep.subr.mxu0 %v3691_v31  ;;  %2143 = vmatprep.subr.mxu1 %v3745_v47  ;;  %v3637_v47 = vld [vmem:[%s7516_s3 + $0x2] ss:$8 sm:$0x3] }
 0x2ca   :  { %2144 = vmatpush2.msra.mxu1 %v3744_v63  ;;  %2223 = vmatpush2.msra.mxu0 %v3690_v52 }
 0x2cb   :  { %2145 = vmatprep.subr.mxu1 %v3743_v1  ;;  %2224 = vmatprep.subr.mxu0 %v3689_v2  ;;  %v1830_v2 = vrot.slane %v3637_v47, %v5096_v9 }
 0x2cc   :  { %2146 = vmatpush2.msra.mxu1 %v3742_v3  ;;  %2225 = vmatpush2.msra.mxu0 %v3688_v4 }
 0x2cd   :  { %2147 = vmatprep.subr.mxu1 %v3741_v8  ;;  %2226 = vmatprep.subr.mxu0 %v3687_v10 }
 0x2ce   :  { %2148 = vmatpush2.msra.mxu1 %v3740_v13  ;;  %2227 = vmatpush2.msra.mxu0 %v3686_v16  ;;  %v1834_v13 = vrot.slane %v3637_v47, %v5101_v12 }
 0x2cf   :  { %2149 = vmatprep.subr.mxu1 %v3739_v17  ;;  %2228 = vmatprep.subr.mxu0 %v3685_v0 }
 0x2d0   :  { %2150 = vmatpush2.msra.mxu1 %v3738_v5  ;;  %2229 = vmatpush2.msra.mxu0 %v3684_v20 }
 0x2d1   :  { %2151 = vmatprep.subr.mxu1 %v3737_v24  ;;  %2230 = vmatprep.subr.mxu0 %v3683_v25 }
 0x2d2   :  { %2152 = vmatpush2.msra.mxu1 %v3736_v28  ;;  %2231 = vmatpush2.msra.mxu0 %v3682_v29 }
 0x2d3   :  { %2153 = vmatprep.subr.mxu1 %v3735_v30  ;;  %2232 = vmatprep.subr.mxu0 %v3681_v33 }
 0x2d4   :  { %2154 = vmatpush2.msra.mxu1 %v3734_v37  ;;  %2233 = vmatpush2.msra.mxu0 %v3680_v39 }
 0x2d5   :  { %2234 = vmatprep.subr.mxu0 %v3679_v41  ;;  %2334 = vmatprep.subr.mxu1 %v3797_v43 }
 0x2d6   :  { %2235 = vmatpush2.msra.mxu0 %v3678_v27 }
 0x2d7   :  { %2236 = vmatprep.subr.mxu0 %v3677_v44 }
 0x2d8   :  { %2237 = vmatpush2.msra.mxu0 %v3676_v45 }
 0x2d9   :  { %2238 = vmatprep.subr.mxu0 %v3675_v46 }
 0x2da   :  { %2239 = vmatpush2.msra.mxu0 %v3674_v50 }
 0x2db   :  { %2240 = vmatprep.subr.mxu0 %v3673_v53 }
 0x2dc   :  { %2241 = vmatpush2.msra.mxu0 %v3672_v48 }
 0x2dd   :  { %2242 = vmatprep.subr.mxu0 %v3671_v55 }
 0x2de   :  { %2243 = vmatpush2.msra.mxu0 %v3670_v14 }
 0x2df   :  { %2581 = vmatprep.subr.mxu0 %v3862_v36 }
 0x31f   :  { %v1550_v38 = vpop.f32.mrf.mxu0 }
 0x321   :  { %v1552_v42 = vpop.f32.mrf.mxu0 }
 0x323   :  { %v1556_v40 = vpop.f32.mrf.mxu0 }
 0x325   :  { %v1558_v58 = vpop.f32.mrf.mxu0 }
 0x327   :  { %v1562_v60 = vpop.f32.mrf.mxu0 }
 0x329   :  { %v1639_v56 = vpop.f32.mrf.mxu1  ;;  %v1564_v19 = vpop.f32.mrf.mxu0 }
 0x32a   :  { %v1640_v1 = vadd.f32 %v1639_v56, %v1550_v38 }
 0x32b   :  { %v1641_v7 = vpop.f32.mrf.mxu1  ;;  %v1568_v31 = vpop.f32.mrf.mxu0 }
 0x32c   :  { %v1642_v4 = vadd.f32 %v1641_v7, %v1552_v42 }
 0x32d   :  { %v1645_v26 = vpop.f32.mrf.mxu1  ;;  %v1570_v52 = vpop.f32.mrf.mxu0 }
 0x32e   :  { %v1646_v17 = vadd.f32 %v1645_v26, %v1556_v40 }
 0x32f   :  { %v1647_v32 = vpop.f32.mrf.mxu1 }
 0x330   :  { %v1648_v24 = vadd.f32 %v1647_v32, %v1558_v58  ;;  %v3796_v58 = vld [vmem:[%s7514_s1 + $0x16f0] sm:$0xff]  ;;  %v3795_v32 = vld [vmem:[%s7514_s1 + $0x16e8] sm:$0xff] }
 0x331   :  { %v1651_v63 = vpop.f32.mrf.mxu1 }
 0x332   :  { %v1652_v33 = vadd.f32 %v1651_v63, %v1562_v60 }
 0x333   :  { %v1653_v8 = vpop.f32.mrf.mxu1 }
 0x334   :  { %v1654_v44 = vadd.f32 %v1653_v8, %v1564_v19 }
 0x335   :  { %v1657_v25 = vpop.f32.mrf.mxu1 }
 0x336   :  { %v1658_v14 = vadd.f32 %v1657_v25, %v1568_v31 }
 0x337   :  { %v1659_v46 = vpop.f32.mrf.mxu1 }
 0x338   :  { %v1660_v60 = vadd.f32 %v1659_v46, %v1570_v52 }
 0x35f   :  { %v1793_v3 = vpop.f32.mrf.mxu0 }
 0x360   :  { %v1816_v10 = vadd.f32 %v1793_v3, %v1640_v1  ;;  %v3794_v1 = vld [vmem:[%s7514_s1 + $0x16e0] sm:$0xff] }
 0x361   :  { %v1795_v16 = vpop.f32.mrf.mxu0 }
 0x362   :  { %v1837_v0 = vadd.f32 %v1830_v2, %v1816_v10  ;;  %v1817_v5 = vadd.f32 %v1795_v16, %v1642_v4  ;;  %v3793_v4 = vld [vmem:[%s7514_s1 + $0x16d8] sm:$0xff] }
 0x363   :  { %v1799_v20 = vpop.f32.mrf.mxu0 }
 0x364   :  { %v1845_v28 = vmul.f32 0.05, %v1837_v0  ;;  %v1838_v29 = vadd.f32 %v1834_v13, %v1817_v5  ;;  %v1818_v30 = vadd.f32 %v1799_v20, %v1646_v17  ;;  %v3792_v5 = vld [vmem:[%s7514_s1 + $0x16d0] sm:$0xff] }
 0x365   :  { %v1801_v37 = vpop.f32.mrf.mxu0 }
 0x366   :  { %v6414_v39 = vmax.f32 %v1837_v0, %v1845_v28  ;;  %v1846_v41 = vmul.f32 0.05, %v1838_v29  ;;  %v1839_v43 = vadd.f32 %v1830_v2, %v1818_v30  ;;  %v1819_v27 = vadd.f32 %v1801_v37, %v1648_v24  ;;  %v3791_v24 = vld [vmem:[%s7514_s1 + $0x16c8] sm:$0xff]  ;;  %v3790_v30 = vld [vmem:[%s7514_s1 + $0x16c0] sm:$0xff]  ;;  %v3789_v37 = vld [vmem:[%s7514_s1 + $0x16b8] sm:$0xff] }
 0x367   :  { %v1805_v45 = vpop.f32.mrf.mxu0 }
 0x368   :  { %v1869_v50 = vrot.slane %v6414_v39, 7  ;;  %v1847_v53 = vmul.f32 0.05, %v1839_v43  ;;  %v1840_v48 = vadd.f32 %v1834_v13, %v1819_v27  ;;  %v1820_v55 = vadd.f32 %v1805_v45, %v1652_v33  ;;  %v3788_v27 = vld [vmem:[%s7514_s1 + $0x16b0] sm:$0xff]  ;;  %v3787_v45 = vld [vmem:[%s7514_s1 + $0x16a8] sm:$0xff] }
 0x369   :  { %v1807_v36 = vpop.f32.mrf.mxu0  ;;  %v6417_v38 = vmax.f32 %v1838_v29, %v1846_v41 }
 0x36a   :  { %1893 = vst [vmem:[#allocation2] sm:$0xfe] %v1869_v50  ;;  %v1848_v42 = vmul.f32 0.05, %v1840_v48  ;;  %v1841_v40 = vadd.f32 %v1830_v2, %v1820_v55  ;;  %v1821_v56 = vadd.f32 %v1807_v36, %v1654_v44  ;;  %v6422_v7 = vmax.f32 %v1839_v43, %v1847_v53  ;;  %v3861_v53 = vld [vmem:[%s7517_s2 + $0x2f0] sm:$0xff]  ;;  %v3785_v36 = vld [vmem:[%s7514_s1 + $0x1698] sm:$0xff] }
 0x36b   :  { %v1870_v26 = vrot.slane %v6417_v38, 7  ;;  %2155 = vmatprep.mubr.f32.mxu1 %v6417_v38  ;;  %v1811_v19 = vpop.f32.mrf.mxu0 }
 0x36c   :  { %v1849_v31 = vmul.f32 0.05, %v1841_v40  ;;  %v1842_v47 = vadd.f32 %v1834_v13, %v1821_v56  ;;  %v1822_v63 = vadd.f32 %v1811_v19, %v1658_v14  ;;  %2156 = vmatmul.mubr.f32.vlgmr.msra.gmra.mxu1 %v6414_v39  ;;  %v6433_v3 = vmax.f32 %v1840_v48, %v1848_v42 }
 0x36d   :  { %1894 = vst [vmem:[#allocation2 + $0x8] sm:$0xfe] %v1870_v26  ;;  %2335 = vmatpush1.msra.mxu1 %v3796_v58  ;;  %v1813_v52 = vpop.f32.mrf.mxu0  ;;  %v1871_v8 = vrot.slane %v6422_v7, 7  ;;  %v3784_v58 = vld [vmem:[%s7514_s1 + $0x1690] sm:$0xff] }
 0x36e   :  { %v1850_v10 = vmul.f32 0.05, %v1842_v47  ;;  %v1843_v16 = vadd.f32 %v1830_v2, %v1822_v63  ;;  %2336 = vmatprep.subr.mxu1 %v3795_v32  ;;  %v1823_v17 = vadd.f32 %v1813_v52, %v1660_v60  ;;  %v1873_v0 = vrot.slane %v6433_v3, 7  ;;  %2161 = vmatprep.mubr.f32.mxu1 %v6433_v3  ;;  %v3859_v60 = vld [vmem:[%s7517_s2 + $0x2e0] sm:$0xff]  ;;  %v3783_v32 = vld [vmem:[%s7514_s1 + $0x1688] sm:$0xff]  ;;  %v3857_v63 = vld [vmem:[%s7517_s2 + $0x2d0] sm:$0xff] }
 0x36f   :  { %2337 = vmatpush1.msra.mxu1 %v3794_v1  ;;  %v6445_v20 = vsel %vm48_vm1, %v1869_v50, %v1871_v8  ;;  %1897 = vst [vmem:[#allocation2 + $0x20] sm:$0x1] %v1871_v8  ;;  %v6450_v2 = vmax.f32 %v1841_v40, %v1849_v31  ;;  %v3786_v50 = vld [vmem:[%s7514_s1 + $0x16a0] sm:$0xff]  ;;  %v3860_v40 = vld [vmem:[%s7517_s2 + $0x2e8] sm:$0xff]  ;;  %v3858_v31 = vld [vmem:[%s7517_s2 + $0x2d8] sm:$0xff] }
 0x370   :  { %v1851_v25 = vmul.f32 0.05, %v1843_v16  ;;  %v1844_v28 = vadd.f32 %v1834_v13, %v1823_v17  ;;  %v6453_v29 = vsel %vm48_vm1, %v1870_v26, %v1873_v0  ;;  %1898 = vst [vmem:[#allocation2 + $0x28] sm:$0x1] %v1873_v0  ;;  %2338 = vmatprep.subr.mxu1 %v3793_v4  ;;  %2162 = vmatmul.mubr.f32.gmra.mxu1 %v6422_v7  ;;  %v3781_v1 = vld [vmem:[%s7514_s1 + $0x1678] sm:$0xff]  ;;  %v3856_v4 = vld [vmem:[%s7517_s2 + $0x2c8] sm:$0xff] }
 0x371   :  { %v6459_v33 = vmax.f32 %v1842_v47, %v1850_v10  ;;  %2339 = vmatpush1.msra.mxu1 %v3792_v5  ;;  %v1875_v13 = vrot.slane %v6450_v2, 7  ;;  %v1905_v14 = vld [vmem:[#allocation2] sm:$0xff]  ;;  %v1937_v8 = vrot.slane %v6453_v29, 2  ;;  %v3780_v10 = vld [vmem:[%s7514_s1 + $0x1670] sm:$0xff]  ;;  %v3779_v0 = vld [vmem:[%s7514_s1 + $0x1668] sm:$0xff] }
 0x372   :  { %v1852_v41 = vmul.f32 0.05, %v1844_v28  ;;  %2340 = vmatprep.subr.mxu1 %v3791_v24  ;;  %v6470_v44 = vmax.f32 %v1843_v16, %v1851_v25  ;;  %v3782_v47 = vld [vmem:[%s7514_s1 + $0x1680] sm:$0xff]  ;;  %v3854_v24 = vld [vmem:[%s7517_s2 + $0x2b8] sm:$0xff] }
 0x373   :  { %v1876_v43 = vrot.slane %v6459_v33, 7  ;;  %2167 = vmatprep.mubr.f32.mxu1 %v6459_v33  ;;  %2341 = vmatpush1.msra.mxu1 %v3790_v30  ;;  %1899 = vst [vmem:[#allocation2 + $0x30] sm:$0xfe] %v1875_v13  ;;  %v3855_v16 = vld [vmem:[%s7517_s2 + $0x2c0] sm:$0xff]  ;;  %v3777_v30 = vld [vmem:[%s7514_s1 + $0x1658] sm:$0xff] }
 0x374   :  { %2342 = vmatprep.subr.mxu1 %v3789_v37  ;;  %2168 = vmatmul.mubr.f32.gmra.mxu1 %v6450_v2  ;;  %v1906_v46 = vld [vmem:[#allocation2 + $0x8] sm:$0xff]  ;;  %v6482_v48 = vmax.f32 %v1844_v28, %v1852_v41  ;;  %v1877_v55 = vrot.slane %v6470_v44, 7  ;;  %v3778_v25 = vld [vmem:[%s7514_s1 + $0x1660] sm:$0xff]  ;;  %v3853_v28 = vld [vmem:[%s7517_s2 + $0x2b0] sm:$0xff] }
 0x375   :  { %1900 = vst [vmem:[#allocation2 + $0x38] sm:$0xfe] %v1876_v43  ;;  %2343 = vmatpush1.msra.mxu1 %v3788_v27  ;;  %2244 = vmatprep.mubr.f32.mxu0 %v1906_v46  ;;  %v1914_v26 = vld [vmem:[#allocation2 + $0x8] sm:$0xfc]  ;;  %v3774_v46 = vld [vmem:[%s7514_s1 + $0x1640] sm:$0xff] }
 0x376   :  { %2344 = vmatprep.subr.mxu1 %v3787_v45  ;;  %2245 = vmatmul.mubr.f32.vlgmr.msra.gmra.mxu0 %v1905_v14  ;;  %v1879_v42 = vrot.slane %v6482_v48, 7  ;;  %v6493_v56 = vsel %vm48_vm1, %v1875_v13, %v1877_v55  ;;  %1903 = vst [vmem:[#allocation2 + $0x50] sm:$0x1] %v1877_v55  ;;  %v1936_v52 = vrot.slane %v1914_v26, 2  ;;  %v3852_v37 = vld [vmem:[%s7517_s2 + $0x2a8] sm:$0xff]  ;;  %v3776_v13 = vld [vmem:[%s7514_s1 + $0x1650] sm:$0xff] }
 0x377   :  { %2345 = vmatpush1.msra.mxu1 %v3786_v50  ;;  %2582 = vmatpush1.msra.mxu0 %v3861_v53  ;;  %v3775_v27 = vld [vmem:[%s7514_s1 + $0x1648] sm:$0xff]  ;;  %v3850_v45 = vld [vmem:[%s7517_s2 + $0x298] sm:$0xff]  ;;  %v3849_v50 = vld [vmem:[%s7517_s2 + $0x290] sm:$0xff] }
 0x378   :  { %v6502_v19 = vsel %vm48_vm1, %v1876_v43, %v1879_v42  ;;  %1904 = vst [vmem:[#allocation2 + $0x58] sm:$0x1] %v1879_v42  ;;  %2173 = vmatprep.mubr.f32.mxu1 %v6482_v48  ;;  %2346 = vmatprep.subr.mxu1 %v3785_v36  ;;  %v1938_v5 = vsel %vm113_vm2, %v1936_v52, %v1937_v8  ;;  %v3851_v43 = vld [vmem:[%s7517_s2 + $0x2a0] sm:$0xff]  ;;  %v3773_v53 = vld [vmem:[%s7514_s1 + $0x1638] sm:$0xff]  ;;  %v3848_v55 = vld [vmem:[%s7517_s2 + $0x288] sm:$0xff] }
 0x379   :  { %2583 = vmatprep.subr.mxu0 %v3860_v40  ;;  %2174 = vmatmul.mubr.f32.gmra.mxu1 %v6470_v44  ;;  %v3772_v14 = vld [vmem:[%s7514_s1 + $0x1630] sm:$0xff]  ;;  %v3847_v36 = vld [vmem:[%s7517_s2 + $0x280] sm:$0xff]  ;;  %v3771_v42 = vld [vmem:[%s7514_s1 + $0x1628] sm:$0xff] }
 0x37a   :  { %2347 = vmatpush1.msra.mxu1 %v3784_v58  ;;  %2584 = vmatpush1.msra.mxu0 %v3859_v60  ;;  %v1909_v41 = vld [vmem:[#allocation2 + $0x30] sm:$0xff]  ;;  %v3846_v40 = vld [vmem:[%s7517_s2 + $0x278] sm:$0xff]  ;;  %v3770_v58 = vld [vmem:[%s7514_s1 + $0x1620] sm:$0xff] }
 0x37b   :  { %2348 = vmatprep.subr.mxu1 %v3783_v32  ;;  %2585 = vmatprep.subr.mxu0 %v3858_v31  ;;  %v3845_v60 = vld [vmem:[%s7517_s2 + $0x270] sm:$0xff]  ;;  %v3769_v26 = vld [vmem:[%s7514_s1 + $0x1618] sm:$0xff]  ;;  %v3844_v32 = vld [vmem:[%s7517_s2 + $0x268] sm:$0xff] }
 0x37c   :  { %2250 = vmatprep.mubr.f32.mxu0 %v6453_v29  ;;  %2349 = vmatpush1.msra.mxu1 %v3782_v47  ;;  %v1910_v17 = vld [vmem:[#allocation2 + $0x38] sm:$0xff]  ;;  %v3768_v31 = vld [vmem:[%s7514_s1 + $0x1610] sm:$0xff]  ;;  %v3843_v47 = vld [vmem:[%s7517_s2 + $0x260] sm:$0xff] }
 0x37d   :  { %2586 = vmatpush1.msra.mxu0 %v3857_v63  ;;  %2350 = vmatprep.subr.mxu1 %v3781_v1  ;;  %v3842_v63 = vld [vmem:[%s7517_s2 + $0x258] sm:$0xff]  ;;  %v3766_v1 = vld [vmem:[%s7514_s1 + $0x1600] sm:$0xff]  ;;  %v3841_v52 = vld [vmem:[%s7517_s2 + $0x250] sm:$0xff] }
 0x37e   :  { %2251 = vmatmul.mubr.f32.gmra.mxu0 %v6445_v20  ;;  %2587 = vmatprep.subr.mxu0 %v3856_v4  ;;  %v3829_v4 = vld [vmem:[%s7514_s1 + $0x17f8] sm:$0xff]  ;;  %v2480_v29 = vld [vmem:[%s7517_s2 + $0xe0] sm:$0xff] }
 0x37f   :  { %2351 = vmatpush1.msra.mxu1 %v3780_v10  ;;  %2588 = vmatpush1.msra.mxu0 %v3855_v16  ;;  %v3840_v10 = vld [vmem:[%s7517_s2 + $0x248] sm:$0xff]  ;;  %v3828_v16 = vld [vmem:[%s7514_s1 + $0x17f0] sm:$0xff] }
 0x380   :  { %2256 = vmatprep.mubr.f32.mxu0 %v1910_v17  ;;  %2352 = vmatprep.subr.mxu1 %v3779_v0  ;;  %v3839_v17 = vld [vmem:[%s7517_s2 + $0x240] sm:$0xff]  ;;  %v3827_v0 = vld [vmem:[%s7514_s1 + $0x17e8] sm:$0xff] }
 0x381   :  { %2398 = vmatprep.mubr.f32.mxu1 %v1938_v5  ;;  %2589 = vmatprep.subr.mxu0 %v3854_v24  ;;  %v3838_v5 = vld [vmem:[%s7517_s2 + $0x238] sm:$0xff]  ;;  %v3826_v24 = vld [vmem:[%s7514_s1 + $0x17e0] sm:$0xff] }
 0x382   :  { %2353 = vmatpush1.msra.mxu1 %v3778_v25  ;;  %2590 = vmatpush1.msra.mxu0 %v3853_v28  ;;  %v3837_v25 = vld [vmem:[%s7517_s2 + $0x230] sm:$0xff]  ;;  %v3825_v28 = vld [vmem:[%s7514_s1 + $0x17d8] sm:$0xff] }
 0x383   :  { %2257 = vmatmul.mubr.f32.gmra.mxu0 %v1909_v41  ;;  %2354 = vmatprep.subr.mxu1 %v3777_v30  ;;  %v3836_v30 = vld [vmem:[%s7517_s2 + $0x228] sm:$0xff] }
 0x384   :  { %2591 = vmatprep.subr.mxu0 %v3852_v37  ;;  %2355 = vmatpush1.msra.mxu1 %v3776_v13  ;;  %v3824_v37 = vld [vmem:[%s7514_s1 + $0x17d0] sm:$0xff]  ;;  %v3835_v13 = vld [vmem:[%s7517_s2 + $0x220] sm:$0xff]  ;;  %v3823_v41 = vld [vmem:[%s7514_s1 + $0x17c8] sm:$0xff] }
 0x385   :  { %2592 = vmatpush1.msra.mxu0 %v3851_v43  ;;  %2356 = vmatprep.subr.mxu1 %v3775_v27  ;;  %v3834_v43 = vld [vmem:[%s7517_s2 + $0x218] sm:$0xff]  ;;  %v3822_v27 = vld [vmem:[%s7514_s1 + $0x17c0] sm:$0xff] }
 0x386   :  { %2593 = vmatprep.subr.mxu0 %v3850_v45  ;;  %2262 = vmatprep.mubr.f32.mxu0 %v6502_v19  ;;  %v3833_v45 = vld [vmem:[%s7517_s2 + $0x210] sm:$0xff] }
 0x387   :  { %2357 = vmatpush1.msra.mxu1 %v3774_v46  ;;  %2594 = vmatpush1.msra.mxu0 %v3849_v50  ;;  %v3821_v46 = vld [vmem:[%s7514_s1 + $0x17b8] sm:$0xff]  ;;  %v3832_v50 = vld [vmem:[%s7517_s2 + $0x208] sm:$0xff] }
 0x388   :  { %2263 = vmatmul.mubr.f32.gmra.mxu0 %v6493_v56  ;;  %2358 = vmatprep.subr.mxu1 %v3773_v53  ;;  %v3820_v53 = vld [vmem:[%s7514_s1 + $0x17b0] sm:$0xff] }
 0x389   :  { %2595 = vmatprep.subr.mxu0 %v3848_v55  ;;  %2359 = vmatpush1.msra.mxu1 %v3772_v14  ;;  %v3831_v55 = vld [vmem:[%s7517_s2 + $0x200] sm:$0xff]  ;;  %v3819_v14 = vld [vmem:[%s7514_s1 + $0x17a8] sm:$0xff] }
 0x38a   :  { %2596 = vmatpush1.msra.mxu0 %v3847_v36  ;;  %2645 = vmatprep.mubr.f32.mxu0 %v5761_v15  ;;  %v3767_v15 = vld [vmem:[%s7514_s1 + $0x1608] sm:$0xff]  ;;  %v3894_v36 = vld [vmem:[%s7517_s2 + $0x3f8] sm:$0xff] }
 0x38b   :  { %2360 = vmatprep.subr.mxu1 %v3771_v42  ;;  %2597 = vmatprep.subr.mxu0 %v3846_v40  ;;  %v3818_v42 = vld [vmem:[%s7514_s1 + $0x17a0] sm:$0xff]  ;;  %v3893_v40 = vld [vmem:[%s7517_s2 + $0x3f0] sm:$0xff] }
 0x38c   :  { %2361 = vmatpush1.msra.mxu1 %v3770_v58  ;;  %2598 = vmatpush1.msra.mxu0 %v3845_v60  ;;  %v3817_v58 = vld [vmem:[%s7514_s1 + $0x1798] sm:$0xff]  ;;  %v3892_v60 = vld [vmem:[%s7517_s2 + $0x3e8] sm:$0xff] }
 0x38d   :  { %2362 = vmatprep.subr.mxu1 %v3769_v26  ;;  %2599 = vmatprep.subr.mxu0 %v3844_v32  ;;  %v3816_v26 = vld [vmem:[%s7514_s1 + $0x1790] sm:$0xff]  ;;  %v3891_v32 = vld [vmem:[%s7517_s2 + $0x3e0] sm:$0xff] }
 0x38e   :  { %2363 = vmatpush1.msra.mxu1 %v3768_v31  ;;  %2600 = vmatpush1.msra.mxu0 %v3843_v47  ;;  %v3815_v31 = vld [vmem:[%s7514_s1 + $0x1788] sm:$0xff]  ;;  %v3890_v47 = vld [vmem:[%s7517_s2 + $0x3d8] sm:$0xff] }
 0x38f   :  { %2364 = vmatprep.subr.mxu1 %v3767_v15  ;;  %2601 = vmatprep.subr.mxu0 %v3842_v63  ;;  %v3814_v15 = vld [vmem:[%s7514_s1 + $0x1780] sm:$0xff]  ;;  %v3889_v63 = vld [vmem:[%s7517_s2 + $0x3d0] sm:$0xff] }
 0x390   :  { %2365 = vmatpush1.msra.mxu1 %v3766_v1  ;;  %2602 = vmatpush1.msra.mxu0 %v3841_v52  ;;  %v3813_v1 = vld [vmem:[%s7514_s1 + $0x1778] sm:$0xff]  ;;  %v3888_v52 = vld [vmem:[%s7517_s2 + $0x3c8] sm:$0xff] }
 0x391   :  { %2366 = vmatprep.subr.mxu1 %v3829_v4  ;;  %2603 = vmatprep.subr.mxu0 %v3840_v10  ;;  %v3812_v4 = vld [vmem:[%s7514_s1 + $0x1770] sm:$0xff]  ;;  %v3887_v10 = vld [vmem:[%s7517_s2 + $0x3c0] sm:$0xff] }
 0x392   :  { %2367 = vmatpush2.msra.mxu1 %v3828_v16  ;;  %2604 = vmatpush1.msra.mxu0 %v3839_v17  ;;  %v3811_v16 = vld [vmem:[%s7514_s1 + $0x1768] sm:$0xff]  ;;  %v3886_v17 = vld [vmem:[%s7517_s2 + $0x3b8] sm:$0xff] }
 0x393   :  { %2368 = vmatprep.subr.mxu1 %v3827_v0  ;;  %2605 = vmatprep.subr.mxu0 %v3838_v5  ;;  %v3810_v0 = vld [vmem:[%s7514_s1 + $0x1760] sm:$0xff]  ;;  %v3885_v5 = vld [vmem:[%s7517_s2 + $0x3b0] sm:$0xff] }
 0x394   :  { %2369 = vmatpush2.msra.mxu1 %v3826_v24  ;;  %2606 = vmatpush1.msra.mxu0 %v3837_v25  ;;  %v3809_v24 = vld [vmem:[%s7514_s1 + $0x1758] sm:$0xff]  ;;  %v3884_v25 = vld [vmem:[%s7517_s2 + $0x3a8] sm:$0xff] }
 0x395   :  { %2370 = vmatprep.subr.mxu1 %v3825_v28  ;;  %2607 = vmatprep.subr.mxu0 %v3836_v30  ;;  %v3808_v28 = vld [vmem:[%s7514_s1 + $0x1750] sm:$0xff]  ;;  %v3883_v30 = vld [vmem:[%s7517_s2 + $0x3a0] sm:$0xff] }
 0x396   :  { %2371 = vmatpush2.msra.mxu1 %v3824_v37  ;;  %2608 = vmatpush1.msra.mxu0 %v3835_v13  ;;  %v3807_v37 = vld [vmem:[%s7514_s1 + $0x1748] sm:$0xff]  ;;  %v3882_v13 = vld [vmem:[%s7517_s2 + $0x398] sm:$0xff] }
 0x397   :  { %2372 = vmatprep.subr.mxu1 %v3823_v41  ;;  %2609 = vmatprep.subr.mxu0 %v3834_v43  ;;  %v3806_v41 = vld [vmem:[%s7514_s1 + $0x1740] sm:$0xff]  ;;  %v3881_v43 = vld [vmem:[%s7517_s2 + $0x390] sm:$0xff] }
 0x398   :  { %2373 = vmatpush2.msra.mxu1 %v3822_v27  ;;  %2610 = vmatpush1.msra.mxu0 %v3833_v45  ;;  %v3805_v27 = vld [vmem:[%s7514_s1 + $0x1738] sm:$0xff]  ;;  %v3880_v45 = vld [vmem:[%s7517_s2 + $0x388] sm:$0xff] }
 0x399   :  { %2374 = vmatprep.subr.mxu1 %v3821_v46  ;;  %2611 = vmatprep.subr.mxu0 %v3832_v50  ;;  %v3804_v46 = vld [vmem:[%s7514_s1 + $0x1730] sm:$0xff]  ;;  %v3879_v50 = vld [vmem:[%s7517_s2 + $0x380] sm:$0xff] }
 0x39a   :  { %2375 = vmatpush2.msra.mxu1 %v3820_v53  ;;  %2612 = vmatpush1.msra.mxu0 %v3831_v55  ;;  %v3803_v53 = vld [vmem:[%s7514_s1 + $0x1728] sm:$0xff]  ;;  %v3878_v55 = vld [vmem:[%s7517_s2 + $0x378] sm:$0xff] }
 0x39b   :  { %2376 = vmatprep.subr.mxu1 %v3819_v14  ;;  %2613 = vmatprep.subr.mxu0 %v3894_v36  ;;  %v3802_v14 = vld [vmem:[%s7514_s1 + $0x1720] sm:$0xff]  ;;  %v3877_v36 = vld [vmem:[%s7517_s2 + $0x370] sm:$0xff] }
 0x39c   :  { %2377 = vmatpush2.msra.mxu1 %v3818_v42  ;;  %2614 = vmatpush2.msra.mxu0 %v3893_v40  ;;  %v1913_v42 = vld [vmem:[#allocation2] sm:$0xfc]  ;;  %v3801_v40 = vld [vmem:[%s7514_s1 + $0x1718] sm:$0xff] }
 0x39d   :  { %2378 = vmatprep.subr.mxu1 %v3817_v58  ;;  %2615 = vmatprep.subr.mxu0 %v3892_v60  ;;  %v3876_v58 = vld [vmem:[%s7517_s2 + $0x368] sm:$0xff] }
 0x39e   :  { %2379 = vmatpush2.msra.mxu1 %v3816_v26  ;;  %2616 = vmatpush2.msra.mxu0 %v3891_v32  ;;  %v1916_v60 = vld [vmem:[#allocation2 + $0x28] sm:$0x3]  ;;  %v3800_v26 = vld [vmem:[%s7514_s1 + $0x1710] sm:$0xff]  ;;  %v3875_v32 = vld [vmem:[%s7517_s2 + $0x360] sm:$0xff] }
 0x39f   :  { %2380 = vmatprep.subr.mxu1 %v3815_v31  ;;  %2617 = vmatprep.subr.mxu0 %v3890_v47  ;;  %v3799_v31 = vld [vmem:[%s7514_s1 + $0x1708] sm:$0xff]  ;;  %v3874_v47 = vld [vmem:[%s7517_s2 + $0x358] sm:$0xff] }
 0x3a0   :  { %2381 = vmatpush2.msra.mxu1 %v3814_v15  ;;  %2618 = vmatpush2.msra.mxu0 %v3889_v63  ;;  %v1933_v15 = vrot.slane %v1913_v42, 2  ;;  %v3798_v63 = vld [vmem:[%s7514_s1 + $0x1700] sm:$0xff] }
 0x3a1   :  { %2382 = vmatprep.subr.mxu1 %v3813_v1  ;;  %2619 = vmatprep.subr.mxu0 %v3888_v52  ;;  %v3873_v1 = vld [vmem:[%s7517_s2 + $0x350] sm:$0xff]  ;;  %v1941_v52 = vrot.slane %v1916_v60, 2 }
 0x3a2   :  { %2383 = vmatpush2.msra.mxu1 %v3812_v4  ;;  %2620 = vmatpush2.msra.mxu0 %v3887_v10  ;;  %v1934_v4 = vrot.slane %v6445_v20, 2  ;;  %v3872_v10 = vld [vmem:[%s7517_s2 + $0x348] sm:$0xff]  ;;  %v3871_v20 = vld [vmem:[%s7517_s2 + $0x340] sm:$0xff] }
 0x3a3   :  { %2384 = vmatprep.subr.mxu1 %v3811_v16  ;;  %2621 = vmatprep.subr.mxu0 %v3886_v17  ;;  %v1915_v16 = vld [vmem:[#allocation2 + $0x20] sm:$0x3]  ;;  %v2483_v17 = vld [vmem:[%s7517_s2 + $0xf8] sm:$0xff] }
 0x3a4   :  { %2385 = vmatpush2.msra.mxu1 %v3810_v0  ;;  %2622 = vmatpush2.msra.mxu0 %v3885_v5  ;;  %v1918_v0 = vld [vmem:[#allocation2 + $0x38] sm:$0xfc]  ;;  %v1935_v5 = vsel %vm113_vm2, %v1933_v15, %v1934_v4 }
 0x3a5   :  { %2386 = vmatprep.subr.mxu1 %v3809_v24  ;;  %2623 = vmatprep.subr.mxu0 %v3884_v25  ;;  %v2482_v24 = vld [vmem:[%s7517_s2 + $0xf0] sm:$0xff]  ;;  %v1942_v25 = vsel %vm113_vm2, %v1937_v8, %v1941_v52  ;;  %v1946_v8 = vrot.slane %v1918_v0, 2  ;;  %v2473_v52 = vld [vmem:[%s7517_s2 + $0xa8] sm:$0xff]  ;;  %v2471_v0 = vld [vmem:[%s7517_s2 + $0x98] sm:$0xff] }
 0x3a6   :  { %2387 = vmatpush2.msra.mxu1 %v3808_v28  ;;  %2624 = vmatpush2.msra.mxu0 %v3883_v30  ;;  %v3870_v28 = vld [vmem:[%s7517_s2 + $0x338] sm:$0xff]  ;;  %v2481_v30 = vld [vmem:[%s7517_s2 + $0xe8] sm:$0xff] }
 0x3a7   :  { %2388 = vmatprep.subr.mxu1 %v3807_v37  ;;  %2625 = vmatprep.subr.mxu0 %v3882_v13  ;;  %v1939_v37 = vrot.slane %v1915_v16, 2  ;;  %v3869_v13 = vld [vmem:[%s7517_s2 + $0x330] sm:$0xff]  ;;  %v2472_v16 = vld [vmem:[%s7517_s2 + $0xa0] sm:$0xff] }
 0x3a8   :  { %2389 = vmatpush2.msra.mxu1 %v3806_v41  ;;  %2626 = vmatpush2.msra.mxu0 %v3881_v43  ;;  %v3868_v41 = vld [vmem:[%s7517_s2 + $0x328] sm:$0xff]  ;;  %v1917_v43 = vld [vmem:[#allocation2 + $0x30] sm:$0xfc] }
 0x3a9   :  { %2390 = vmatprep.subr.mxu1 %v3805_v27  ;;  %2627 = vmatprep.subr.mxu0 %v3880_v45  ;;  %v1947_v27 = vrot.slane %v6502_v19, 2  ;;  %v2479_v45 = vld [vmem:[%s7517_s2 + $0xd8] sm:$0xff]  ;;  %v1943_v42 = vrot.slane %v1917_v43, 2 }
 0x3aa   :  { %2391 = vmatpush2.msra.mxu1 %v3804_v46  ;;  %2628 = vmatpush2.msra.mxu0 %v3879_v50  ;;  %v1920_v46 = vld [vmem:[#allocation2 + $0x58] sm:$0x3]  ;;  %v1940_v50 = vsel %vm113_vm2, %v1934_v4, %v1939_v37 }
 0x3ab   :  { %2392 = vmatprep.subr.mxu1 %v3803_v53  ;;  %2629 = vmatprep.subr.mxu0 %v3878_v55  ;;  %v3867_v53 = vld [vmem:[%s7517_s2 + $0x320] sm:$0xff]  ;;  %v2478_v55 = vld [vmem:[%s7517_s2 + $0xd0] sm:$0xff]  ;;  %v1948_v19 = vsel %vm113_vm2, %v1946_v8, %v1947_v27  ;;  %v1951_v60 = vrot.slane %v1920_v46, 2  ;;  %v3926_v4 = vld [vmem:[%s7517_s2 + $0x4f8] sm:$0xff] }
 0x3ac   :  { %2393 = vmatpush2.msra.mxu1 %v3802_v14  ;;  %2630 = vmatpush2.msra.mxu0 %v3877_v36  ;;  %v3866_v14 = vld [vmem:[%s7517_s2 + $0x318] sm:$0xff]  ;;  %v2477_v36 = vld [vmem:[%s7517_s2 + $0xc8] sm:$0xff]  ;;  %v2464_v8 = vld [vmem:[%s7517_s2 + $0x60] sm:$0xff] }
 0x3ad   :  { %2394 = vmatprep.subr.mxu1 %v3801_v40  ;;  %2631 = vmatprep.subr.mxu0 %v3876_v58  ;;  %v3865_v40 = vld [vmem:[%s7517_s2 + $0x310] sm:$0xff]  ;;  %v2476_v58 = vld [vmem:[%s7517_s2 + $0xc0] sm:$0xff]  ;;  %v2467_v37 = vld [vmem:[%s7517_s2 + $0x78] sm:$0xff] }
 0x3ae   :  { %2395 = vmatpush2.msra.mxu1 %v3800_v26  ;;  %2632 = vmatpush2.msra.mxu0 %v3875_v32  ;;  %v1944_v26 = vrot.slane %v6493_v56, 2  ;;  %v3864_v32 = vld [vmem:[%s7517_s2 + $0x308] sm:$0xff]  ;;  %v3863_v56 = vld [vmem:[%s7517_s2 + $0x300] sm:$0xff]  ;;  %v2463_v43 = vld [vmem:[%s7517_s2 + $0x58] sm:$0xff] }
 0x3af   :  { %2396 = vmatprep.subr.mxu1 %v3799_v31  ;;  %2633 = vmatprep.subr.mxu0 %v3874_v47  ;;  %v2475_v31 = vld [vmem:[%s7517_s2 + $0xb8] sm:$0xff]  ;;  %v1919_v47 = vld [vmem:[#allocation2 + $0x50] sm:$0x3]  ;;  %v2461_v46 = vld [vmem:[%s7517_s2 + $0x48] sm:$0xff] }
 0x3b0   :  { %2397 = vmatpush2.msra.mxu1 %v3798_v63  ;;  %2634 = vmatpush2.msra.mxu0 %v3873_v1  ;;  %v1945_v15 = vsel %vm113_vm2, %v1943_v42, %v1944_v26  ;;  %v2474_v63 = vld [vmem:[%s7517_s2 + $0xb0] sm:$0xff]  ;;  %v1952_v1 = vsel %vm113_vm2, %v1947_v27, %v1951_v60  ;;  %v3916_v27 = vld [vmem:[%s7517_s2 + $0x4a8] sm:$0xff]  ;;  %v3910_v42 = vld [vmem:[%s7517_s2 + $0x478] sm:$0xff] }
 0x3b1   :  { %2399 = vmatmul.mubr.f32.vlgmr.msra.gmra.mxu1 %v1935_v5  ;;  %2635 = vmatprep.subr.mxu0 %v3872_v10  ;;  %v1949_v10 = vrot.slane %v1919_v47, 2  ;;  %v3924_v5 = vld [vmem:[%s7517_s2 + $0x4e8] sm:$0xff]  ;;  %v3906_v47 = vld [vmem:[%s7517_s2 + $0x458] sm:$0xff] }
 0x3b2   :  { %2670 = vmatprep.subr.mxu1 %v2483_v17  ;;  %2404 = vmatprep.mubr.f32.mxu1 %v1942_v25  ;;  %v3925_v17 = vld [vmem:[%s7517_s2 + $0x4f0] sm:$0xff]  ;;  %v3922_v25 = vld [vmem:[%s7517_s2 + $0x4d8] sm:$0xff]  ;;  %v3908_v60 = vld [vmem:[%s7517_s2 + $0x468] sm:$0xff] }
 0x3b3   :  { %2636 = vmatpush2.msra.mxu0 %v3871_v20  ;;  %2671 = vmatpush1.msra.mxu1 %v2482_v24  ;;  %v2470_v20 = vld [vmem:[%s7517_s2 + $0x90] sm:$0xff]  ;;  %v3923_v24 = vld [vmem:[%s7517_s2 + $0x4e0] sm:$0xff] }
 0x3b4   :  { %2637 = vmatprep.subr.mxu0 %v3870_v28  ;;  %2672 = vmatprep.subr.mxu1 %v2481_v30  ;;  %v2468_v28 = vld [vmem:[%s7517_s2 + $0x80] sm:$0xff]  ;;  %v3921_v30 = vld [vmem:[%s7517_s2 + $0x4d0] sm:$0xff] }
 0x3b5   :  { %2638 = vmatpush2.msra.mxu0 %v3869_v13  ;;  %2673 = vmatpush1.msra.mxu1 %v2480_v29  ;;  %v2466_v13 = vld [vmem:[%s7517_s2 + $0x70] sm:$0xff]  ;;  %v2465_v29 = vld [vmem:[%s7517_s2 + $0x68] sm:$0xff] }
 0x3b6   :  { %2405 = vmatmul.mubr.f32.gmra.mxu1 %v1940_v50  ;;  %2639 = vmatprep.subr.mxu0 %v3868_v41  ;;  %v3917_v41 = vld [vmem:[%s7517_s2 + $0x4b0] sm:$0xff]  ;;  %v2460_v50 = vld [vmem:[%s7517_s2 + $0x40] sm:$0xff] }
 0x3b7   :  { %2674 = vmatprep.subr.mxu1 %v2479_v45  ;;  %2410 = vmatprep.mubr.f32.mxu1 %v1948_v19  ;;  %v2462_v45 = vld [vmem:[%s7517_s2 + $0x50] sm:$0xff]  ;;  %v3912_v19 = vld [vmem:[%s7517_s2 + $0x488] sm:$0xff] }
 0x3b8   :  { %2640 = vmatpush2.msra.mxu0 %v3867_v53  ;;  %2675 = vmatpush1.msra.mxu1 %v2478_v55  ;;  %v3913_v53 = vld [vmem:[%s7517_s2 + $0x490] sm:$0xff]  ;;  %v2459_v55 = vld [vmem:[%s7517_s2 + $0x38] sm:$0xff] }
 0x3b9   :  { %2641 = vmatprep.subr.mxu0 %v3866_v14  ;;  %2676 = vmatprep.subr.mxu1 %v2477_v36  ;;  %v2458_v14 = vld [vmem:[%s7517_s2 + $0x30] sm:$0xff]  ;;  %v3911_v36 = vld [vmem:[%s7517_s2 + $0x480] sm:$0xff] }
 0x3ba   :  { %2642 = vmatpush2.msra.mxu0 %v3865_v40  ;;  %2677 = vmatpush1.msra.mxu1 %v2476_v58  ;;  %v2456_v40 = vld [vmem:[%s7517_s2 + $0x20] sm:$0xff]  ;;  %v3909_v58 = vld [vmem:[%s7517_s2 + $0x470] sm:$0xff] }
 0x3bb   :  { %2411 = vmatmul.mubr.f32.gmra.mxu1 %v1945_v15  ;;  %2643 = vmatprep.subr.mxu0 %v3864_v32  ;;  %v3907_v32 = vld [vmem:[%s7517_s2 + $0x460] sm:$0xff] }
 0x3bc   :  { %2678 = vmatprep.subr.mxu1 %v2475_v31  ;;  %2416 = vmatprep.mubr.f32.mxu1 %v1952_v1  ;;  %v2453_v31 = vld [vmem:[%s7517_s2 + $0x8] sm:$0xff]  ;;  %v2452_v15 = vld [vmem:[%s7517_s2] sm:$0xff] }
 0x3bd   :  { %2644 = vmatpush2.msra.mxu0 %v3863_v56  ;;  %2679 = vmatpush1.msra.mxu1 %v2474_v63  ;;  %v3905_v56 = vld [vmem:[%s7517_s2 + $0x450] sm:$0xff]  ;;  %v2515_v63 = vld [vmem:[%s7517_s2 + $0x1f8] sm:$0xff]  ;;  %v3904_v1 = vld [vmem:[%s7517_s2 + $0x448] sm:$0xff] }
 0x3be   :  { %2646 = vmatmul.mubr.f32.vlgmr.msra.gmra.mxu0 %v5758_v62  ;;  %2680 = vmatprep.subr.mxu1 %v2473_v52  ;;  %v1950_v62 = vsel %vm113_vm2, %v1944_v26, %v1949_v10  ;;  %v2454_v26 = vld [vmem:[%s7517_s2 + $0x10] sm:$0xff]  ;;  %v2513_v10 = vld [vmem:[%s7517_s2 + $0x1e8] sm:$0xff] }
 0x3bf   :  { %2824 = vmatprep.subr.mxu0 %v3926_v4  ;;  %2651 = vmatprep.mubr.f32.mxu0 %v5779_v35  ;;  %v2469_v35 = vld [vmem:[%s7517_s2 + $0x88] sm:$0xff]  ;;  %v2514_v52 = vld [vmem:[%s7517_s2 + $0x1f0] sm:$0xff]  ;;  %v3903_v4 = vld [vmem:[%s7517_s2 + $0x440] sm:$0xff] }
 0x3c0   :  { %2681 = vmatpush1.msra.mxu1 %v2472_v16  ;;  %2825 = vmatpush1.msra.mxu0 %v3925_v17  ;;  %v3902_v16 = vld [vmem:[%s7517_s2 + $0x438] sm:$0xff]  ;;  %v2512_v17 = vld [vmem:[%s7517_s2 + $0x1e0] sm:$0xff] }
 0x3c1   :  { %2417 = vmatmul.mubr.f32.gmra.mxu1 %v1950_v62  ;;  %2682 = vmatprep.subr.mxu1 %v2471_v0  ;;  %v3901_v0 = vld [vmem:[%s7517_s2 + $0x430] sm:$0xff] }
 0x3c2   :  { %2826 = vmatprep.subr.mxu0 %v3924_v5  ;;  %2683 = vmatpush1.msra.mxu1 %v2470_v20  ;;  %v2511_v5 = vld [vmem:[%s7517_s2 + $0x1d8] sm:$0xff]  ;;  %v3900_v20 = vld [vmem:[%s7517_s2 + $0x428] sm:$0xff]  ;;  %v2510_v62 = vld [vmem:[%s7517_s2 + $0x1d0] sm:$0xff] }
 0x3c3   :  { %2734 = vmatprep.mubr.f32.mxu1 %v5108_v49  ;;  %2827 = vmatpush1.msra.mxu0 %v3923_v24  ;;  %v3920_v49 = vld [vmem:[%s7517_s2 + $0x4c8] sm:$0xff]  ;;  %v3899_v24 = vld [vmem:[%s7517_s2 + $0x420] sm:$0xff] }
 0x3c4   :  { %2652 = vmatmul.mubr.f32.gmra.mxu0 %v5768_v22  ;;  %2684 = vmatprep.subr.mxu1 %v2469_v35  ;;  %v3919_v22 = vld [vmem:[%s7517_s2 + $0x4c0] sm:$0xff]  ;;  %v2509_v35 = vld [vmem:[%s7517_s2 + $0x1c8] sm:$0xff] }
 0x3c5   :  { %2828 = vmatprep.subr.mxu0 %v3922_v25  ;;  %2657 = vmatprep.mubr.f32.mxu0 %v5799_v21  ;;  %v3918_v21 = vld [vmem:[%s7517_s2 + $0x4b8] sm:$0xff] }
 0x3c6   :  { %2685 = vmatpush1.msra.mxu1 %v2468_v28  ;;  %2829 = vmatpush1.msra.mxu0 %v3921_v30  ;;  %v3898_v25 = vld [vmem:[%s7517_s2 + $0x418] sm:$0xff]  ;;  %v2508_v28 = vld [vmem:[%s7517_s2 + $0x1c0] sm:$0xff]  ;;  %v3897_v30 = vld [vmem:[%s7517_s2 + $0x410] sm:$0xff] }
 0x3c7   :  { %2686 = vmatprep.subr.mxu1 %v2467_v37  ;;  %2830 = vmatprep.subr.mxu0 %v3920_v49  ;;  %v2507_v37 = vld [vmem:[%s7517_s2 + $0x1b8] sm:$0xff]  ;;  %v3896_v49 = vld [vmem:[%s7517_s2 + $0x408] sm:$0xff] }
 0x3c8   :  { %2687 = vmatpush1.msra.mxu1 %v2466_v13  ;;  %2831 = vmatpush1.msra.mxu0 %v3919_v22  ;;  %v2506_v13 = vld [vmem:[%s7517_s2 + $0x1b0] sm:$0xff]  ;;  %v3895_v22 = vld [vmem:[%s7517_s2 + $0x400] sm:$0xff] }
 0x3c9   :  { %2658 = vmatmul.mubr.f32.gmra.mxu0 %v5793_v51  ;;  %2688 = vmatprep.subr.mxu1 %v2465_v29  ;;  %v3915_v51 = vld [vmem:[%s7517_s2 + $0x4a0] sm:$0xff]  ;;  %v2505_v29 = vld [vmem:[%s7517_s2 + $0x1a8] sm:$0xff] }
 0x3ca   :  { %2832 = vmatprep.subr.mxu0 %v3918_v21  ;;  %2663 = vmatprep.mubr.f32.mxu0 %v5824_v61  ;;  %v3914_v61 = vld [vmem:[%s7517_s2 + $0x498] sm:$0xff] }
 0x3cb   :  { %2689 = vmatpush1.msra.mxu1 %v2464_v8  ;;  %2833 = vmatpush1.msra.mxu0 %v3917_v41  ;;  %v3958_v21 = vld [vmem:[%s7517_s2 + $0x5f8] sm:$0xff]  ;;  %v2504_v8 = vld [vmem:[%s7517_s2 + $0x1a0] sm:$0xff]  ;;  %v3957_v41 = vld [vmem:[%s7517_s2 + $0x5f0] sm:$0xff] }
 0x3cc   :  { %2690 = vmatprep.subr.mxu1 %v2463_v43  ;;  %2834 = vmatprep.subr.mxu0 %v3916_v27  ;;  %v2503_v43 = vld [vmem:[%s7517_s2 + $0x198] sm:$0xff]  ;;  %v3956_v27 = vld [vmem:[%s7517_s2 + $0x5e8] sm:$0xff] }
 0x3cd   :  { %2691 = vmatpush1.msra.mxu1 %v2462_v45  ;;  %2835 = vmatpush1.msra.mxu0 %v3915_v51  ;;  %v2502_v45 = vld [vmem:[%s7517_s2 + $0x190] sm:$0xff]  ;;  %v3955_v51 = vld [vmem:[%s7517_s2 + $0x5e0] sm:$0xff] }
 0x3ce   :  { %2664 = vmatmul.mubr.f32.gmra.mxu0 %v5810_v57  ;;  %2692 = vmatprep.subr.mxu1 %v2461_v46  ;;  %v2457_v57 = vld [vmem:[%s7517_s2 + $0x28] sm:$0xff] }
 0x3cf   :  { %2836 = vmatprep.subr.mxu0 %v3914_v61  ;;  %2693 = vmatpush1.msra.mxu1 %v2460_v50  ;;  %v2501_v46 = vld [vmem:[%s7517_s2 + $0x188] sm:$0xff]  ;;  %v3954_v61 = vld [vmem:[%s7517_s2 + $0x5d8] sm:$0xff]  ;;  %v2500_v50 = vld [vmem:[%s7517_s2 + $0x180] sm:$0xff] }
 0x3d0   :  { %2837 = vmatpush1.msra.mxu0 %v3913_v53  ;;  %2888 = vmatprep.mubr.f32.mxu0 %v6417_v38  ;;  %v2455_v38 = vld [vmem:[%s7517_s2 + $0x18] sm:$0xff]  ;;  %v3953_v53 = vld [vmem:[%s7517_s2 + $0x5d0] sm:$0xff] }
 0x3d1   :  { %2694 = vmatprep.subr.mxu1 %v2459_v55  ;;  %2838 = vmatprep.subr.mxu0 %v3912_v19  ;;  %v2499_v55 = vld [vmem:[%s7517_s2 + $0x178] sm:$0xff]  ;;  %v3952_v19 = vld [vmem:[%s7517_s2 + $0x5c8] sm:$0xff] }
 0x3d2   :  { %2695 = vmatpush1.msra.mxu1 %v2458_v14  ;;  %2839 = vmatpush1.msra.mxu0 %v3911_v36  ;;  %v2498_v14 = vld [vmem:[%s7517_s2 + $0x170] sm:$0xff]  ;;  %v3951_v36 = vld [vmem:[%s7517_s2 + $0x5c0] sm:$0xff] }
 0x3d3   :  { %2696 = vmatprep.subr.mxu1 %v2457_v57  ;;  %2840 = vmatprep.subr.mxu0 %v3910_v42  ;;  %v2497_v57 = vld [vmem:[%s7517_s2 + $0x168] sm:$0xff]  ;;  %v3950_v42 = vld [vmem:[%s7517_s2 + $0x5b8] sm:$0xff] }
 0x3d4   :  { %2697 = vmatpush1.msra.mxu1 %v2456_v40  ;;  %2841 = vmatpush1.msra.mxu0 %v3909_v58  ;;  %v2496_v40 = vld [vmem:[%s7517_s2 + $0x160] sm:$0xff]  ;;  %v3949_v58 = vld [vmem:[%s7517_s2 + $0x5b0] sm:$0xff] }
 0x3d5   :  { %2698 = vmatprep.subr.mxu1 %v2455_v38  ;;  %2842 = vmatprep.subr.mxu0 %v3908_v60  ;;  %v2495_v38 = vld [vmem:[%s7517_s2 + $0x158] sm:$0xff]  ;;  %v3948_v60 = vld [vmem:[%s7517_s2 + $0x5a8] sm:$0xff] }
 0x3d6   :  { %2699 = vmatpush1.msra.mxu1 %v2454_v26  ;;  %2843 = vmatpush1.msra.mxu0 %v3907_v32  ;;  %v2494_v26 = vld [vmem:[%s7517_s2 + $0x150] sm:$0xff]  ;;  %v3947_v32 = vld [vmem:[%s7517_s2 + $0x5a0] sm:$0xff] }
 0x3d7   :  { %2700 = vmatprep.subr.mxu1 %v2453_v31  ;;  %2844 = vmatprep.subr.mxu0 %v3906_v47  ;;  %v2493_v31 = vld [vmem:[%s7517_s2 + $0x148] sm:$0xff]  ;;  %v3946_v47 = vld [vmem:[%s7517_s2 + $0x598] sm:$0xff] }
 0x3d8   :  { %2701 = vmatpush1.msra.mxu1 %v2452_v15  ;;  %2845 = vmatpush1.msra.mxu0 %v3905_v56  ;;  %v2492_v15 = vld [vmem:[%s7517_s2 + $0x140] sm:$0xff]  ;;  %v3945_v56 = vld [vmem:[%s7517_s2 + $0x590] sm:$0xff] }
 0x3d9   :  { %2702 = vmatprep.subr.mxu1 %v2515_v63  ;;  %2846 = vmatprep.subr.mxu0 %v3904_v1  ;;  %v2491_v63 = vld [vmem:[%s7517_s2 + $0x138] sm:$0xff]  ;;  %v3944_v1 = vld [vmem:[%s7517_s2 + $0x588] sm:$0xff] }
 0x3da   :  { %2703 = vmatpush2.msra.mxu1 %v2514_v52  ;;  %2847 = vmatpush1.msra.mxu0 %v3903_v4  ;;  %v2490_v52 = vld [vmem:[%s7517_s2 + $0x130] sm:$0xff]  ;;  %v3943_v4 = vld [vmem:[%s7517_s2 + $0x580] sm:$0xff] }
 0x3db   :  { %2704 = vmatprep.subr.mxu1 %v2513_v10  ;;  %2848 = vmatprep.subr.mxu0 %v3902_v16  ;;  %v2489_v10 = vld [vmem:[%s7517_s2 + $0x128] sm:$0xff]  ;;  %v3942_v16 = vld [vmem:[%s7517_s2 + $0x578] sm:$0xff] }
 0x3dc   :  { %2705 = vmatpush2.msra.mxu1 %v2512_v17  ;;  %2849 = vmatpush1.msra.mxu0 %v3901_v0  ;;  %v2488_v17 = vld [vmem:[%s7517_s2 + $0x120] sm:$0xff]  ;;  %v3941_v0 = vld [vmem:[%s7517_s2 + $0x570] sm:$0xff] }
 0x3dd   :  { %2706 = vmatprep.subr.mxu1 %v2511_v5  ;;  %2850 = vmatprep.subr.mxu0 %v3900_v20  ;;  %v2487_v5 = vld [vmem:[%s7517_s2 + $0x118] sm:$0xff]  ;;  %v3940_v20 = vld [vmem:[%s7517_s2 + $0x568] sm:$0xff] }
 0x3de   :  { %2707 = vmatpush2.msra.mxu1 %v2510_v62  ;;  %2851 = vmatpush1.msra.mxu0 %v3899_v24  ;;  %v2486_v62 = vld [vmem:[%s7517_s2 + $0x110] sm:$0xff]  ;;  %v3939_v24 = vld [vmem:[%s7517_s2 + $0x560] sm:$0xff] }
 0x3df   :  { %2708 = vmatprep.subr.mxu1 %v2509_v35  ;;  %2852 = vmatprep.subr.mxu0 %v3898_v25  ;;  %v2485_v35 = vld [vmem:[%s7517_s2 + $0x108] sm:$0xff]  ;;  %v3938_v25 = vld [vmem:[%s7517_s2 + $0x558] sm:$0xff] }
 0x3e0   :  { %2709 = vmatpush2.msra.mxu1 %v2508_v28  ;;  %2853 = vmatpush1.msra.mxu0 %v3897_v30  ;;  %v2484_v28 = vld [vmem:[%s7517_s2 + $0x100] sm:$0xff]  ;;  %v3937_v30 = vld [vmem:[%s7517_s2 + $0x550] sm:$0xff] }
 0x3e1   :  { %2710 = vmatprep.subr.mxu1 %v2507_v37  ;;  %2854 = vmatprep.subr.mxu0 %v3896_v49  ;;  %v3936_v37 = vld [vmem:[%s7517_s2 + $0x548] sm:$0xff]  ;;  %v3935_v49 = vld [vmem:[%s7517_s2 + $0x540] sm:$0xff] }
 0x3e2   :  { %2711 = vmatpush2.msra.mxu1 %v2506_v13  ;;  %2855 = vmatpush1.msra.mxu0 %v3895_v22  ;;  %v3934_v13 = vld [vmem:[%s7517_s2 + $0x538] sm:$0xff] }
 0x3e3   :  { %2712 = vmatprep.subr.mxu1 %v2505_v29  ;;  %2856 = vmatprep.subr.mxu0 %v3958_v21  ;;  %v3990_v22 = vld [vmem:[%s7517_s2 + $0x6f8] sm:$0xff]  ;;  %v3933_v29 = vld [vmem:[%s7517_s2 + $0x530] sm:$0xff] }
 0x3e4   :  { %2713 = vmatpush2.msra.mxu1 %v2504_v8  ;;  %2857 = vmatpush2.msra.mxu0 %v3957_v41  ;;  %v3989_v21 = vld [vmem:[%s7517_s2 + $0x6f0] sm:$0xff]  ;;  %v3932_v8 = vld [vmem:[%s7517_s2 + $0x528] sm:$0xff]  ;;  %v3930_v41 = vld [vmem:[%s7517_s2 + $0x518] sm:$0xff] }
 0x3e5   :  { %2714 = vmatprep.subr.mxu1 %v2503_v43  ;;  %2858 = vmatprep.subr.mxu0 %v3956_v27  ;;  %v3929_v43 = vld [vmem:[%s7517_s2 + $0x510] sm:$0xff]  ;;  %v3987_v27 = vld [vmem:[%s7517_s2 + $0x6e0] sm:$0xff] }
 0x3e6   :  { %2715 = vmatpush2.msra.mxu1 %v2502_v45  ;;  %2859 = vmatpush2.msra.mxu0 %v3955_v51  ;;  %v3928_v45 = vld [vmem:[%s7517_s2 + $0x508] sm:$0xff]  ;;  %v3986_v51 = vld [vmem:[%s7517_s2 + $0x6d8] sm:$0xff] }
 0x3e7   :  { %2716 = vmatprep.subr.mxu1 %v2501_v46  ;;  %2860 = vmatprep.subr.mxu0 %v3954_v61  ;;  %v3984_v46 = vld [vmem:[%s7517_s2 + $0x6c8] sm:$0xff]  ;;  %v3983_v61 = vld [vmem:[%s7517_s2 + $0x6c0] sm:$0xff] }
 0x3e8   :  { %2717 = vmatpush2.msra.mxu1 %v2500_v50  ;;  %2861 = vmatpush2.msra.mxu0 %v3953_v53  ;;  %v3977_v50 = vld [vmem:[%s7517_s2 + $0x690] sm:$0xff]  ;;  %v3974_v53 = vld [vmem:[%s7517_s2 + $0x678] sm:$0xff] }
 0x3e9   :  { %2718 = vmatprep.subr.mxu1 %v2499_v55  ;;  %2862 = vmatprep.subr.mxu0 %v3952_v19  ;;  %v3973_v55 = vld [vmem:[%s7517_s2 + $0x670] sm:$0xff]  ;;  %v3970_v19 = vld [vmem:[%s7517_s2 + $0x658] sm:$0xff] }
 0x3ea   :  { %2719 = vmatpush2.msra.mxu1 %v2498_v14  ;;  %2863 = vmatpush2.msra.mxu0 %v3951_v36  ;;  %v3969_v14 = vld [vmem:[%s7517_s2 + $0x650] sm:$0xff]  ;;  %v3967_v36 = vld [vmem:[%s7517_s2 + $0x640] sm:$0xff] }
 0x3eb   :  { %2720 = vmatprep.subr.mxu1 %v2497_v57  ;;  %2864 = vmatprep.subr.mxu0 %v3950_v42  ;;  %v3966_v57 = vld [vmem:[%s7517_s2 + $0x638] sm:$0xff]  ;;  %v3965_v42 = vld [vmem:[%s7517_s2 + $0x630] sm:$0xff] }
 0x3ec   :  { %2721 = vmatpush2.msra.mxu1 %v2496_v40  ;;  %2865 = vmatpush2.msra.mxu0 %v3949_v58  ;;  %v3964_v40 = vld [vmem:[%s7517_s2 + $0x628] sm:$0xff]  ;;  %v3963_v58 = vld [vmem:[%s7517_s2 + $0x620] sm:$0xff] }
 0x3ed   :  { %2722 = vmatprep.subr.mxu1 %v2495_v38  ;;  %2866 = vmatprep.subr.mxu0 %v3948_v60  ;;  %v3962_v38 = vld [vmem:[%s7517_s2 + $0x618] sm:$0xff]  ;;  %v3961_v60 = vld [vmem:[%s7517_s2 + $0x610] sm:$0xff] }
 0x3ee   :  { %2723 = vmatpush2.msra.mxu1 %v2494_v26  ;;  %2867 = vmatpush2.msra.mxu0 %v3947_v32  ;;  %v3960_v26 = vld [vmem:[%s7517_s2 + $0x608] sm:$0xff]  ;;  %v3959_v32 = vld [vmem:[%s7517_s2 + $0x600] sm:$0xff] }
 0x3ef   :  { %2724 = vmatprep.subr.mxu1 %v2493_v31  ;;  %2868 = vmatprep.subr.mxu0 %v3946_v47  ;;  %v4022_v31 = vld [vmem:[%s7517_s2 + $0x7f8] sm:$0xff]  ;;  %v4021_v47 = vld [vmem:[%s7517_s2 + $0x7f0] sm:$0xff] }
 0x3f0   :  { %2725 = vmatpush2.msra.mxu1 %v2492_v15  ;;  %2869 = vmatpush2.msra.mxu0 %v3945_v56  ;;  %v4020_v15 = vld [vmem:[%s7517_s2 + $0x7e8] sm:$0xff]  ;;  %v4019_v56 = vld [vmem:[%s7517_s2 + $0x7e0] sm:$0xff] }
 0x3f1   :  { %2726 = vmatprep.subr.mxu1 %v2491_v63  ;;  %2870 = vmatprep.subr.mxu0 %v3944_v1  ;;  %v4018_v63 = vld [vmem:[%s7517_s2 + $0x7d8] sm:$0xff]  ;;  %v4017_v1 = vld [vmem:[%s7517_s2 + $0x7d0] sm:$0xff] }
 0x3f2   :  { %2727 = vmatpush2.msra.mxu1 %v2490_v52  ;;  %2871 = vmatpush2.msra.mxu0 %v3943_v4  ;;  %v4016_v52 = vld [vmem:[%s7517_s2 + $0x7c8] sm:$0xff]  ;;  %v4015_v4 = vld [vmem:[%s7517_s2 + $0x7c0] sm:$0xff] }
 0x3f3   :  { %2728 = vmatprep.subr.mxu1 %v2489_v10  ;;  %2872 = vmatprep.subr.mxu0 %v3942_v16  ;;  %v4014_v10 = vld [vmem:[%s7517_s2 + $0x7b8] sm:$0xff]  ;;  %v4013_v16 = vld [vmem:[%s7517_s2 + $0x7b0] sm:$0xff] }
 0x3f4   :  { %2729 = vmatpush2.msra.mxu1 %v2488_v17  ;;  %2873 = vmatpush2.msra.mxu0 %v3941_v0  ;;  %v4012_v17 = vld [vmem:[%s7517_s2 + $0x7a8] sm:$0xff]  ;;  %v4011_v0 = vld [vmem:[%s7517_s2 + $0x7a0] sm:$0xff] }
 0x3f5   :  { %2730 = vmatprep.subr.mxu1 %v2487_v5  ;;  %2874 = vmatprep.subr.mxu0 %v3940_v20  ;;  %v4010_v5 = vld [vmem:[%s7517_s2 + $0x798] sm:$0xff]  ;;  %v4009_v20 = vld [vmem:[%s7517_s2 + $0x790] sm:$0xff] }
 0x3f6   :  { %2731 = vmatpush2.msra.mxu1 %v2486_v62  ;;  %2875 = vmatpush2.msra.mxu0 %v3939_v24  ;;  %v4008_v62 = vld [vmem:[%s7517_s2 + $0x788] sm:$0xff]  ;;  %v4007_v24 = vld [vmem:[%s7517_s2 + $0x780] sm:$0xff] }
 0x3f7   :  { %2732 = vmatprep.subr.mxu1 %v2485_v35  ;;  %2876 = vmatprep.subr.mxu0 %v3938_v25  ;;  %v4006_v35 = vld [vmem:[%s7517_s2 + $0x778] sm:$0xff]  ;;  %v4005_v25 = vld [vmem:[%s7517_s2 + $0x770] sm:$0xff] }
 0x3f8   :  { %2733 = vmatpush2.msra.mxu1 %v2484_v28  ;;  %2877 = vmatpush2.msra.mxu0 %v3937_v30  ;;  %v4004_v28 = vld [vmem:[%s7517_s2 + $0x768] sm:$0xff]  ;;  %v4003_v30 = vld [vmem:[%s7517_s2 + $0x760] sm:$0xff] }
 0x3f9   :  { %2735 = vmatmul.mubr.f32.vlgmr.msra.gmra.mxu1 %v5105_v34  ;;  %2878 = vmatprep.subr.mxu0 %v3936_v37  ;;  %v3931_v34 = vld [vmem:[%s7517_s2 + $0x520] sm:$0xff]  ;;  %v4002_v37 = vld [vmem:[%s7517_s2 + $0x758] sm:$0xff] }
 0x3fa   :  { %2740 = vmatprep.mubr.f32.mxu1 %v5126_v59  ;;  %2879 = vmatpush2.msra.mxu0 %v3935_v49  ;;  %v3988_v59 = vld [vmem:[%s7517_s2 + $0x6e8] sm:$0xff]  ;;  %v4001_v49 = vld [vmem:[%s7517_s2 + $0x750] sm:$0xff] }
 0x3fb   :  { %2880 = vmatprep.subr.mxu0 %v3934_v13  ;;  %2986 = vmatprep.subr.mxu1 %v3990_v22  ;;  %v4000_v13 = vld [vmem:[%s7517_s2 + $0x748] sm:$0xff]  ;;  %v3999_v22 = vld [vmem:[%s7517_s2 + $0x740] sm:$0xff] }
 0x3fc   :  { %2881 = vmatpush2.msra.mxu0 %v3933_v29  ;;  %2987 = vmatpush1.msra.mxu1 %v3989_v21  ;;  %v3998_v29 = vld [vmem:[%s7517_s2 + $0x738] sm:$0xff]  ;;  %v3997_v21 = vld [vmem:[%s7517_s2 + $0x730] sm:$0xff] }
 0x3fd   :  { %2741 = vmatmul.mubr.f32.gmra.mxu1 %v5115_v54  ;;  %2882 = vmatprep.subr.mxu0 %v3932_v8  ;;  %v3927_v54 = vld [vmem:[%s7517_s2 + $0x500] sm:$0xff]  ;;  %v3996_v8 = vld [vmem:[%s7517_s2 + $0x728] sm:$0xff] }
 0x3fe   :  { %2746 = vmatprep.mubr.f32.mxu1 %v5146_v11  ;;  %2883 = vmatpush2.msra.mxu0 %v3931_v34  ;;  %v3985_v11 = vld [vmem:[%s7517_s2 + $0x6d0] sm:$0xff]  ;;  %v3995_v34 = vld [vmem:[%s7517_s2 + $0x720] sm:$0xff] }
 0x3ff   :  { %2884 = vmatprep.subr.mxu0 %v3930_v41  ;;  %2988 = vmatprep.subr.mxu1 %v3988_v59  ;;  %v3994_v41 = vld [vmem:[%s7517_s2 + $0x718] sm:$0xff]  ;;  %v3993_v59 = vld [vmem:[%s7517_s2 + $0x710] sm:$0xff] }
 0x400   :  { %2885 = vmatpush2.msra.mxu0 %v3929_v43  ;;  %2989 = vmatpush1.msra.mxu1 %v3987_v27  ;;  %v3992_v43 = vld [vmem:[%s7517_s2 + $0x708] sm:$0xff]  ;;  %v3991_v27 = vld [vmem:[%s7517_s2 + $0x700] sm:$0xff] }
 0x401   :  { %2747 = vmatmul.mubr.f32.gmra.mxu1 %v5140_v6  ;;  %2886 = vmatprep.subr.mxu0 %v3928_v45  ;;  %v3982_v6 = vld [vmem:[%s7517_s2 + $0x6b8] sm:$0xff] }
 0x402   :  { %2752 = vmatprep.mubr.f32.mxu1 %v5171_v23  ;;  %2887 = vmatpush2.msra.mxu0 %v3927_v54  ;;  %v3981_v23 = vld [vmem:[%s7517_s2 + $0x6b0] sm:$0xff] }
 0x403   :  { %2889 = vmatmul.mubr.f32.vlgmr.msra.gmra.mxu0 %v6414_v39  ;;  %2990 = vmatprep.subr.mxu1 %v3986_v51  ;;  %v3980_v39 = vld [vmem:[%s7517_s2 + $0x6a8] sm:$0xff] }
 0x404   :  { %2894 = vmatprep.mubr.f32.mxu0 %v6433_v3  ;;  %2991 = vmatpush1.msra.mxu1 %v3985_v11  ;;  %v3979_v3 = vld [vmem:[%s7517_s2 + $0x6a0] sm:$0xff] }
 0x405   :  { %2753 = vmatmul.mubr.f32.gmra.mxu1 %v5157_v18  ;;  %2992 = vmatprep.subr.mxu1 %v3984_v46  ;;  %v3978_v18 = vld [vmem:[%s7517_s2 + $0x698] sm:$0xff] }
 0x406   :  { %2993 = vmatpush1.msra.mxu1 %v3983_v61 }
 0x407   :  { %2895 = vmatmul.mubr.f32.gmra.mxu0 %v6422_v7  ;;  %2994 = vmatprep.subr.mxu1 %v3982_v6  ;;  %v3976_v7 = vld [vmem:[%s7517_s2 + $0x688] sm:$0xff] }
 0x408   :  { %2900 = vmatprep.mubr.f32.mxu0 %v6459_v33  ;;  %2995 = vmatpush1.msra.mxu1 %v3981_v23  ;;  %v3975_v33 = vld [vmem:[%s7517_s2 + $0x680] sm:$0xff] }
 0x409   :  { %2996 = vmatprep.subr.mxu1 %v3980_v39 }
 0x40a   :  { %2997 = vmatpush1.msra.mxu1 %v3979_v3 }
 0x40b   :  { %2901 = vmatmul.mubr.f32.gmra.mxu0 %v6450_v2  ;;  %2998 = vmatprep.subr.mxu1 %v3978_v18  ;;  %v3972_v2 = vld [vmem:[%s7517_s2 + $0x668] sm:$0xff] }
 0x40c   :  { %2906 = vmatprep.mubr.f32.mxu0 %v6482_v48  ;;  %2999 = vmatpush1.msra.mxu1 %v3977_v50  ;;  %v3971_v48 = vld [vmem:[%s7517_s2 + $0x660] sm:$0xff] }
 0x40d   :  { %3000 = vmatprep.subr.mxu1 %v3976_v7  ;;  %v3830_v7 = vld [vmem:[%s7516_s3 + $0x3] ss:$8 sm:$0x3] }
 0x40e   :  { %3001 = vmatpush1.msra.mxu1 %v3975_v33 }
 0x40f   :  { %2907 = vmatmul.mubr.f32.gmra.mxu0 %v6470_v44  ;;  %3002 = vmatprep.subr.mxu1 %v3974_v53  ;;  %v3968_v44 = vld [vmem:[%s7517_s2 + $0x648] sm:$0xff] }
 0x410   :  { %3003 = vmatpush1.msra.mxu1 %v3973_v55 }
 0x411   :  { %3004 = vmatprep.subr.mxu1 %v3972_v2  ;;  %v2441_v2 = vrot.slane %v3830_v7, %v5101_v12 }
 0x412   :  { %3005 = vmatpush1.msra.mxu1 %v3971_v48 }
 0x413   :  { %3006 = vmatprep.subr.mxu1 %v3970_v19 }
 0x414   :  { %3007 = vmatpush1.msra.mxu1 %v3969_v14  ;;  %v2437_v14 = vrot.slane %v3830_v7, %v5096_v9 }
 0x415   :  { %3008 = vmatprep.subr.mxu1 %v3968_v44 }
 0x416   :  { %3009 = vmatpush1.msra.mxu1 %v3967_v36 }
 0x417   :  { %3010 = vmatprep.subr.mxu1 %v3966_v57 }
 0x418   :  { %3011 = vmatpush1.msra.mxu1 %v3965_v42 }
 0x419   :  { %3012 = vmatprep.subr.mxu1 %v3964_v40 }
 0x41a   :  { %3013 = vmatpush1.msra.mxu1 %v3963_v58 }
 0x41b   :  { %3014 = vmatprep.subr.mxu1 %v3962_v38 }
 0x41c   :  { %3015 = vmatpush1.msra.mxu1 %v3961_v60 }
 0x41d   :  { %3016 = vmatprep.subr.mxu1 %v3960_v26 }
 0x41e   :  { %3017 = vmatpush1.msra.mxu1 %v3959_v32 }
 0x41f   :  { %3018 = vmatprep.subr.mxu1 %v4022_v31 }
 0x420   :  { %3019 = vmatpush2.msra.mxu1 %v4021_v47 }
 0x421   :  { %3020 = vmatprep.subr.mxu1 %v4020_v15 }
 0x422   :  { %3021 = vmatpush2.msra.mxu1 %v4019_v56 }
 0x423   :  { %3022 = vmatprep.subr.mxu1 %v4018_v63 }
 0x424   :  { %3023 = vmatpush2.msra.mxu1 %v4017_v1 }
 0x425   :  { %3024 = vmatprep.subr.mxu1 %v4016_v52 }
 0x426   :  { %3025 = vmatpush2.msra.mxu1 %v4015_v4 }
 0x427   :  { %3026 = vmatprep.subr.mxu1 %v4014_v10 }
 0x428   :  { %3027 = vmatpush2.msra.mxu1 %v4013_v16 }
 0x429   :  { %3028 = vmatprep.subr.mxu1 %v4012_v17 }
 0x42a   :  { %3029 = vmatpush2.msra.mxu1 %v4011_v0 }
 0x42b   :  { %3030 = vmatprep.subr.mxu1 %v4010_v5 }
 0x42c   :  { %3031 = vmatpush2.msra.mxu1 %v4009_v20  ;;  %v2157_v45 = vpop.f32.mrf.mxu1 }
 0x42d   :  { %3032 = vmatprep.subr.mxu1 %v4008_v62 }
 0x42e   :  { %3033 = vmatpush2.msra.mxu1 %v4007_v24  ;;  %v2159_v54 = vpop.f32.mrf.mxu1 }
 0x42f   :  { %3034 = vmatprep.subr.mxu1 %v4006_v35 }
 0x430   :  { %3035 = vmatpush2.msra.mxu1 %v4005_v25  ;;  %v2163_v51 = vpop.f32.mrf.mxu1 }
 0x431   :  { %3036 = vmatprep.subr.mxu1 %v4004_v28 }
 0x432   :  { %3037 = vmatpush2.msra.mxu1 %v4003_v30  ;;  %v2165_v11 = vpop.f32.mrf.mxu1 }
 0x433   :  { %3038 = vmatprep.subr.mxu1 %v4002_v37 }
 0x434   :  { %3039 = vmatpush2.msra.mxu1 %v4001_v49  ;;  %v2169_v46 = vpop.f32.mrf.mxu1 }
 0x435   :  { %3040 = vmatprep.subr.mxu1 %v4000_v13 }
 0x436   :  { %3041 = vmatpush2.msra.mxu1 %v3999_v22  ;;  %v2246_v61 = vpop.f32.mrf.mxu0  ;;  %v2171_v6 = vpop.f32.mrf.mxu1 }
 0x437   :  { %3042 = vmatprep.subr.mxu1 %v3998_v29  ;;  %v2247_v33 = vadd.f32 %v2246_v61, %v2157_v45 }
 0x438   :  { %3043 = vmatpush2.msra.mxu1 %v3997_v21  ;;  %v2248_v23 = vpop.f32.mrf.mxu0 }
 0x439   :  { %3044 = vmatprep.subr.mxu1 %v3996_v8  ;;  %v2175_v39 = vpop.f32.mrf.mxu1  ;;  %v2249_v55 = vadd.f32 %v2248_v23, %v2159_v54  ;;  %v4023_v23 = vld [vmem:[%s7516_s3 + $0x4] ss:$8 sm:$0x3] }
 0x43a   :  { %3045 = vmatpush2.msra.mxu1 %v3995_v34 }
 0x43b   :  { %3046 = vmatprep.subr.mxu1 %v3994_v41  ;;  %v2177_v18 = vpop.f32.mrf.mxu1 }
 0x43c   :  { %3047 = vmatpush2.msra.mxu1 %v3993_v59 }
 0x43d   :  { %3048 = vmatprep.subr.mxu1 %v3992_v43 }
 0x43e   :  { %3049 = vmatpush2.msra.mxu1 %v3991_v27  ;;  %v2252_v3 = vpop.f32.mrf.mxu0 }
 0x43f   :  { %v2253_v57 = vadd.f32 %v2252_v3, %v2163_v51 }
 0x440   :  { %v2254_v50 = vpop.f32.mrf.mxu0 }
 0x441   :  { %v2255_v58 = vadd.f32 %v2254_v50, %v2165_v11 }
 0x443   :  { %v2258_v48 = vpop.f32.mrf.mxu0 }
 0x444   :  { %v2259_v47 = vadd.f32 %v2258_v48, %v2169_v46  ;;  %v3093_v48 = vrot.slane %v4023_v23, %v5101_v12  ;;  %v4026_v12 = vld [vmem:[%s7515_s0 + $0x8] sm:$0xff] }
 0x445   :  { %v2260_v38 = vpop.f32.mrf.mxu0 }
 0x446   :  { %v2261_v1 = vadd.f32 %v2260_v38, %v2171_v6 }
 0x448   :  { %v2264_v15 = vpop.f32.mrf.mxu0 }
 0x449   :  { %v2265_v5 = vadd.f32 %v2264_v15, %v2175_v39 }
 0x44a   :  { %v2266_v17 = vpop.f32.mrf.mxu0 }
 0x44b   :  { %v2267_v24 = vadd.f32 %v2266_v17, %v2177_v18 }
 0x471   :  { %v2400_v53 = vpop.f32.mrf.mxu1 }
 0x472   :  { %v2423_v19 = vadd.f32 %v2400_v53, %v2247_v33  ;;  %v3089_v33 = vrot.slane %v4023_v23, %v5096_v9 }
 0x473   :  { %v2402_v44 = vpop.f32.mrf.mxu1 }
 0x474   :  { %v2424_v36 = vadd.f32 %v2402_v44, %v2249_v55  ;;  %v2444_v60 = vadd.f32 %v2437_v14, %v2423_v19 }
 0x476   :  { %v2445_v42 = vadd.f32 %v2441_v2, %v2424_v36  ;;  %v2406_v40 = vpop.f32.mrf.mxu1 }
 0x477   :  { %v2425_v26 = vadd.f32 %v2406_v40, %v2253_v57 }
 0x478   :  { %v2408_v32 = vpop.f32.mrf.mxu1  ;;  %3050 = vmatprep.mubr.f32.mxu1 %v2445_v42 }
 0x479   :  { %v2426_v31 = vadd.f32 %v2408_v32, %v2255_v58  ;;  %3051 = vmatmul.mubr.f32.vlgmr.msra.gmra.mxu1 %v2444_v60  ;;  %v2446_v52 = vadd.f32 %v2437_v14, %v2425_v26  ;;  %v4025_v58 = vld [vmem:[%s7515_s0] sm:$0xff] }
 0x47b   :  { %v2447_v56 = vadd.f32 %v2441_v2, %v2426_v31  ;;  %v2412_v63 = vpop.f32.mrf.mxu1 }
 0x47c   :  { %v2427_v4 = vadd.f32 %v2412_v63, %v2259_v47 }
 0x47d   :  { %v2414_v10 = vpop.f32.mrf.mxu1  ;;  %3056 = vmatprep.mubr.f32.mxu1 %v2447_v56 }
 0x47e   :  { %v2428_v16 = vadd.f32 %v2414_v10, %v2261_v1  ;;  %3057 = vmatmul.mubr.f32.gmra.mxu1 %v2446_v52  ;;  %v2448_v20 = vadd.f32 %v2437_v14, %v2427_v4  ;;  %v2647_v49 = vpop.f32.mrf.mxu0 }
 0x480   :  { %v2449_v0 = vadd.f32 %v2441_v2, %v2428_v16  ;;  %v2649_v13 = vpop.f32.mrf.mxu0  ;;  %v4027_v16 = vld [vmem:[%s7515_s0 + $0x10] sm:$0xff] }
 0x481   :  { %v2418_v62 = vpop.f32.mrf.mxu1 }
 0x482   :  { %3062 = vmatprep.mubr.f32.mxu1 %v2449_v0  ;;  %v2429_v35 = vadd.f32 %v2418_v62, %v2265_v5 }
 0x483   :  { %v2420_v25 = vpop.f32.mrf.mxu1  ;;  %3063 = vmatmul.mubr.f32.gmra.mxu1 %v2448_v20 }
 0x484   :  { %v2430_v28 = vadd.f32 %v2420_v25, %v2267_v24  ;;  %v2450_v37 = vadd.f32 %v2437_v14, %v2429_v35  ;;  %v2653_v22 = vpop.f32.mrf.mxu0  ;;  %v4028_v24 = vld [vmem:[%s7515_s0 + $0x18] sm:$0xff] }
 0x486   :  { %v2451_v30 = vadd.f32 %v2441_v2, %v2430_v28  ;;  %v2655_v29 = vpop.f32.mrf.mxu0 }
 0x488   :  { %3068 = vmatprep.mubr.f32.mxu1 %v2451_v30 }
 0x489   :  { %3069 = vmatmul.mubr.f32.gmra.mxu1 %v2450_v37  ;;  %v2659_v8 = vpop.f32.mrf.mxu0 }
 0x48b   :  { %v2661_v41 = vpop.f32.mrf.mxu0 }
 0x48e   :  { %v2665_v43 = vpop.f32.mrf.mxu0 }
 0x490   :  { %v2667_v45 = vpop.f32.mrf.mxu0 }
 0x4b9   :  { %v2736_v21 = vpop.f32.mrf.mxu1 }
 0x4ba   :  { %v2737_v39 = vadd.f32 %v2736_v21, %v2647_v49 }
 0x4bb   :  { %v2738_v34 = vpop.f32.mrf.mxu1 }
 0x4bc   :  { %v2739_v50 = vadd.f32 %v2738_v34, %v2649_v13 }
 0x4bd   :  { %v2742_v59 = vpop.f32.mrf.mxu1 }
 0x4be   :  { %v2743_v19 = vadd.f32 %v2742_v59, %v2653_v22  ;;  %v4030_v59 = vld [vmem:[%s7515_s0 + $0x28] sm:$0xff] }
 0x4bf   :  { %v2744_v27 = vpop.f32.mrf.mxu1 }
 0x4c0   :  { %v2745_v42 = vadd.f32 %v2744_v27, %v2655_v29  ;;  %v4029_v29 = vld [vmem:[%s7515_s0 + $0x20] sm:$0xff] }
 0x4c1   :  { %v2748_v54 = vpop.f32.mrf.mxu1 }
 0x4c2   :  { %v2749_v47 = vadd.f32 %v2748_v54, %v2659_v8 }
 0x4c3   :  { %v2890_v51 = vpop.f32.mrf.mxu0  ;;  %v2750_v11 = vpop.f32.mrf.mxu1 }
 0x4c4   :  { %v2913_v7 = vadd.f32 %v2890_v51, %v2737_v39  ;;  %v2751_v52 = vadd.f32 %v2750_v11, %v2661_v41  ;;  %v4031_v11 = vld [vmem:[%s7515_s0 + $0x30] sm:$0xff] }
 0x4c5   :  { %v2892_v46 = vpop.f32.mrf.mxu0  ;;  %v2754_v61 = vpop.f32.mrf.mxu1 }
 0x4c6   :  { %v2914_v55 = vadd.f32 %v2892_v46, %v2739_v50  ;;  %v2755_v28 = vadd.f32 %v2754_v61, %v2665_v43 }
 0x4c7   :  { %v2896_v6 = vpop.f32.mrf.mxu0  ;;  %v2756_v3 = vpop.f32.mrf.mxu1 }
 0x4c8   :  { %v2915_v40 = vadd.f32 %v2896_v6, %v2743_v19  ;;  %v2757_v13 = vadd.f32 %v2756_v3, %v2667_v45  ;;  %v4032_v6 = vld [vmem:[%s7515_s0 + $0x38] sm:$0xff] }
 0x4c9   :  { %v2898_v18 = vpop.f32.mrf.mxu0 }
 0x4ca   :  { %v2916_v9 = vadd.f32 %v2898_v18, %v2745_v42 }
 0x4cb   :  { %v2902_v14 = vpop.f32.mrf.mxu0 }
 0x4cc   :  { %v2917_v4 = vadd.f32 %v2902_v14, %v2749_v47 }
 0x4cd   :  { %v2904_v32 = vpop.f32.mrf.mxu0 }
 0x4ce   :  { %v2918_v20 = vadd.f32 %v2904_v32, %v2751_v52 }
 0x4cf   :  { %v2908_v10 = vpop.f32.mrf.mxu0 }
 0x4d0   :  { %v2919_v22 = vadd.f32 %v2908_v10, %v2755_v28 }
 0x4d1   :  { %v2910_v49 = vpop.f32.mrf.mxu0 }
 0x4d2   :  { %v2920_v41 = vadd.f32 %v2910_v49, %v2757_v13 }
 0x539   :  { %v3052_v53 = vpop.f32.mrf.mxu1 }
 0x53a   :  { %v3075_v2 = vadd.f32 %v3052_v53, %v2913_v7 }
 0x53b   :  { %v3054_v44 = vpop.f32.mrf.mxu1 }
 0x53c   :  { %v3096_v36 = vadd.f32 %v3089_v33, %v3075_v2  ;;  %v3076_v57 = vadd.f32 %v3054_v44, %v2914_v55 }
 0x53e   :  { %v3104_v38 = vadd.f32 %v4025_v58, %v3096_v36  ;;  %v3097_v60 = vadd.f32 %v3093_v48, %v3076_v57  ;;  %v3058_v26 = vpop.f32.mrf.mxu1 }
 0x53f   :  { %v3077_v31 = vadd.f32 %v3058_v26, %v2915_v40 }
 0x540   :  { %3112 = vst [vmem:[%s7518_s4] sm:$0xff] %v3104_v38  ;;  %v3105_v15 = vadd.f32 %v4026_v12, %v3097_v60  ;;  %v3060_v56 = vpop.f32.mrf.mxu1 }
 0x541   :  { %v3098_v63 = vadd.f32 %v3089_v33, %v3077_v31  ;;  %v3078_v1 = vadd.f32 %v3060_v56, %v2916_v9 }
 0x542   :  { %3113 = vst [vmem:[%s7518_s4 + $0x8] sm:$0xff] %v3105_v15 }
 0x543   :  { %v3106_v17 = vadd.f32 %v4027_v16, %v3098_v63  ;;  %v3099_v0 = vadd.f32 %v3093_v48, %v3078_v1  ;;  %v3064_v5 = vpop.f32.mrf.mxu1 }
 0x544   :  { %v3079_v62 = vadd.f32 %v3064_v5, %v2917_v4 }
 0x545   :  { %3114 = vst [vmem:[%s7518_s4 + $0x10] sm:$0xff] %v3106_v17  ;;  %v3107_v35 = vadd.f32 %v4028_v24, %v3099_v0  ;;  %v3066_v25 = vpop.f32.mrf.mxu1 }
 0x546   :  { %v3100_v30 = vadd.f32 %v3089_v33, %v3079_v62  ;;  %v3080_v37 = vadd.f32 %v3066_v25, %v2918_v20 }
 0x547   :  { %3115 = vst [vmem:[%s7518_s4 + $0x18] sm:$0xff] %v3107_v35 }
 0x548   :  { %v3108_v21 = vadd.f32 %v4029_v29, %v3100_v30  ;;  %v3101_v8 = vadd.f32 %v3093_v48, %v3080_v37 }
 0x549   :  { %v3070_v34 = vpop.f32.mrf.mxu1 }
 0x54a   :  { %3116 = vst [vmem:[%s7518_s4 + $0x20] sm:$0xff] %v3108_v21  ;;  %v3109_v43 = vadd.f32 %v4030_v59, %v3101_v8  ;;  %v3081_v27 = vadd.f32 %v3070_v34, %v2919_v22 }
 0x54b   :  { %v3072_v45 = vpop.f32.mrf.mxu1 }
 0x54c   :  { %3117 = vst [vmem:[%s7518_s4 + $0x28] sm:$0xff] %v3109_v43  ;;  %v3102_v54 = vadd.f32 %v3089_v33, %v3081_v27  ;;  %v3082_v51 = vadd.f32 %v3072_v45, %v2920_v41 }
 0x54e   :  { %v3110_v46 = vadd.f32 %v4031_v11, %v3102_v54  ;;  %v3103_v61 = vadd.f32 %v3093_v48, %v3082_v51 }
 0x550   :  { %3118 = vst [vmem:[%s7518_s4 + $0x30] sm:$0xff] %v3110_v46  ;;  %v3111_v23 = vadd.f32 %v4032_v6, %v3103_v61 }
 0x552   :  { %3119 = vst [vmem:[%s7518_s4 + $0x38] sm:$0xff] %v3111_v23 }

</bundles_post_ra>
